<compile_context>
chip_gen: v6e
topology: v6e:2x2x1
jax: 0.10.0
libtpu: 0.0.40
codegen_flags: <defaults>
</compile_context>

<pallas_src>
import jax
import jax.numpy as jnp
from jax.experimental import pallas as pl
from jax.experimental.pallas import tpu as pltpu


def _bottleneck_kernel(x_ref, w1_ref, b1_ref, w2_ref, b2_ref, w3_ref, b3_ref,
                       o_ref, pad_ref):
    # x_ref : (B, H, W, Cin)          bf16
    # w1_ref: (Cin, width)            bf16  (BN1 scale folded in)
    # w2_ref: (9*width, width)        bf16  (BN2 scale folded in; K=(dy,dx,cin))
    # w3_ref: (width, Cout)           bf16  (BN3 scale folded in)
    # b*_ref: (1, C)                  f32   folded BN bias
    # o_ref : (B, H, W, Cout)         bf16
    # pad_ref: (B, H+2, W+2, width)   bf16  scratch for the 3x3 zero padding
    B, H, W, Cin = x_ref.shape
    width = w1_ref.shape[1]
    Cout = w3_ref.shape[1]
    rows = B * H * W

    x = x_ref[...]                                  # (B, H, W, Cin) bf16
    xm = x.reshape(rows, Cin)

    # ---- conv1 (1x1) + bn1 bias + relu (scale pre-folded into w1) ----
    h1 = jnp.dot(xm, w1_ref[...], preferred_element_type=jnp.float32)
    h1 = jnp.maximum(h1 + b1_ref[...], 0.0).astype(jnp.bfloat16)  # (rows, w) bf16

    # ---- conv2 (3x3, stride 1, pad 1) + bn2 bias + relu ----
    # Zero only the 1-element border (the interior is fully rewritten every
    # step).  Re-done each step so it stays correct if the batch-grid axis is
    # sharded across TensorCores; O((H+W)*width) bf16 stores, negligible.
    pad_ref[:, 0:1, :, :] = jnp.zeros((B, 1, W + 2, width), jnp.bfloat16)
    pad_ref[:, H + 1:H + 2, :, :] = jnp.zeros((B, 1, W + 2, width), jnp.bfloat16)
    pad_ref[:, :, 0:1, :] = jnp.zeros((B, H + 2, 1, width), jnp.bfloat16)
    pad_ref[:, :, W + 1:W + 2, :] = jnp.zeros((B, H + 2, 1, width), jnp.bfloat16)
    pad_ref[:, 1:H + 1, 1:W + 1, :] = h1.reshape(B, H, W, width)

    # im2col: only 3 dx-shifted (sublane-offset) planes are loaded; each is
    # reused for the 3 dy offsets with cheap major-axis slices.  K ordering is
    # (dy, dx, cin) to match w2_ref.
    planes = [pad_ref[:, :, dx:dx + W, :] for dx in range(3)]   # (B,H+2,W,width)
    patches = jnp.concatenate(
        [planes[dx][:, dy:dy + H, :, :].reshape(rows, width)
         for dy in range(3) for dx in range(3)],
        axis=-1)                                    # (rows, 9*width) bf16
    h2 = jnp.dot(patches, w2_ref[...], preferred_element_type=jnp.float32)
    h2 = jnp.maximum(h2 + b2_ref[...], 0.0).astype(jnp.bfloat16)

    # ---- conv3 (1x1) + bn3 bias + identity residual + relu ----
    h3 = jnp.dot(h2, w3_ref[...], preferred_element_type=jnp.float32)
    h3 = h3 + b3_ref[...] + xm.astype(jnp.float32)
    o_ref[...] = jnp.maximum(h3, 0.0).astype(o_ref.dtype).reshape(B, H, W, Cout)


def _fold_bn(gamma, beta, mean, var, eps=1e-5):
    scale = gamma / jnp.sqrt(var + eps)
    bias = beta - mean * scale
    return scale.reshape(1, -1), bias.reshape(1, -1)


def _folded_params(params):
    """Fold BN (inference) scale into conv weights (bf16); bias stays f32."""
    w1, bn1, w2, bn2, w3, bn3 = params
    s1, b1 = _fold_bn(*bn1)
    s2, b2 = _fold_bn(*bn2)
    s3, b3 = _fold_bn(*bn3)
    w1f = (w1 * s1).astype(jnp.bfloat16)        # (Cin, width)
    w2f = (w2 * s2).astype(jnp.bfloat16)        # (3, 3, width, width)
    w3f = (w3 * s3).astype(jnp.bfloat16)        # (width, Cout)
    return w1f, b1, w2f, b2, w3f, b3


def _pick_batch_tile(N, H, W, cin, width, cout,
                     vmem_budget_bytes=24 * 1024 * 1024, target_rows=512):
    """Largest divisor of N giving M >= target_rows under a VMEM budget."""
    def step_bytes(bt):
        rows = bt * H * W
        return (2 * rows * cin * 2                     # input blocks (bf16, x2 buf)
                + 2 * rows * cout * 2                  # output blocks (bf16, x2 buf)
                + bt * (H + 2) * (W + 2) * width * 2   # pad scratch (bf16)
                + rows * 9 * width * 2                 # im2col patches (bf16)
                + 2 * rows * width * 4)                # live f32 intermediates
    bt = min(N, max(1, -(-target_rows // (H * W))))
    while bt > 1 and (N % bt != 0 or step_bytes(bt) > vmem_budget_bytes):
        bt -= 1
    return bt


def bottleneck_forward_nhwc(x_nhwc, folded):
    """NHWC bf16 -> NHWC bf16 fast path (no HBM transpose passes)."""
    w1f, b1, w2f, b2, w3f, b3 = folded
    Cin, width = w1f.shape
    Cout = w3f.shape[1]
    w2flat = w2f.reshape(9 * width, width)          # K ordered (dy, dx, cin)

    x = x_nhwc.astype(jnp.bfloat16)
    N, H, W, _ = x.shape
    assert Cin == Cout, "identity residual requires inplanes == planes*4"
    b_tile = _pick_batch_tile(N, H, W, Cin, width, Cout)

    full = lambda a: pl.BlockSpec(a.shape, lambda n: (0,) * a.ndim)

    flops = 2 * N * H * W * (Cin * width + 9 * width * width + width * Cout)
    bytes_accessed = (
        N * H * W * Cin * 2 + N * H * W * Cout * 2
        + (w1f.size + w2flat.size + w3f.size) * 2
        + (b1.size + b2.size + b3.size) * 4)

    return pl.pallas_call(
        _bottleneck_kernel,
        out_shape=jax.ShapeDtypeStruct((N, H, W, Cout), jnp.bfloat16),
        grid_spec=pltpu.PrefetchScalarGridSpec(
            num_scalar_prefetch=0,
            grid=(N // b_tile,),
            in_specs=[
                pl.BlockSpec((b_tile, H, W, Cin), lambda n: (n, 0, 0, 0)),
                full(w1f), full(b1),
                full(w2flat), full(b2),
                full(w3f), full(b3),
            ],
            out_specs=pl.BlockSpec((b_tile, H, W, Cout),
                                   lambda n: (n, 0, 0, 0)),
            scratch_shapes=[
                pltpu.VMEM((b_tile, H + 2, W + 2, width), jnp.bfloat16)],
        ),
        compiler_params=pltpu.CompilerParams(
            dimension_semantics=("parallel",),
            vmem_limit_bytes=64 * 1024 * 1024),
        cost_estimate=pl.CostEstimate(
            flops=flops, transcendentals=0, bytes_accessed=bytes_accessed),
    )(x, w1f, b1, w2flat, b2, w3f, b3)


@jax.jit
def bottleneck_forward(x_nchw, params):
    """x_nchw: (N, Cin, H, W) float32 -> (N, Cout, H, W) float32.

    Matches the PyTorch module interface; a real pipeline should call
    bottleneck_forward_nhwc directly and stay NHWC/bf16 end-to-end.
    """
    folded = _folded_params(params)
    x = jnp.transpose(x_nchw, (0, 2, 3, 1)).astype(jnp.bfloat16)   # NHWC bf16
    out = bottleneck_forward_nhwc(x, folded)                       # NHWC bf16
    return jnp.transpose(out, (0, 3, 1, 2)).astype(jnp.float32)    # NCHW f32


def _reference_forward(x_nchw, params):
    """Pure-JAX reference using the identical bf16-folded weights."""
    w1f, b1, w2f, b2, w3f, b3 = _folded_params(params)
    f32 = jnp.float32
    x = jnp.transpose(x_nchw, (0, 2, 3, 1)).astype(jnp.bfloat16)
    h1 = jnp.einsum('nhwc,cd->nhwd', x, w1f, preferred_element_type=f32) + b1
    h1 = jnp.maximum(h1, 0.0).astype(jnp.bfloat16)
    N, H, W, width = h1.shape
    h1p = jnp.pad(h1, ((0, 0), (1, 1), (1, 1), (0, 0)))
    acc = jnp.zeros((N, H, W, width), f32)
    for dy in range(3):
        for dx in range(3):
            acc = acc + jnp.einsum(
                'nhwc,cd->nhwd', h1p[:, dy:dy + H, dx:dx + W, :], w2f[dy, dx],
                preferred_element_type=f32)
    h2 = jnp.maximum(acc + b2, 0.0).astype(jnp.bfloat16)
    h3 = jnp.einsum('nhwc,cd->nhwd', h2, w3f, preferred_element_type=f32) + b3
    out = jnp.maximum(h3 + x.astype(f32), 0.0).astype(jnp.bfloat16)
    return jnp.transpose(out, (0, 3, 1, 2)).astype(f32)


def make_params(key, inplanes, planes, base_width=64, groups=1):
    expansion = 4
    width = int(planes * (base_width / 64.0)) * groups
    out_ch = planes * expansion
    ks = jax.random.split(key, 6)

    def bn(k, c):
        kg, kb, km, kv = jax.random.split(k, 4)
        gamma = 1.0 + 0.1 * jax.random.normal(kg, (c,), jnp.float32)
        beta = 0.1 * jax.random.normal(kb, (c,), jnp.float32)
        mean = 0.1 * jax.random.normal(km, (c,), jnp.float32)
        var = 0.5 + jnp.abs(jax.random.normal(kv, (c,), jnp.float32))
        return (gamma, beta, mean, var)

    # Weights in kernel layout: 1x1 as (Cin, Cout); 3x3 as (3, 3, Cin, Cout).
    w1 = 0.1 * jax.random.normal(ks[0], (inplanes, width), jnp.float32)
    w2 = 0.1 * jax.random.normal(ks[1], (3, 3, width, width), jnp.float32)
    w3 = 0.1 * jax.random.normal(ks[2], (width, out_ch), jnp.float32)
    return (w1, bn(ks[3], width), w2, bn(ks[4], width), w3, bn(ks[5], out_ch))


if __name__ == "__main__":
    key = jax.random.PRNGKey(0)
    kx, kp = jax.random.split(key)

    # Small but lane-friendly shapes: planes=32 -> width=32, Cin=Cout=128 so
    # the identity residual is valid and the output channel dim fills a lane.
    N, planes, H, W = 2, 32, 16, 16
    inplanes = planes * 4
    x = jax.random.normal(kx, (N, inplanes, H, W), jnp.float32)   # NCHW input

    params = make_params(kp, inplanes, planes)
    y = bottleneck_forward(x, params)
    jax.block_until_ready(y)

    assert y.shape == (N, inplanes, H, W)
    assert bool(jnp.all(y >= 0.0))              # final ReLU
    assert bool(jnp.all(jnp.isfinite(y)))

    # Numerical self-check vs. a pure-JAX reference with identical bf16-folded
    # weights (only accumulation order differs).
    y_ref = _reference_forward(x, params)
    err = float(jnp.max(jnp.abs(y - y_ref)))
    ref_scale = float(jnp.max(jnp.abs(y_ref))) + 1.0
    assert err / ref_scale < 2e-2, f"kernel/reference mismatch: {err}"
    print("KERNEL_OK")
</pallas_src>

<mosaic_0001>
module attributes {stable_mosaic.version = 11 : i64} {
  func.func @_bottleneck_kernel(%arg0: i32, %arg1: memref<2x16x16x128xbf16, #tpu.memory_space<vmem>>, %arg2: memref<128x32xbf16, #tpu.memory_space<vmem>>, %arg3: memref<1x32xf32, #tpu.memory_space<vmem>>, %arg4: memref<288x32xbf16, #tpu.memory_space<vmem>>, %arg5: memref<1x32xf32, #tpu.memory_space<vmem>>, %arg6: memref<32x128xbf16, #tpu.memory_space<vmem>>, %arg7: memref<1x128xf32, #tpu.memory_space<vmem>>, %arg8: memref<2x16x16x128xbf16, #tpu.memory_space<vmem>>, %arg9: memref<2x18x18x32xbf16, #tpu.memory_space<vmem>>) attributes {dimension_semantics = [#tpu.dimension_semantics<parallel>], iteration_bounds = array<i64: 1>, scalar_prefetch = 0 : i64, scratch_operands = 1 : i64, tpu.core_type = #tpu.core_type<tc>, window_params = [{transform_indices = @transform_0, window_bounds = array<i64: 2, 16, 16, 128>}, {pipeline_mode = #tpu.pipeline_mode<synchronous>, transform_indices = @transform_1, window_bounds = array<i64: 128, 32>}, {pipeline_mode = #tpu.pipeline_mode<synchronous>, transform_indices = @transform_2, window_bounds = array<i64: 1, 32>}, {pipeline_mode = #tpu.pipeline_mode<synchronous>, transform_indices = @transform_3, window_bounds = array<i64: 288, 32>}, {pipeline_mode = #tpu.pipeline_mode<synchronous>, transform_indices = @transform_4, window_bounds = array<i64: 1, 32>}, {pipeline_mode = #tpu.pipeline_mode<synchronous>, transform_indices = @transform_5, window_bounds = array<i64: 32, 128>}, {pipeline_mode = #tpu.pipeline_mode<synchronous>, transform_indices = @transform_6, window_bounds = array<i64: 1, 128>}, {transform_indices = @transform_7, window_bounds = array<i64: 2, 16, 16, 128>}]} {
    %c0 = arith.constant 0 : index
    %c0_0 = arith.constant 0 : index
    %c0_1 = arith.constant 0 : index
    %c0_2 = arith.constant 0 : index
    %0 = vector.load %arg1[%c0, %c0_0, %c0_1, %c0_2] : memref<2x16x16x128xbf16, #tpu.memory_space<vmem>>, vector<2x16x16x128xbf16>
    %1 = vector.shape_cast %0 : vector<2x16x16x128xbf16> to vector<512x128xbf16>
    %c0_3 = arith.constant 0 : index
    %c0_4 = arith.constant 0 : index
    %2 = vector.load %arg2[%c0_3, %c0_4] : memref<128x32xbf16, #tpu.memory_space<vmem>>, vector<128x32xbf16>
    %cst = arith.constant dense<0.000000e+00> : vector<512x32xf32>
    %3 = tpu.matmul %1, %2, %cst {dimension_numbers = #tpu.dot_dimension_numbers<[1], [0], [0], [1], [0, 0, 1, 1], [], []>} : vector<512x128xbf16>, vector<128x32xbf16>, vector<512x32xf32> -> vector<512x32xf32>
    %c0_5 = arith.constant 0 : index
    %c0_6 = arith.constant 0 : index
    %4 = vector.load %arg3[%c0_5, %c0_6] : memref<1x32xf32, #tpu.memory_space<vmem>>, vector<1x32xf32>
    %5 = vector.broadcast %4 : vector<1x32xf32> to vector<512x32xf32>
    %6 = arith.addf %3, %5 : vector<512x32xf32>
    %cst_7 = arith.constant 0.000000e+00 : f32
    %7 = vector.broadcast %cst_7 : f32 to vector<512x32xf32>
    %8 = arith.maximumf %6, %7 : vector<512x32xf32>
    %9 = arith.truncf %8 : vector<512x32xf32> to vector<512x32xbf16>
    %cst_8 = arith.constant 0.000000e+00 : bf16
    %10 = vector.broadcast %cst_8 : bf16 to vector<2x1x18x32xbf16>
    %c0_9 = arith.constant 0 : index
    %c0_10 = arith.constant 0 : index
    %c0_11 = arith.constant 0 : index
    %c0_12 = arith.constant 0 : index
    %11 = vector.load %arg9[%c0_9, %c0_10, %c0_11, %c0_12] : memref<2x18x18x32xbf16, #tpu.memory_space<vmem>>, vector<2x1x18x32xbf16>
    tpu.vector_store %arg9[%c0_9, %c0_10, %c0_11, %c0_12], %10 {strides = array<i32>} : memref<2x18x18x32xbf16, #tpu.memory_space<vmem>>, vector<2x1x18x32xbf16>,
    %cst_13 = arith.constant 0.000000e+00 : bf16
    %12 = vector.broadcast %cst_13 : bf16 to vector<2x1x18x32xbf16>
    %c0_14 = arith.constant 0 : index
    %c17 = arith.constant 17 : index
    %c0_15 = arith.constant 0 : index
    %c0_16 = arith.constant 0 : index
    %13 = vector.load %arg9[%c0_14, %c17, %c0_15, %c0_16] : memref<2x18x18x32xbf16, #tpu.memory_space<vmem>>, vector<2x1x18x32xbf16>
    tpu.vector_store %arg9[%c0_14, %c17, %c0_15, %c0_16], %12 {strides = array<i32>} : memref<2x18x18x32xbf16, #tpu.memory_space<vmem>>, vector<2x1x18x32xbf16>,
    %cst_17 = arith.constant 0.000000e+00 : bf16
    %14 = vector.broadcast %cst_17 : bf16 to vector<2x18x1x32xbf16>
    %c0_18 = arith.constant 0 : index
    %c0_19 = arith.constant 0 : index
    %c0_20 = arith.constant 0 : index
    %c0_21 = arith.constant 0 : index
    %15 = vector.load %arg9[%c0_18, %c0_19, %c0_20, %c0_21] : memref<2x18x18x32xbf16, #tpu.memory_space<vmem>>, vector<2x18x1x32xbf16>
    tpu.vector_store %arg9[%c0_18, %c0_19, %c0_20, %c0_21], %14 {strides = array<i32>} : memref<2x18x18x32xbf16, #tpu.memory_space<vmem>>, vector<2x18x1x32xbf16>,
    %cst_22 = arith.constant 0.000000e+00 : bf16
    %16 = vector.broadcast %cst_22 : bf16 to vector<2x18x1x32xbf16>
    %c0_23 = arith.constant 0 : index
    %c0_24 = arith.constant 0 : index
    %c17_25 = arith.constant 17 : index
    %c0_26 = arith.constant 0 : index
    %17 = vector.load %arg9[%c0_23, %c0_24, %c17_25, %c0_26] : memref<2x18x18x32xbf16, #tpu.memory_space<vmem>>, vector<2x18x1x32xbf16>
    tpu.vector_store %arg9[%c0_23, %c0_24, %c17_25, %c0_26], %16 {strides = array<i32>} : memref<2x18x18x32xbf16, #tpu.memory_space<vmem>>, vector<2x18x1x32xbf16>,
    %18 = vector.shape_cast %9 : vector<512x32xbf16> to vector<2x16x16x32xbf16>
    %c0_27 = arith.constant 0 : index
    %c1 = arith.constant 1 : index
    %c1_28 = arith.constant 1 : index
    %c0_29 = arith.constant 0 : index
    %19 = vector.load %arg9[%c0_27, %c1, %c1_28, %c0_29] : memref<2x18x18x32xbf16, #tpu.memory_space<vmem>>, vector<2x16x16x32xbf16>
    tpu.vector_store %arg9[%c0_27, %c1, %c1_28, %c0_29], %18 {strides = array<i32>} : memref<2x18x18x32xbf16, #tpu.memory_space<vmem>>, vector<2x16x16x32xbf16>,
    %c0_30 = arith.constant 0 : index
    %c0_31 = arith.constant 0 : index
    %c0_32 = arith.constant 0 : index
    %c0_33 = arith.constant 0 : index
    %20 = vector.load %arg9[%c0_30, %c0_31, %c0_32, %c0_33] : memref<2x18x18x32xbf16, #tpu.memory_space<vmem>>, vector<2x18x16x32xbf16>
    %c0_34 = arith.constant 0 : index
    %c0_35 = arith.constant 0 : index
    %c1_36 = arith.constant 1 : index
    %c0_37 = arith.constant 0 : index
    %21 = vector.load %arg9[%c0_34, %c0_35, %c1_36, %c0_37] : memref<2x18x18x32xbf16, #tpu.memory_space<vmem>>, vector<2x18x16x32xbf16>
    %c0_38 = arith.constant 0 : index
    %c0_39 = arith.constant 0 : index
    %c2 = arith.constant 2 : index
    %c0_40 = arith.constant 0 : index
    %22 = vector.load %arg9[%c0_38, %c0_39, %c2, %c0_40] : memref<2x18x18x32xbf16, #tpu.memory_space<vmem>>, vector<2x18x16x32xbf16>
    %23 = vector.extract_strided_slice %20 {offsets = [0, 0, 0, 0], sizes = [2, 16, 16, 32], strides = [1, 1, 1, 1]} : vector<2x18x16x32xbf16> to vector<2x16x16x32xbf16>
    %24 = vector.shape_cast %23 : vector<2x16x16x32xbf16> to vector<512x32xbf16>
    %25 = vector.extract_strided_slice %21 {offsets = [0, 0, 0, 0], sizes = [2, 16, 16, 32], strides = [1, 1, 1, 1]} : vector<2x18x16x32xbf16> to vector<2x16x16x32xbf16>
    %26 = vector.shape_cast %25 : vector<2x16x16x32xbf16> to vector<512x32xbf16>
    %27 = vector.extract_strided_slice %22 {offsets = [0, 0, 0, 0], sizes = [2, 16, 16, 32], strides = [1, 1, 1, 1]} : vector<2x18x16x32xbf16> to vector<2x16x16x32xbf16>
    %28 = vector.shape_cast %27 : vector<2x16x16x32xbf16> to vector<512x32xbf16>
    %29 = vector.extract_strided_slice %20 {offsets = [0, 1, 0, 0], sizes = [2, 16, 16, 32], strides = [1, 1, 1, 1]} : vector<2x18x16x32xbf16> to vector<2x16x16x32xbf16>
    %30 = vector.shape_cast %29 : vector<2x16x16x32xbf16> to vector<512x32xbf16>
    %31 = vector.extract_strided_slice %21 {offsets = [0, 1, 0, 0], sizes = [2, 16, 16, 32], strides = [1, 1, 1, 1]} : vector<2x18x16x32xbf16> to vector<2x16x16x32xbf16>
    %32 = vector.shape_cast %31 : vector<2x16x16x32xbf16> to vector<512x32xbf16>
    %33 = vector.extract_strided_slice %22 {offsets = [0, 1, 0, 0], sizes = [2, 16, 16, 32], strides = [1, 1, 1, 1]} : vector<2x18x16x32xbf16> to vector<2x16x16x32xbf16>
    %34 = vector.shape_cast %33 : vector<2x16x16x32xbf16> to vector<512x32xbf16>
    %35 = vector.extract_strided_slice %20 {offsets = [0, 2, 0, 0], sizes = [2, 16, 16, 32], strides = [1, 1, 1, 1]} : vector<2x18x16x32xbf16> to vector<2x16x16x32xbf16>
    %36 = vector.shape_cast %35 : vector<2x16x16x32xbf16> to vector<512x32xbf16>
    %37 = vector.extract_strided_slice %21 {offsets = [0, 2, 0, 0], sizes = [2, 16, 16, 32], strides = [1, 1, 1, 1]} : vector<2x18x16x32xbf16> to vector<2x16x16x32xbf16>
    %38 = vector.shape_cast %37 : vector<2x16x16x32xbf16> to vector<512x32xbf16>
    %39 = vector.extract_strided_slice %22 {offsets = [0, 2, 0, 0], sizes = [2, 16, 16, 32], strides = [1, 1, 1, 1]} : vector<2x18x16x32xbf16> to vector<2x16x16x32xbf16>
    %40 = vector.shape_cast %39 : vector<2x16x16x32xbf16> to vector<512x32xbf16>
    %41 = tpu.concatenate %24, %26, %28, %30, %32, %34, %36, %38, %40 in 1 : vector<512x32xbf16>, vector<512x32xbf16>, vector<512x32xbf16>, vector<512x32xbf16>, vector<512x32xbf16>, vector<512x32xbf16>, vector<512x32xbf16>, vector<512x32xbf16>, vector<512x32xbf16> -> vector<512x288xbf16>
    %c0_41 = arith.constant 0 : index
    %c0_42 = arith.constant 0 : index
    %42 = vector.load %arg4[%c0_41, %c0_42] : memref<288x32xbf16, #tpu.memory_space<vmem>>, vector<288x32xbf16>
    %cst_43 = arith.constant dense<0.000000e+00> : vector<512x32xf32>
    %43 = tpu.matmul %41, %42, %cst_43 {dimension_numbers = #tpu.dot_dimension_numbers<[1], [0], [0], [1], [0, 0, 1, 1], [], []>} : vector<512x288xbf16>, vector<288x32xbf16>, vector<512x32xf32> -> vector<512x32xf32>
    %c0_44 = arith.constant 0 : index
    %c0_45 = arith.constant 0 : index
    %44 = vector.load %arg5[%c0_44, %c0_45] : memref<1x32xf32, #tpu.memory_space<vmem>>, vector<1x32xf32>
    %45 = vector.broadcast %44 : vector<1x32xf32> to vector<512x32xf32>
    %46 = arith.addf %43, %45 : vector<512x32xf32>
    %cst_46 = arith.constant 0.000000e+00 : f32
    %47 = vector.broadcast %cst_46 : f32 to vector<512x32xf32>
    %48 = arith.maximumf %46, %47 : vector<512x32xf32>
    %49 = arith.truncf %48 : vector<512x32xf32> to vector<512x32xbf16>
    %c0_47 = arith.constant 0 : index
    %c0_48 = arith.constant 0 : index
    %50 = vector.load %arg6[%c0_47, %c0_48] : memref<32x128xbf16, #tpu.memory_space<vmem>>, vector<32x128xbf16>
    %cst_49 = arith.constant dense<0.000000e+00> : vector<512x128xf32>
    %51 = tpu.matmul %49, %50, %cst_49 {dimension_numbers = #tpu.dot_dimension_numbers<[1], [0], [0], [1], [0, 0, 1, 1], [], []>} : vector<512x32xbf16>, vector<32x128xbf16>, vector<512x128xf32> -> vector<512x128xf32>
    %c0_50 = arith.constant 0 : index
    %c0_51 = arith.constant 0 : index
    %52 = vector.load %arg7[%c0_50, %c0_51] : memref<1x128xf32, #tpu.memory_space<vmem>>, vector<1x128xf32>
    %53 = vector.broadcast %52 : vector<1x128xf32> to vector<512x128xf32>
    %54 = arith.addf %51, %53 : vector<512x128xf32>
    %55 = arith.extf %1 : vector<512x128xbf16> to vector<512x128xf32>
    %56 = arith.addf %54, %55 : vector<512x128xf32>
    %cst_52 = arith.constant 0.000000e+00 : f32
    %57 = vector.broadcast %cst_52 : f32 to vector<512x128xf32>
    %58 = arith.maximumf %56, %57 : vector<512x128xf32>
    %59 = arith.truncf %58 : vector<512x128xf32> to vector<512x128xbf16>
    %60 = vector.shape_cast %59 : vector<512x128xbf16> to vector<2x16x16x128xbf16>
    %c0_53 = arith.constant 0 : index
    %c0_54 = arith.constant 0 : index
    %c0_55 = arith.constant 0 : index
    %c0_56 = arith.constant 0 : index
    %61 = vector.load %arg8[%c0_53, %c0_54, %c0_55, %c0_56] : memref<2x16x16x128xbf16, #tpu.memory_space<vmem>>, vector<2x16x16x128xbf16>
    tpu.vector_store %arg8[%c0_53, %c0_54, %c0_55, %c0_56], %60 {strides = array<i32>} : memref<2x16x16x128xbf16, #tpu.memory_space<vmem>>, vector<2x16x16x128xbf16>,
    return
  }
  func.func @transform_0(%arg0: i32) -> (i32, i32, i32, i32) {
    %c0_i32 = arith.constant 0 : i32
    %c0_i32_0 = arith.constant 0 : i32
    %c0_i32_1 = arith.constant 0 : i32
    %c0_i32_2 = arith.constant 0 : i32
    return %arg0, %c0_i32, %c0_i32_0, %c0_i32_1 : i32, i32, i32, i32
  }
  func.func @transform_1(%arg0: i32) -> (i32, i32) {
    %c0_i32 = arith.constant 0 : i32
    %c0_i32_0 = arith.constant 0 : i32
    %c0_i32_1 = arith.constant 0 : i32
    return %c0_i32, %c0_i32_0 : i32, i32
  }
  func.func @transform_2(%arg0: i32) -> (i32, i32) {
    %c0_i32 = arith.constant 0 : i32
    %c0_i32_0 = arith.constant 0 : i32
    %c0_i32_1 = arith.constant 0 : i32
    return %c0_i32, %c0_i32_0 : i32, i32
  }
  func.func @transform_3(%arg0: i32) -> (i32, i32) {
    %c0_i32 = arith.constant 0 : i32
    %c0_i32_0 = arith.constant 0 : i32
    %c0_i32_1 = arith.constant 0 : i32
    return %c0_i32, %c0_i32_0 : i32, i32
  }
  func.func @transform_4(%arg0: i32) -> (i32, i32) {
    %c0_i32 = arith.constant 0 : i32
    %c0_i32_0 = arith.constant 0 : i32
    %c0_i32_1 = arith.constant 0 : i32
    return %c0_i32, %c0_i32_0 : i32, i32
  }
  func.func @transform_5(%arg0: i32) -> (i32, i32) {
    %c0_i32 = arith.constant 0 : i32
    %c0_i32_0 = arith.constant 0 : i32
    %c0_i32_1 = arith.constant 0 : i32
    return %c0_i32, %c0_i32_0 : i32, i32
  }
  func.func @transform_6(%arg0: i32) -> (i32, i32) {
    %c0_i32 = arith.constant 0 : i32
    %c0_i32_0 = arith.constant 0 : i32
    %c0_i32_1 = arith.constant 0 : i32
    return %c0_i32, %c0_i32_0 : i32, i32
  }
  func.func @transform_7(%arg0: i32) -> (i32, i32, i32, i32) {
    %c0_i32 = arith.constant 0 : i32
    %c0_i32_0 = arith.constant 0 : i32
    %c0_i32_1 = arith.constant 0 : i32
    %c0_i32_2 = arith.constant 0 : i32
    return %arg0, %c0_i32, %c0_i32_0, %c0_i32_1 : i32, i32, i32, i32
  }
}

</mosaic_0001>

<bundles_post_ra>
// kernel: bottleneck_forward.1
= control target key start
LH: loop header
LB: loop body
LE: loop exit
PB: predicated region body
PF: predicated region fallthrough
CT: control target
= control target key end

     0   :  { %vm739_vm0 = vcmask 257024   ;;  %vm742_vm1 = vcmask 253952   ;;  %v11349_v30 = vmov 0   ;;  %vm755_vm2 = vsmask.f32 256  ;;  %s7725_s13 = smov 64   ;;  %s11339_s1 = inlined_call_operand.vmem [shape: bf16[128,32], index: 1, kind: input, shape index: {}]   ;;  %s11340_s0 = inlined_call_operand.vmem [shape: bf16[2,16,16,128], index: 0, kind: input, shape index: {}]   ;;  %s11341_s3 = inlined_call_operand.vmem [shape: bf16[288,32], index: 3, kind: input, shape index: {}]   ;;  %s11342_s2 = inlined_call_operand.vmem [shape: f32[1,32], index: 2, kind: input, shape index: {}]   ;;  %s11343_s5 = inlined_call_operand.vmem [shape: bf16[32,128], index: 5, kind: input, shape index: {}]   ;;  %s11344_s4 = inlined_call_operand.vmem [shape: f32[1,32], index: 4, kind: input, shape index: {}]   ;;  %s11345_s6 = inlined_call_operand.vmem [shape: f32[1,128], index: 6, kind: input, shape index: {}]   ;;  %s11346_s7 = inlined_call_operand.vmem [shape: bf16[2,16,16,128], index: 7, kind: output, shape index: {}]  }
   0x1   :  { %v7544_v0 = vld [vmem:[%s11339_s1 + $0x38] sm:$0xff]   ;;  %v7545_v1 = vld [vmem:[%s11339_s1 + $0x30] sm:$0xff]   ;;  %v7546_v2 = vld [vmem:[%s11339_s1 + $0x28] sm:$0xff]   ;;  %748 = vst.msk [vmem:[#allocation2 + $0xcc] sm:$0xf] %vm739_vm0, %v11349_v30  ;;  %v11434_v36 = vmov 0 }
   0x2   :  { %7308 = vmatprep.subr.bf16.mxu0 %v7544_v0  ;;  %7524 = vmatprep.subr.bf16.mxu1 %v7544_v0  ;;  %v7547_v3 = vld [vmem:[%s11339_s1 + $0x20] sm:$0xff]   ;;  %v7548_v6 = vld [vmem:[%s11339_s1 + $0x18] sm:$0xff]   ;;  %v7549_v7 = vld [vmem:[%s11339_s1 + $0x10] sm:$0xff]   ;;  %749 = vst.msk [vmem:[#allocation2 + $0xd0] sm:$0xf] %vm739_vm0, %v11349_v30  ;;  %vm3015_vm6 = vcmask 1042432  }
   0x3   :  { %7309 = vmatpush3.bf16.msra.mxu0 %v7544_v0  ;;  %7532 = vmatpush3.bf16.msra.mxu1 %v7544_v0  ;;  %v27_v4 = vld [vmem:[%s11340_s0] sm:$0xff]   ;;  %v7550_v8 = vld [vmem:[%s11339_s1 + $0x8] sm:$0xff]   ;;  %v31_v12 = vld [vmem:[%s11340_s0 + $0x10] sm:$0xff]   ;;  %740 = vst.msk [vmem:[#allocation2] sm:$0xf] %vm739_vm0, %v11349_v30  ;;  %vm3016_vm7 = vcmask 1046532  }
   0x4   :  { %7310 = vmatprep.subr.bf16.mxu0 %v7545_v1  ;;  %7525 = vmatprep.subr.bf16.mxu1 %v7545_v1  ;;  %v59_v5 = vld [vmem:[%s11340_s0 + $0x80] sm:$0xff]   ;;  %v29_v10 = vld [vmem:[%s11340_s0 + $0x8] sm:$0xff]   ;;  %v63_v13 = vld [vmem:[%s11340_s0 + $0x90] sm:$0xff]   ;;  %741 = vst.msk [vmem:[#allocation2 + $0x4] sm:$0xf] %vm739_vm0, %v11349_v30  ;;  %v11437_v63 = vmov 0 }
   0x5   :  { %7324 = vmatprep.mubr.bf16.mxu0 %v27_v4  ;;  %7356 = vmatprep.mubr.bf16.mxu1 %v59_v5  ;;  %v7551_v9 = vld [vmem:[%s11339_s1] sm:$0xff]   ;;  %v61_v11 = vld [vmem:[%s11340_s0 + $0x88] sm:$0xff]   ;;  %v33_v14 = vld [vmem:[%s11340_s0 + $0x18] sm:$0xff]   ;;  %743 = vst.msk [vmem:[#allocation2 + $0x8] sm:$0x1] %vm742_vm1, %v11349_v30  ;;  %s7726_s14 = smov 32  }
   0x6   :  { %v65_v15 = vld [vmem:[%s11340_s0 + $0x98] sm:$0xff]   ;;  %v35_v16 = vld [vmem:[%s11340_s0 + $0x20] sm:$0xff]   ;;  %v37_v18 = vld [vmem:[%s11340_s0 + $0x28] sm:$0xff]   ;;  %744 = vst.msk [vmem:[#allocation2 + $0xd8] sm:$0xf] %vm739_vm0, %v11349_v30  ;;  %s7727_s15 = smov 96  }
   0x7   :  { %7311 = vmatpush3.bf16.msra.mxu0 %v7545_v1  ;;  %7533 = vmatpush3.bf16.msra.mxu1 %v7545_v1  ;;  %v67_v17 = vld [vmem:[%s11340_s0 + $0xa0] sm:$0xff]   ;;  %v69_v19 = vld [vmem:[%s11340_s0 + $0xa8] sm:$0xff]   ;;  %v39_v20 = vld [vmem:[%s11340_s0 + $0x30] sm:$0xff]   ;;  %745 = vst.msk [vmem:[#allocation2 + $0xdc] sm:$0xf] %vm739_vm0, %v11349_v30  ;;  %vm4122_vm15 = vcmask 261120  }
   0x8   :  { %7312 = vmatprep.subr.bf16.mxu0 %v7546_v2  ;;  %7526 = vmatprep.subr.bf16.mxu1 %v7546_v2  ;;  %v41_v21 = vld [vmem:[%s11340_s0 + $0x38] sm:$0xff]   ;;  %v43_v22 = vld [vmem:[%s11340_s0 + $0x40] sm:$0xff]   ;;  %v45_v23 = vld [vmem:[%s11340_s0 + $0x48] sm:$0xff]   ;;  %746 = vst.msk [vmem:[#allocation2 + $0xe0] sm:$0x1] %vm742_vm1, %v11349_v30 }
   0x9   :  { %v47_v24 = vld [vmem:[%s11340_s0 + $0x50] sm:$0xff]   ;;  %v49_v25 = vld [vmem:[%s11340_s0 + $0x58] sm:$0xff]   ;;  %v51_v26 = vld [vmem:[%s11340_s0 + $0x60] sm:$0xff]   ;;  %750 = vst.msk [vmem:[#allocation2 + $0xd4] sm:$0x1] %vm742_vm1, %v11349_v30 }
   0xa   :  { %v53_v27 = vld [vmem:[%s11340_s0 + $0x68] sm:$0xff]   ;;  %v55_v28 = vld [vmem:[%s11340_s0 + $0x70] sm:$0xff]   ;;  %v57_v29 = vld [vmem:[%s11340_s0 + $0x78] sm:$0xff]   ;;  %751 = vst.msk [vmem:[#allocation2 + $0x1a4] sm:$0xf] %vm739_vm0, %v11349_v30 }
   0xb   :  { %7313 = vmatpush3.bf16.msra.mxu0 %v7546_v2  ;;  %7534 = vmatpush3.bf16.msra.mxu1 %v7546_v2  ;;  %752 = vst.msk [vmem:[#allocation2 + $0x1a8] sm:$0xf] %vm739_vm0, %v11349_v30  ;;  %vm865_vm3 = vsmask.f32 7938  ;;  %vm7885_vm4 = vmand %vm742_vm1, %vm755_vm2  ;;  %v763_v32 = vld [vmem:[#allocation2 + $0x18] sm:$0x1] }
   0xc   :  { %7314 = vmatprep.subr.bf16.mxu0 %v7547_v3  ;;  %7527 = vmatprep.subr.bf16.mxu1 %v7547_v3  ;;  %753 = vst.msk [vmem:[#allocation2 + $0x1ac] sm:$0x1] %vm742_vm1, %v11349_v30  ;;  %v817_v33 = vld [vmem:[#allocation2 + $0xf0] sm:$0x1]  ;;  %v764_v34 = vsel %vm7885_vm4, 0, %v763_v32  ;;  %vm7895_vm5 = vmand %vm742_vm1, %vm865_vm3  ;;  %vm4219_vm1 = vcmask 523264  }
   0xd   :  { %v818_v35 = vsel %vm7885_vm4, 0, %v817_v33  ;;  %v11435_v36 = vsel %vm7895_vm5, 4294967295, %v11434_v36  ;;  %v757_v37 = vld [vmem:[#allocation2] sm:$0x1]  ;;  %765 = vst [vmem:[#allocation2 + $0x18] sm:$0x1] %v764_v34  ;;  %vm7919_vm8 = vmor %vm3015_vm6, %vm3016_vm7 }
   0xe   :  { %11436 = vst [vmem:[#allocation3_spill] sm:$0xff] %v11435_v36  ;;  %819 = vst [vmem:[#allocation2 + $0xf0] sm:$0x1] %v818_v35  ;;  %v760_v38 = vld [vmem:[#allocation2 + $0xc] sm:$0x1]  ;;  %v758_v39 = vsel %vm7885_vm4, 0, %v757_v37 }
   0xf   :  { %7315 = vmatpush3.bf16.msra.mxu0 %v7547_v3  ;;  %7535 = vmatpush3.bf16.msra.mxu1 %v7547_v3  ;;  %v761_v40 = vsel %vm7885_vm4, 0, %v760_v38  ;;  %v814_v41 = vld [vmem:[#allocation2 + $0xe4] sm:$0x1]  ;;  %v867_v42 = vld [vmem:[#allocation2 + $0x8] sm:$0x1]  ;;  %v11438_v63 = vsel %vm7919_vm8, 4294967295, %v11437_v63  ;;  %vm8072_vm13 = vmand %vm739_vm0, %vm865_vm3 }
  0x10   :  { %7316 = vmatprep.subr.bf16.mxu0 %v7548_v6  ;;  %7528 = vmatprep.subr.bf16.mxu1 %v7548_v6  ;;  %759 = vst [vmem:[#allocation2] sm:$0x1] %v758_v39  ;;  %762 = vst [vmem:[#allocation2 + $0xc] sm:$0x1] %v761_v40  ;;  %v815_v43 = vsel %vm7885_vm4, 0, %v814_v41  ;;  %v868_v44 = vsel %vm7895_vm5, 0, %v867_v42 }
  0x11   :  { %816 = vst [vmem:[#allocation2 + $0xe4] sm:$0x1] %v815_v43  ;;  %v873_v45 = vld [vmem:[#allocation2 + $0x20] sm:$0x1]  ;;  %869 = vst [vmem:[#allocation2 + $0x8] sm:$0x1] %v868_v44 }
  0x12   :  { %v874_v46 = vsel %vm7895_vm5, 0, %v873_v45  ;;  %v808_v47 = vld [vmem:[#allocation2 + $0xcc] sm:$0x1]  ;;  %v927_v49 = vld [vmem:[#allocation2 + $0xf8] sm:$0x1]  ;;  %11439 = vst [vmem:[#allocation4_spill] sm:$0xff] %v11438_v63 }
  0x13   :  { %7317 = vmatpush3.bf16.msra.mxu0 %v7548_v6  ;;  %7536 = vmatpush3.bf16.msra.mxu1 %v7548_v6  ;;  %875 = vst [vmem:[#allocation2 + $0x20] sm:$0x1] %v874_v46  ;;  %v809_v48 = vsel %vm7885_vm4, 0, %v808_v47  ;;  %v928_v50 = vsel %vm7895_vm5, 0, %v927_v49  ;;  %v870_v51 = vld [vmem:[#allocation2 + $0x14] sm:$0x1] }
  0x14   :  { %7318 = vmatprep.subr.bf16.mxu0 %v7549_v7  ;;  %7529 = vmatprep.subr.bf16.mxu1 %v7549_v7  ;;  %810 = vst [vmem:[#allocation2 + $0xcc] sm:$0x1] %v809_v48  ;;  %929 = vst [vmem:[#allocation2 + $0xf8] sm:$0x1] %v928_v50  ;;  %v2005_v52 = vld [vmem:[#allocation2 + $0x4] sm:$0xf] }
  0x15   :  { %v811_v53 = vld [vmem:[#allocation2 + $0xd8] sm:$0x1]  ;;  %v871_v54 = vsel %vm7895_vm5, 0, %v870_v51  ;;  %v924_v55 = vld [vmem:[#allocation2 + $0xec] sm:$0x1]  ;;  %v3020_v56 = vrot.slane %v2005_v52, 5 }
  0x16   :  { %872 = vst [vmem:[#allocation2 + $0x14] sm:$0x1] %v871_v54  ;;  %v925_v57 = vsel %vm7895_vm5, 0, %v924_v55  ;;  %v812_v59 = vsel %vm7885_vm4, 0, %v811_v53  ;;  %v2112_v60 = vld [vmem:[#allocation2] sm:$0xe] }
  0x17   :  { %7319 = vmatpush3.bf16.msra.mxu0 %v7549_v7  ;;  %7537 = vmatpush3.bf16.msra.mxu1 %v7549_v7  ;;  %926 = vst [vmem:[#allocation2 + $0xec] sm:$0x1] %v925_v57  ;;  %v3022_v61 = vrot.slane %v3020_v56, 4  ;;  %813 = vst [vmem:[#allocation2 + $0xd8] sm:$0x1] %v812_v59  ;;  %v6587_v0 = vrot.slane %v2112_v60, 9 }
  0x18   :  { %7320 = vmatprep.subr.bf16.mxu0 %v7550_v8  ;;  %7530 = vmatprep.subr.bf16.mxu1 %v7550_v8  ;;  %v2076_v58 = vld [vmem:[#allocation2 + $0x8] sm:$0x1]  ;;  %v921_v1 = vld [vmem:[#allocation2 + $0xe0] sm:$0x1]  ;;  %v7923_v3 = vld [vmem:[#allocation2 + $0xd0] sm:$0xf] }
  0x19   :  { %v3023_v62 = vrot.slane %v2076_v58, 5  ;;  %v922_v5 = vsel %vm7895_vm5, 0, %v921_v1  ;;  %v3021_v7 = vsel %vm7919_vm8, %v6587_v0, %v3020_v56  ;;  %vm2148_vm9 = vsmask.f32 3328  ;;  %v918_v41 = vld [vmem:[#allocation2 + $0xd4] sm:$0x1] }
  0x1a   :  { %923 = vst [vmem:[#allocation2 + $0xe0] sm:$0x1] %v922_v5  ;;  %vm2149_vm10 = vsmask.f32 7440  ;;  %v3320_v32 = vshll.u32 %v7923_v3, 16  ;;  %v3324_v33 = vshrl.u32 %v7923_v3, 16 }
  0x1b   :  { %7321 = vmatpush3.bf16.msra.mxu0 %v7550_v8  ;;  %7538 = vmatpush3.bf16.msra.mxu1 %v7550_v8  ;;  %v2038_v2 = vld [vmem:[#allocation2 + $0xcc] sm:$0xf]  ;;  %v3024_v4 = vsel %vm7919_vm8, %v3022_v61, %v3023_v62  ;;  %v2004_v8 = vld [vmem:[#allocation2] sm:$0xf]  ;;  %vm7948_vm11 = vmor %vm2148_vm9, %vm2149_vm10  ;;  %v919_v46 = vsel %vm7895_vm5, 0, %v918_v41 }
  0x1c   :  { %7322 = vmatprep.subr.bf16.mxu0 %v7551_v9  ;;  %7531 = vmatprep.subr.bf16.mxu1 %v7551_v9  ;;  %v6725_v6 = vcombine.low %v2038_v2, %v7923_v3  ;;  %v879_v47 = vld [vmem:[#allocation2 + $0x38] sm:$0x1]  ;;  %v823_v48 = vld [vmem:[#allocation2 + $0x108] sm:$0x1]  ;;  %v876_v49 = vld [vmem:[#allocation2 + $0x2c] sm:$0x1] }
  0x1d   :  { %920 = vst [vmem:[#allocation2 + $0xd4] sm:$0x1] %v919_v46  ;;  %v880_v51 = vsel %vm7895_vm5, 0, %v879_v47  ;;  %v877_v53 = vsel %vm7895_vm5, 0, %v876_v49  ;;  %v3326_v60 = vrot.slane %v3324_v33, 4 }
  0x1e   :  { %4012 = vrot.lane.b32.xlu0 %v6725_v6, %s7725_s13  ;;  %v2040_v55 = vld [vmem:[#allocation2 + $0xd8] sm:$0xf]  ;;  %881 = vst [vmem:[#allocation2 + $0x38] sm:$0x1] %v880_v51  ;;  %878 = vst [vmem:[#allocation2 + $0x2c] sm:$0x1] %v877_v53 }
  0x1f   :  { %7323 = vmatpush3.bf16.msra.mxu0 %v7551_v9  ;;  %7539 = vmatpush3.bf16.msra.mxu1 %v7551_v9  ;;  %v6687_v9 = vcombine.low %v3021_v7, %v3024_v4  ;;  %v2536_v57 = vshrl.u32 %v2040_v55, 16  ;;  %v820_v1 = vld [vmem:[#allocation2 + $0xfc] sm:$0x1]  ;;  %v778_v47 = vld [vmem:[#allocation2 + $0x54] sm:$0x1] }
  0x20   :  { %4884 = vmatprep.subr.bf16.mxu1 %v11349_v30  ;;  %v821_v7 = vsel %vm7885_vm4, 0, %v820_v1  ;;  %v891_v49 = vld [vmem:[#allocation2 + $0x68] sm:$0x1]  ;;  %v888_v53 = vld [vmem:[#allocation2 + $0x5c] sm:$0x1]  ;;  %v7580_v1 = vld [vmem:[%s11341_s3 + $0x80] sm:$0xff]  }
  0x21   :  { %3762 = vrot.lane.b32.xlu1 %v6687_v9, %s7725_s13  ;;  %v2538_v4 = vrot.slane %v2536_v57, 4  ;;  %822 = vst [vmem:[#allocation2 + $0xfc] sm:$0x1] %v821_v7  ;;  %v892_v51 = vsel %vm7895_vm5, 0, %v891_v49  ;;  %v784_v57 = vld [vmem:[#allocation2 + $0x6c] sm:$0x1] }
  0x22   :  { %7325 = vmatmul.mubr.bf16.vlgmr.msra.gmra.mxu0 %v29_v10  ;;  %7357 = vmatmul.mubr.bf16.vlgmr.msra.gmra.mxu1 %v61_v11  ;;  %v2152_v10 = vshrl.u32 %v2004_v8, 16  ;;  %v2161_v11 = vshll.u32 %v2005_v52, 16  ;;  %893 = vst [vmem:[#allocation2 + $0x68] sm:$0x1] %v892_v51  ;;  %v903_v7 = vld [vmem:[#allocation2 + $0x98] sm:$0x1] }
  0x23   :  { %7328 = vmatprep.mubr.bf16.mxu0 %v31_v12  ;;  %7360 = vmatprep.mubr.bf16.mxu1 %v63_v13  ;;  %v7933_v12 = vld [vmem:[#allocation2 + $0xdc] sm:$0xf]  ;;  %vm1135_vm12 = vsmask.f32 4368 }
  0x24   :  { %v3132_v13 = vrot.slane %v7933_v12, 5  ;;  %v2545_v59 = vshll.u32 %v7933_v12, 16  ;;  %v2549_v0 = vshrl.u32 %v7933_v12, 16  ;;  %vm8100_vm14 = vmor %vm755_vm2, %vm1135_vm12  ;;  %vm4284_vm2 = vcmask 785408  }
  0x26   :  { %v2547_v6 = vrot.slane %v2545_v59, 5  ;;  %v2551_v9 = vrot.slane %v2549_v0, 4  ;;  %v785_v59 = vsel %vm7885_vm4, 0, %v784_v57 }
  0x27   :  { %786 = vst [vmem:[#allocation2 + $0x6c] sm:$0x1] %v785_v59 }
  0x28   :  { %v2552_v12 = vor.u32 %v2551_v9, %v2547_v6  ;;  %v900_v9 = vld [vmem:[#allocation2 + $0x8c] sm:$0x1] }
  0x2a   :  { %7329 = vmatmul.mubr.bf16.gmra.mxu0 %v33_v14  ;;  %7361 = vmatmul.mubr.bf16.gmra.mxu1 %v65_v15  ;;  %v2155_v14 = vshll.u32 %v2004_v8, 16  ;;  %v769_v15 = vld [vmem:[#allocation2 + $0x30] sm:$0x1] }
  0x2b   :  { %7332 = vmatprep.mubr.bf16.mxu0 %v35_v16  ;;  %7364 = vmatprep.mubr.bf16.mxu1 %v67_v17  ;;  %v3311_v16 = vshrl.u32 %v2038_v2, 16  ;;  %v2171_v17 = vshll.u32 %v2076_v58, 16  ;;  %v2539_v58 = vshll.u32 %v2040_v55, 16  ;;  %v7579_v55 = vld [vmem:[%s11341_s3 + $0x88] sm:$0xff]  }
  0x2c   :  { %7388 = vmatprep.subr.bf16.mxu0 %v7579_v55 }
  0x2d   :  { %v3313_v37 = vrot.slane %v3311_v16, 4  ;;  %v2173_v45 = vrot.slane %v2171_v17, 5  ;;  %v2541_v5 = vrot.slane %v2539_v58, 5  ;;  %v933_v16 = vld [vmem:[#allocation2 + $0x110] sm:$0x1]  ;;  %7389 = vmatpush3.bf16.msra.mxu0 %v7579_v55 }
  0x2e   :  { %7390 = vmatprep.subr.bf16.mxu0 %v7580_v1 }
  0x31   :  { %7391 = vmatpush3.bf16.msra.mxu0 %v7580_v1 }
  0x32   :  { %7333 = vmatmul.mubr.bf16.gmra.mxu0 %v37_v18  ;;  %7365 = vmatmul.mubr.bf16.gmra.mxu1 %v69_v19  ;;  %v2165_v18 = vshrl.u32 %v2005_v52, 16  ;;  %v770_v19 = vsel %vm7885_vm4, 0, %v769_v15  ;;  %v824_v52 = vsel %vm7885_vm4, 0, %v823_v48  ;;  %v7970_v15 = vld [vmem:[#allocation2 + $0xd4] sm:$0x1]  ;;  %v779_v48 = vsel %vm7885_vm4, 0, %v778_v47 }
  0x33   :  { %7336 = vmatprep.mubr.bf16.mxu0 %v39_v20  ;;  %v766_v20 = vld [vmem:[#allocation2 + $0x24] sm:$0x1]  ;;  %771 = vst [vmem:[#allocation2 + $0x30] sm:$0x1] %v770_v19  ;;  %825 = vst [vmem:[#allocation2 + $0x108] sm:$0x1] %v824_v52 }
  0x34   :  { %v2167_v35 = vrot.slane %v2165_v18, 4  ;;  %780 = vst [vmem:[#allocation2 + $0x54] sm:$0x1] %v779_v48  ;;  %v73_v52 = vld [vmem:[%s11340_s0 + $0xb8] sm:$0xff]  }
  0x3a   :  { %7337 = vmatmul.mubr.bf16.gmra.mxu0 %v41_v21  ;;  %v3314_v21 = vshll.u32 %v2038_v2, 16 }
  0x3b   :  { %7340 = vmatprep.mubr.bf16.mxu0 %v43_v22  ;;  %v2154_v22 = vrot.slane %v2152_v10, 4 }
  0x3c   :  { %v3316_v38 = vrot.slane %v3314_v21, 5  ;;  %v934_v21 = vsel %vm7895_vm5, 0, %v933_v16  ;;  %v909_v16 = vld [vmem:[#allocation2 + $0xb0] sm:$0x1] }
  0x3d   :  { %935 = vst [vmem:[#allocation2 + $0x110] sm:$0x1] %v934_v21  ;;  %v77_v21 = vld [vmem:[%s11340_s0 + $0xc8] sm:$0xff]  }
  0x3e   :  { %v3317_v61 = vor.u32 %v3316_v38, %v3313_v37  ;;  %v930_v38 = vld [vmem:[#allocation2 + $0x104] sm:$0x1] }
  0x42   :  { %7341 = vmatmul.mubr.bf16.gmra.mxu0 %v45_v23  ;;  %v2163_v23 = vrot.slane %v2161_v11, 5  ;;  %v2542_v11 = vor.u32 %v2541_v5, %v2538_v4  ;;  %v790_v5 = vld [vmem:[#allocation2 + $0x84] sm:$0x1] }
  0x43   :  { %7344 = vmatprep.mubr.bf16.mxu0 %v47_v24  ;;  %v767_v24 = vsel %vm7885_vm4, 0, %v766_v20  ;;  %v3330_v20 = vshll.u32 %v7970_v15, 16 }
  0x44   :  { %768 = vst [vmem:[#allocation2 + $0x24] sm:$0x1] %v767_v24  ;;  %v2168_v44 = vor.u32 %v2167_v35, %v2163_v23  ;;  %v2543_v17 = vrot.slane %v2542_v11, 4  ;;  %v2553_v24 = vrot.slane %v2552_v12, 4  ;;  %v799_v11 = vld [vmem:[#allocation2 + $0xa8] sm:$0x1] }
  0x46   :  { %v2169_v56 = vrot.slane %v2168_v44, 4 }
  0x48   :  { %v2174_v2 = vsel %vm7948_vm11, %v2169_v56, %v2173_v45  ;;  %v781_v45 = vld [vmem:[#allocation2 + $0x60] sm:$0x1]  ;;  %v787_v56 = vld [vmem:[#allocation2 + $0x78] sm:$0x1] }
  0x49   :  { %v782_v46 = vsel %vm7885_vm4, 0, %v781_v45  ;;  %v788_v58 = vsel %vm7885_vm4, 0, %v787_v56 }
  0x4a   :  { %7345 = vmatmul.mubr.bf16.gmra.mxu0 %v49_v25  ;;  %v2130_v25 = vld [vmem:[#allocation2 + $0xd8] sm:$0xe]  ;;  %783 = vst [vmem:[#allocation2 + $0x60] sm:$0x1] %v782_v46  ;;  %789 = vst [vmem:[#allocation2 + $0x78] sm:$0x1] %v788_v58 }
  0x4b   :  { %7348 = vmatprep.mubr.bf16.mxu0 %v51_v26  ;;  %v3134_v26 = vrot.slane %v3132_v13, 4 }
  0x52   :  { %7349 = vmatmul.mubr.bf16.gmra.mxu0 %v53_v27  ;;  %v2094_v27 = vld [vmem:[#allocation2 + $0xe0] sm:$0x1] }
  0x53   :  { %7352 = vmatprep.mubr.bf16.mxu0 %v55_v28  ;;  %v6603_v28 = vrot.slane %v2130_v25, 9  ;;  %v3135_v34 = vrot.slane %v2094_v27, 5  ;;  %v2555_v10 = vshll.u32 %v2094_v27, 16  ;;  %v772_v27 = vld [vmem:[#allocation2 + $0x3c] sm:$0x1] }
  0x55   :  { %v3133_v39 = vsel %vm7919_vm8, %v6603_v28, %v3132_v13  ;;  %v3136_v42 = vsel %vm7919_vm8, %v3134_v26, %v3135_v34  ;;  %v3322_v13 = vrot.slane %v3320_v32, 5  ;;  %v2557_v18 = vrot.slane %v2555_v10, 5 }
  0x56   :  { %v6703_v50 = vcombine.low %v3133_v39, %v3136_v42  ;;  %v3332_v28 = vrot.slane %v3330_v20, 5  ;;  %v931_v39 = vsel %vm7895_vm5, 0, %v930_v38  ;;  %v885_v42 = vld [vmem:[#allocation2 + $0x50] sm:$0x1]  ;;  %v901_v10 = vsel %vm7895_vm5, 0, %v900_v9 }
  0x57   :  { %v3327_v19 = vor.u32 %v3326_v60, %v3322_v13  ;;  %v2558_v32 = vsel %vm7948_vm11, %v2553_v24, %v2557_v18  ;;  %932 = vst [vmem:[#allocation2 + $0x104] sm:$0x1] %v931_v39  ;;  %v886_v44 = vsel %vm7895_vm5, 0, %v885_v42  ;;  %v897_v60 = vld [vmem:[#allocation2 + $0x80] sm:$0x1] }
  0x58   :  { %3794 = vrot.lane.b32.xlu1 %v6703_v50, %s7725_s13  ;;  %887 = vst [vmem:[#allocation2 + $0x50] sm:$0x1] %v886_v44  ;;  %v71_v50 = vld [vmem:[%s11340_s0 + $0xb0] sm:$0xff]   ;;  %902 = vst [vmem:[#allocation2 + $0x8c] sm:$0x1] %v901_v10  ;;  %v75_v18 = vld [vmem:[%s11340_s0 + $0xc0] sm:$0xff]  }
  0x59   :  { %v3328_v25 = vrot.slane %v3327_v19, 4  ;;  %7368 = vmatprep.mubr.bf16.mxu1 %v71_v50  ;;  %v906_v19 = vld [vmem:[#allocation2 + $0xa4] sm:$0x1]  ;;  %v802_v24 = vld [vmem:[#allocation2 + $0xb4] sm:$0x1] }
  0x5a   :  { %7353 = vmatmul.mubr.bf16.gmra.mxu0 %v57_v29  ;;  %v2157_v29 = vrot.slane %v2155_v14, 5  ;;  %v3318_v14 = vrot.slane %v3317_v61, 4  ;;  %7369 = vmatmul.mubr.bf16.gmra.mxu1 %v73_v52  ;;  %v898_v61 = vsel %vm7895_vm5, 0, %v897_v60  ;;  %v907_v20 = vsel %vm7895_vm5, 0, %v906_v19  ;;  %v912_v42 = vld [vmem:[#allocation2 + $0xbc] sm:$0x1] }
  0x5b   :  { %v3333_v35 = vsel %vm7948_vm11, %v3328_v25, %v3332_v28  ;;  %899 = vst [vmem:[#allocation2 + $0x80] sm:$0x1] %v898_v61  ;;  %908 = vst [vmem:[#allocation2 + $0xa4] sm:$0x1] %v907_v20  ;;  %7372 = vmatprep.mubr.bf16.mxu1 %v75_v18  ;;  %v803_v25 = vsel %vm7885_vm4, 0, %v802_v24  ;;  %v913_v46 = vsel %vm7895_vm5, 0, %v912_v42 }
  0x5c   :  { %v2158_v40 = vor.u32 %v2157_v29, %v2154_v22  ;;  %v775_v22 = vld [vmem:[#allocation2 + $0x48] sm:$0x1]  ;;  %v773_v29 = vsel %vm7885_vm4, 0, %v772_v27  ;;  %v3323_v33 = vsel %vm7948_vm11, %v3318_v14, %v3322_v13  ;;  %v800_v13 = vsel %vm7885_vm4, 0, %v799_v11  ;;  %v796_v14 = vld [vmem:[#allocation2 + $0x9c] sm:$0x1] }
  0x5d   :  { %v776_v26 = vsel %vm7885_vm4, 0, %v775_v22  ;;  %774 = vst [vmem:[#allocation2 + $0x3c] sm:$0x1] %v773_v29  ;;  %v6727_v37 = vcombine.low %v3323_v33, %v3333_v35  ;;  %801 = vst [vmem:[#allocation2 + $0xa8] sm:$0x1] %v800_v13  ;;  %v797_v12 = vsel %vm7885_vm4, 0, %v796_v14 }
  0x5e   :  { %v2159_v54 = vrot.slane %v2158_v40, 4  ;;  %777 = vst [vmem:[#allocation2 + $0x48] sm:$0x1] %v776_v26  ;;  %v882_v40 = vld [vmem:[#allocation2 + $0x44] sm:$0x1] }
  0x5f   :  { %v883_v41 = vsel %vm7895_vm5, 0, %v882_v40  ;;  %798 = vst [vmem:[#allocation2 + $0x9c] sm:$0x1] %v797_v12  ;;  %v805_v22 = vld [vmem:[#allocation2 + $0xc0] sm:$0x1] }
  0x60   :  { %v2164_v62 = vsel %vm7948_vm11, %v2159_v54, %v2163_v23  ;;  %v2548_v23 = vsel %vm7948_vm11, %v2543_v17, %v2547_v6  ;;  %884 = vst [vmem:[#allocation2 + $0x44] sm:$0x1] %v883_v41  ;;  %v889_v54 = vsel %vm7895_vm5, 0, %v888_v53  ;;  %v791_v6 = vsel %vm7885_vm4, 0, %v790_v5  ;;  %804 = vst [vmem:[#allocation2 + $0xb4] sm:$0x1] %v803_v25 }
  0x61   :  { %v6655_v8 = vcombine.low %v2164_v62, %v2174_v2  ;;  %v6671_v34 = vcombine.low %v2548_v23, %v2558_v32  ;;  %890 = vst [vmem:[#allocation2 + $0x5c] sm:$0x1] %v889_v54  ;;  %v894_v62 = vld [vmem:[#allocation2 + $0x74] sm:$0x1]  ;;  %v793_v2 = vld [vmem:[#allocation2 + $0x90] sm:$0x1] }
  0x62   :  { %v895_v0 = vsel %vm7895_vm5, 0, %v894_v62  ;;  %v794_v4 = vsel %vm7885_vm4, 0, %v793_v2  ;;  %792 = vst [vmem:[#allocation2 + $0x84] sm:$0x1] %v791_v6  ;;  %v910_v17 = vsel %vm7895_vm5, 0, %v909_v16  ;;  %7373 = vmatmul.mubr.bf16.gmra.mxu1 %v77_v21  ;;  %v806_v23 = vsel %vm7885_vm4, 0, %v805_v22 }
  0x63   :  { %3602 = vrot.lane.b32.xlu0 %v6655_v8, %s7726_s14  ;;  %3634 = vrot.lane.b32.xlu1 %v6671_v34, %s7726_s14  ;;  %896 = vst [vmem:[#allocation2 + $0x74] sm:$0x1] %v895_v0  ;;  %795 = vst [vmem:[#allocation2 + $0x90] sm:$0x1] %v794_v4  ;;  %v904_v8 = vsel %vm7895_vm5, 0, %v903_v7  ;;  %v11442_v7 = vmov 0 }
  0x64   :  { %905 = vst [vmem:[#allocation2 + $0x98] sm:$0x1] %v904_v8  ;;  %911 = vst [vmem:[#allocation2 + $0xb0] sm:$0x1] %v910_v17  ;;  %v8052_v26 = vld [vmem:[%s11342_s2] ss:$0 sm:$0xff] }
  0x65   :  { %807 = vst [vmem:[#allocation2 + $0xc0] sm:$0x1] %v806_v23  ;;  %v915_v27 = vld [vmem:[#allocation2 + $0xc8] sm:$0x1]  ;;  %914 = vst [vmem:[#allocation2 + $0xbc] sm:$0x1] %v913_v46 }
  0x66   :  { %v916_v28 = vsel %vm7895_vm5, 0, %v915_v27  ;;  %v1787_v2 = vld [vmem:[#allocation2 + $0x18] sm:$0xf]  ;;  %v11443_v7 = vsel %vm8072_vm13, 4294967295, %v11442_v7  ;;  %v1899_v8 = vld [vmem:[#allocation2 + $0xf0] sm:$0xf] }
  0x67   :  { %4082 = vrot.lane.b32.xlu0 %v6727_v37, %s7727_s15  ;;  %917 = vst [vmem:[#allocation2 + $0xc8] sm:$0x1] %v916_v28  ;;  %11444 = vst [vmem:[#allocation5_spill] sm:$0xff] %v11443_v7  ;;  %v1780_v27 = vld [vmem:[#allocation2 + $0xc] sm:$0xf] }
  0x68   :  { %v1892_v28 = vld [vmem:[#allocation2 + $0xe4] sm:$0xf] }
  0xe2   :  { %v7326_v29 = vpop.f32.mrf.mxu0  ;;  %v7358_v32 = vpop.f32.mrf.mxu1 }
  0xe3   :  { %v397_v33 = vadd.f32 %v7326_v29, %v8052_v26  ;;  %v525_v34 = vadd.f32 %v7358_v32, %v8052_v26 }
  0xe4   :  { %v388_v35 = vpop.f32.mrf.mxu0  ;;  %v516_v37 = vpop.f32.mrf.mxu1 }
  0xe5   :  { %v645_v38 = vmax.f32 %v397_v33, 0.0  ;;  %v677_v39 = vmax.f32 %v525_v34, 0.0  ;;  %v389_v40 = vadd.f32 %v8052_v26, %v388_v35  ;;  %v517_v41 = vadd.f32 %v8052_v26, %v516_v37 }
  0xe6   :  { %v7327_v44 = vpop.f32.mrf.mxu0  ;;  %v7359_v45 = vpop.f32.mrf.mxu1 }
  0xe7   :  { %v6883_v47 = vpack.c.bf16 %v645_v38, %v645_v38  ;;  %v6915_v48 = vpack.c.bf16 %v677_v39, %v677_v39  ;;  %v643_v49 = vmax.f32 %v389_v40, 0.0  ;;  %v675_v50 = vmax.f32 %v517_v41, 0.0 }
  0xe8   :  { %v400_v51 = vadd.f32 %v7327_v44, %v8052_v26  ;;  %v528_v52 = vadd.f32 %v7359_v45, %v8052_v26  ;;  %v391_v53 = vpop.f32.mrf.mxu0  ;;  %v519_v54 = vpop.f32.mrf.mxu1 }
  0xe9   :  { %v1155_v55 = vshrl.u32 %v6883_v47, 16  ;;  %v1158_v56 = vshll.u32 %v6883_v47, 16  ;;  %v1427_v57 = vshrl.u32 %v6915_v48, 16  ;;  %v1430_v58 = vshll.u32 %v6915_v48, 16 }
  0xea   :  { %v6881_v59 = vpack.c.bf16 %v643_v49, %v643_v49  ;;  %v6913_v60 = vpack.c.bf16 %v675_v50, %v675_v50  ;;  %v646_v61 = vmax.f32 %v400_v51, 0.0  ;;  %v678_v62 = vmax.f32 %v528_v52, 0.0  ;;  %v7330_v0 = vpop.f32.mrf.mxu0  ;;  %v1791_v49 = vld [vmem:[#allocation2 + $0x20] sm:$0x1] }
  0xeb   :  { %v8064_v1 = vrot.slane %v1155_v55, 7  ;;  %v8066_v4 = vrot.slane %v1427_v57, 7  ;;  %v392_v5 = vadd.f32 %v8052_v26, %v391_v53  ;;  %v520_v6 = vadd.f32 %v8052_v26, %v519_v54  ;;  %v1903_v54 = vld [vmem:[#allocation2 + $0xf8] sm:$0x1] }
  0xec   :  { %v1138_v9 = vshrl.u32 %v6881_v59, 16  ;;  %v1141_v10 = vshll.u32 %v6881_v59, 16  ;;  %v1410_v11 = vshrl.u32 %v6913_v60, 16  ;;  %v1413_v13 = vshll.u32 %v6913_v60, 16  ;;  %v404_v14 = vpop.f32.mrf.mxu0  ;;  %v7362_v59 = vpop.f32.mrf.mxu1 }
  0xed   :  { %v1160_v12 = vor.u32 %v1158_v56, %v8064_v1  ;;  %v1161_v16 = vrot.slane %v8064_v1, 4  ;;  %v1432_v17 = vor.u32 %v1430_v58, %v8066_v4  ;;  %v1433_v18 = vrot.slane %v8066_v4, 4 }
  0xee   :  { %v8080_v19 = vrot.slane %v1138_v9, 7  ;;  %v8082_v20 = vrot.slane %v1410_v11, 7  ;;  %v6884_v21 = vpack.c.bf16 %v646_v61, %v646_v61  ;;  %v6916_v22 = vpack.c.bf16 %v678_v62, %v678_v62  ;;  %v7331_v23 = vpop.f32.mrf.mxu0 }
  0xef   :  { %v1788_v24 = vsel %vm8072_vm13, %v1160_v12, %v1787_v2  ;;  %v1900_v25 = vsel %vm8072_vm13, %v1432_v17, %v1899_v8  ;;  %v644_v29 = vmax.f32 %v392_v5, 0.0  ;;  %v676_v32 = vmax.f32 %v520_v6, 0.0 }
  0xf0   :  { %1789 = vst [vmem:[#allocation2 + $0x18] sm:$0xf] %v1788_v24  ;;  %1901 = vst [vmem:[#allocation2 + $0xf0] sm:$0xf] %v1900_v25  ;;  %v1143_v33 = vor.u32 %v1141_v10, %v8080_v19  ;;  %v1144_v34 = vrot.slane %v8080_v19, 4  ;;  %v1415_v35 = vor.u32 %v1413_v13, %v8082_v20  ;;  %v1416_v37 = vrot.slane %v8082_v20, 4  ;;  %v407_v47 = vpop.f32.mrf.mxu0  ;;  %v532_v20 = vpop.f32.mrf.mxu1 }
  0xf1   :  { %v1163_v38 = vshrl.u32 %v6884_v21, 16  ;;  %v1166_v39 = vshll.u32 %v6884_v21, 16  ;;  %v1435_v40 = vshrl.u32 %v6916_v22, 16  ;;  %v1438_v41 = vshll.u32 %v6916_v22, 16  ;;  %v1784_v13 = vld [vmem:[#allocation2 + $0x14] sm:$0x1] }
  0xf2   :  { %v1781_v42 = vsel %vm8072_vm13, %v1143_v33, %v1780_v27  ;;  %v1893_v44 = vsel %vm8072_vm13, %v1415_v35, %v1892_v28  ;;  %v6882_v45 = vpack.c.bf16 %v644_v29, %v644_v29  ;;  %v6914_v46 = vpack.c.bf16 %v676_v32, %v676_v32  ;;  %v7334_v6 = vpop.f32.mrf.mxu0 }
  0xf3   :  { %1782 = vst [vmem:[#allocation2 + $0xc] sm:$0xf] %v1781_v42  ;;  %1894 = vst [vmem:[#allocation2 + $0xe4] sm:$0xf] %v1893_v44  ;;  %v1165_v48 = vrot.slane %v1163_v38, 7  ;;  %v1437_v50 = vrot.slane %v1435_v40, 7  ;;  %v413_v51 = vadd.f32 %v7330_v0, %v8052_v26  ;;  %v405_v52 = vadd.f32 %v8052_v26, %v404_v14 }
  0xf4   :  { %v11445_v53 = vmov 0  ;;  %v1146_v55 = vshrl.u32 %v6882_v45, 16  ;;  %v1149_v56 = vshll.u32 %v6882_v45, 16  ;;  %v1418_v57 = vshrl.u32 %v6914_v46, 16  ;;  %v1896_v14 = vld [vmem:[#allocation2 + $0xec] sm:$0x1]  ;;  %v420_v32 = vpop.f32.mrf.mxu0 }
  0xf5   :  { %v11446_v53 = vsel %vm8100_vm14, 4294967295, %v11445_v53  ;;  %v1421_v58 = vshll.u32 %v6914_v46, 16  ;;  %v1168_v60 = vor.u32 %v1166_v39, %v1165_v48  ;;  %v1170_v61 = vrot.slane %v1165_v48, 4  ;;  %v1801_v48 = vld [vmem:[#allocation2 + $0x30] sm:$0xf] }
  0xf6   :  { %11447 = vst [vmem:[#allocation6_spill] sm:$0xff] %v11446_v53  ;;  %v1440_v62 = vor.u32 %v1438_v41, %v1437_v50  ;;  %v1442_v1 = vrot.slane %v1437_v50, 4  ;;  %v1148_v2 = vrot.slane %v1146_v55, 7  ;;  %v1420_v0 = vrot.slane %v1418_v57, 7  ;;  %v7363_v41 = vpop.f32.mrf.mxu1  ;;  %v7335_v55 = vpop.f32.mrf.mxu0 }
  0xf7   :  { %v649_v4 = vmax.f32 %v413_v51, 0.0  ;;  %v647_v5 = vmax.f32 %v405_v52, 0.0  ;;  %v1169_v8 = vsel %vm8100_vm14, %v1161_v16, %v1168_v60  ;;  %v1792_v9 = vsel %vm7885_vm4, %v1170_v61, %v1791_v49  ;;  %v1794_v49 = vld [vmem:[#allocation2 + $0x24] sm:$0xf] }
  0xf8   :  { %v1441_v10 = vsel %vm8100_vm14, %v1433_v18, %v1440_v62  ;;  %v1904_v11 = vsel %vm7885_vm4, %v1442_v1, %v1903_v54  ;;  %1790 = vst.msk [vmem:[#allocation2 + $0x1c] sm:$0xf] %vm739_vm0, %v1169_v8  ;;  %1793 = vst [vmem:[#allocation2 + $0x20] sm:$0x1] %v1792_v9  ;;  %v1151_v12 = vor.u32 %v1149_v56, %v1148_v2  ;;  %v1153_v17 = vrot.slane %v1148_v2, 4 }
  0xf9   :  { %1902 = vst.msk [vmem:[#allocation2 + $0xf4] sm:$0xf] %vm739_vm0, %v1441_v10  ;;  %1905 = vst [vmem:[#allocation2 + $0xf8] sm:$0x1] %v1904_v11  ;;  %v1423_v16 = vor.u32 %v1421_v58, %v1420_v0  ;;  %v1425_v19 = vrot.slane %v1420_v0, 4  ;;  %v6887_v21 = vpack.c.bf16 %v649_v4, %v649_v4  ;;  %v6885_v22 = vpack.c.bf16 %v647_v5, %v647_v5  ;;  %v423_v10 = vpop.f32.mrf.mxu0 }
  0xfa   :  { %v416_v18 = vadd.f32 %v7331_v23, %v8052_v26  ;;  %v541_v24 = vadd.f32 %v7362_v59, %v8052_v26  ;;  %v1152_v25 = vsel %vm8100_vm14, %v1144_v34, %v1151_v12  ;;  %v1785_v27 = vsel %vm7885_vm4, %v1153_v17, %v1784_v13  ;;  %v1805_v5 = vld [vmem:[#allocation2 + $0x38] sm:$0x1]  ;;  %v1913_v11 = vld [vmem:[#allocation2 + $0x108] sm:$0xf] }
  0xfb   :  { %v1424_v28 = vsel %vm8100_vm14, %v1416_v37, %v1423_v16  ;;  %v1897_v29 = vsel %vm7885_vm4, %v1425_v19, %v1896_v14  ;;  %1783 = vst.msk [vmem:[#allocation2 + $0x10] sm:$0xf] %vm739_vm0, %v1152_v25  ;;  %1786 = vst [vmem:[#allocation2 + $0x14] sm:$0x1] %v1785_v27  ;;  %v1189_v23 = vshrl.u32 %v6887_v21, 16  ;;  %v1192_v33 = vshll.u32 %v6887_v21, 16 }
  0xfc   :  { %1895 = vst.msk [vmem:[#allocation2 + $0xe8] sm:$0xf] %vm739_vm0, %v1424_v28  ;;  %1898 = vst [vmem:[#allocation2 + $0xec] sm:$0x1] %v1897_v29  ;;  %v1172_v35 = vshrl.u32 %v6885_v22, 16  ;;  %v1175_v34 = vshll.u32 %v6885_v22, 16  ;;  %v408_v40 = vadd.f32 %v8052_v26, %v407_v47  ;;  %v533_v37 = vadd.f32 %v8052_v26, %v532_v20 }
  0xfd   :  { %v650_v38 = vmax.f32 %v416_v18, 0.0  ;;  %v681_v39 = vmax.f32 %v541_v24, 0.0  ;;  %v1191_v42 = vrot.slane %v1189_v23, 7  ;;  %v429_v45 = vadd.f32 %v7334_v6, %v8052_v26  ;;  %v1798_v23 = vld [vmem:[#allocation2 + $0x2c] sm:$0x1] }
  0xfe   :  { %v8128_v44 = vrot.slane %v1172_v35, 7  ;;  %v544_v46 = vadd.f32 %v7363_v41, %v8052_v26  ;;  %v648_v52 = vmax.f32 %v408_v40, 0.0  ;;  %v679_v54 = vmax.f32 %v533_v37, 0.0  ;;  %v535_v41 = vpop.f32.mrf.mxu1 }
  0xff   :  { %v6888_v50 = vpack.c.bf16 %v650_v38, %v650_v38  ;;  %v6919_v51 = vpack.c.bf16 %v681_v39, %v681_v39  ;;  %v1194_v56 = vor.u32 %v1192_v33, %v1191_v42  ;;  %v1195_v57 = vrot.slane %v1191_v42, 4  ;;  %v1906_v33 = vld [vmem:[#allocation2 + $0xfc] sm:$0xf] }
 0x100   :  { %v1177_v47 = vor.u32 %v1175_v34, %v8128_v44  ;;  %v6886_v2 = vpack.c.bf16 %v648_v52, %v648_v52  ;;  %v6917_v0 = vpack.c.bf16 %v679_v54, %v679_v54  ;;  %v653_v8 = vmax.f32 %v429_v45, 0.0  ;;  %v7338_v34 = vpop.f32.mrf.mxu0 }
 0x101   :  { %v1197_v58 = vshrl.u32 %v6888_v50, 16  ;;  %v1200_v59 = vshll.u32 %v6888_v50, 16  ;;  %v1461_v60 = vshrl.u32 %v6919_v51, 16  ;;  %v1464_v61 = vshll.u32 %v6919_v51, 16 }
 0x102   :  { %v1802_v62 = vsel %vm8072_vm13, %v1194_v56, %v1801_v48  ;;  %v1795_v1 = vsel %vm8072_vm13, %v1177_v47, %v1794_v49  ;;  %v682_v9 = vmax.f32 %v544_v46, 0.0  ;;  %v1180_v13 = vshrl.u32 %v6886_v2, 16 }
 0x103   :  { %1803 = vst [vmem:[#allocation2 + $0x30] sm:$0xf] %v1802_v62  ;;  %1796 = vst [vmem:[#allocation2 + $0x24] sm:$0xf] %v1795_v1  ;;  %v1199_v4 = vrot.slane %v1197_v58, 7  ;;  %v8137_v6 = vrot.slane %v1461_v60, 7  ;;  %v6891_v24 = vpack.c.bf16 %v653_v8, %v653_v8  ;;  %v421_v35 = vadd.f32 %v8052_v26, %v420_v32 }
 0x104   :  { %v1183_v14 = vshll.u32 %v6886_v2, 16  ;;  %v1444_v12 = vshrl.u32 %v6917_v0, 16  ;;  %v1447_v17 = vshll.u32 %v6917_v0, 16  ;;  %v1178_v16 = vrot.slane %v8128_v44, 4  ;;  %v1815_v58 = vld [vmem:[#allocation2 + $0x48] sm:$0xf] }
 0x105   :  { %v1202_v19 = vor.u32 %v1200_v59, %v1199_v4  ;;  %v1204_v20 = vrot.slane %v1199_v4, 4  ;;  %v1466_v21 = vor.u32 %v1464_v61, %v8137_v6  ;;  %v1182_v22 = vrot.slane %v1180_v13, 7  ;;  %v1917_v59 = vld [vmem:[#allocation2 + $0x110] sm:$0x1] }
 0x106   :  { %v8141_v18 = vrot.slane %v1444_v12, 7  ;;  %v6920_v25 = vpack.c.bf16 %v682_v9, %v682_v9  ;;  %v1467_v38 = vrot.slane %v8137_v6, 4  ;;  %v1223_v42 = vshrl.u32 %v6891_v24, 16 }
 0x107   :  { %v1203_v27 = vsel %vm8100_vm14, %v1195_v57, %v1202_v19  ;;  %v1806_v28 = vsel %vm7885_vm4, %v1204_v20, %v1805_v5  ;;  %v1914_v29 = vsel %vm8072_vm13, %v1466_v21, %v1913_v11  ;;  %v1185_v39 = vor.u32 %v1183_v14, %v1182_v22  ;;  %v436_v57 = vpop.f32.mrf.mxu0  ;;  %v8175_v14 = vld [vmem:[#allocation2 + $0xf0] sm:$0xf] }
 0x108   :  { %1804 = vst.msk [vmem:[#allocation2 + $0x34] sm:$0xf] %vm739_vm0, %v1203_v27  ;;  %1807 = vst [vmem:[#allocation2 + $0x38] sm:$0x1] %v1806_v28  ;;  %v1187_v40 = vrot.slane %v1182_v22, 4  ;;  %v1449_v37 = vor.u32 %v1447_v17, %v8141_v18  ;;  %v1226_v44 = vshll.u32 %v6891_v24, 16  ;;  %v536_v54 = vadd.f32 %v8052_v26, %v535_v41 }
 0x109   :  { %1915 = vst [vmem:[#allocation2 + $0x108] sm:$0xf] %v1914_v29  ;;  %v1469_v45 = vshrl.u32 %v6920_v25, 16  ;;  %v1472_v46 = vshll.u32 %v6920_v25, 16  ;;  %v1186_v48 = vsel %vm8100_vm14, %v1178_v16, %v1185_v39  ;;  %v651_v50 = vmax.f32 %v421_v35, 0.0  ;;  %v8177_v12 = vpop.f32.mrf.mxu0 }
 0x10a   :  { %v1799_v32 = vsel %vm7885_vm4, %v1187_v40, %v1798_v23  ;;  %v1907_v49 = vsel %vm8072_vm13, %v1449_v37, %v1906_v33  ;;  %1797 = vst.msk [vmem:[#allocation2 + $0x28] sm:$0xf] %vm739_vm0, %v1186_v48  ;;  %v8160_v51 = vrot.slane %v1223_v42, 7  ;;  %v432_v56 = vadd.f32 %v7335_v55, %v8052_v26  ;;  %v1808_v24 = vld [vmem:[#allocation2 + $0x3c] sm:$0xf] }
 0x10b   :  { %1800 = vst [vmem:[#allocation2 + $0x2c] sm:$0x1] %v1799_v32  ;;  %1908 = vst [vmem:[#allocation2 + $0xfc] sm:$0xf] %v1907_v49  ;;  %v1471_v52 = vrot.slane %v1469_v45, 7  ;;  %v11347_v47 = vrot.slane %v7923_v3, 5  ;;  %v6889_v60 = vpack.c.bf16 %v651_v50, %v651_v50  ;;  %v424_v61 = vadd.f32 %v8052_v26, %v423_v10  ;;  %v8183_v40 = vpop.f32.mrf.mxu0 }
 0x10c   :  { %v445_v62 = vadd.f32 %v7338_v34, %v8052_v26  ;;  %v1228_v1 = vor.u32 %v1226_v44, %v8160_v51  ;;  %v437_v4 = vadd.f32 %v8052_v26, %v436_v57  ;;  %v680_v8 = vmax.f32 %v536_v54, 0.0  ;;  %v1910_v41 = vld [vmem:[#allocation2 + $0x104] sm:$0x1] }
 0x10d   :  { %v1474_v2 = vor.u32 %v1472_v46, %v1471_v52  ;;  %v1476_v0 = vrot.slane %v1471_v52, 4  ;;  %v1206_v5 = vshrl.u32 %v6889_v60, 16  ;;  %v1209_v6 = vshll.u32 %v6889_v60, 16  ;;  %v1812_v32 = vld [vmem:[#allocation2 + $0x44] sm:$0x1] }
 0x10e   :  { %v654_v55 = vmax.f32 %v432_v56, 0.0  ;;  %v1816_v9 = vsel %vm8072_vm13, %v1228_v1, %v1815_v58  ;;  %v652_v13 = vmax.f32 %v424_v61, 0.0  ;;  %v6918_v16 = vpack.c.bf16 %v680_v8, %v680_v8  ;;  %v1819_v52 = vld [vmem:[#allocation2 + $0x50] sm:$0x1]  ;;  %v7342_v61 = vpop.f32.mrf.mxu0 }
 0x10f   :  { %v1475_v11 = vsel %vm8100_vm14, %v1467_v38, %v1474_v2  ;;  %v1918_v10 = vsel %vm7885_vm4, %v1476_v0, %v1917_v59  ;;  %1817 = vst [vmem:[#allocation2 + $0x48] sm:$0xf] %v1816_v9  ;;  %v1208_v17 = vrot.slane %v1206_v5, 7  ;;  %v657_v20 = vmax.f32 %v445_v62, 0.0  ;;  %v1829_v9 = vld [vmem:[#allocation2 + $0x60] sm:$0xf] }
 0x110   :  { %1916 = vst.msk [vmem:[#allocation2 + $0x10c] sm:$0xf] %vm739_vm0, %v1475_v11  ;;  %1919 = vst [vmem:[#allocation2 + $0x110] sm:$0x1] %v1918_v10  ;;  %v6892_v19 = vpack.c.bf16 %v654_v55, %v654_v55  ;;  %v1450_v21 = vrot.slane %v8141_v18, 4  ;;  %v1229_v22 = vrot.slane %v8160_v51, 4  ;;  %v6890_v25 = vpack.c.bf16 %v652_v13, %v652_v13 }
 0x111   :  { %v655_v27 = vmax.f32 %v437_v4, 0.0  ;;  %v1211_v28 = vor.u32 %v1209_v6, %v1208_v17  ;;  %v1452_v29 = vshrl.u32 %v6918_v16, 16  ;;  %v1455_v23 = vshll.u32 %v6918_v16, 16  ;;  %v8194_v4 = vld [vmem:[#allocation2 + $0xf4] sm:$0xf] }
 0x112   :  { %v2584_v33 = vshrl.u32 %v8175_v14, 16  ;;  %v1231_v35 = vshrl.u32 %v6892_v19, 16  ;;  %v1234_v34 = vshll.u32 %v6892_v19, 16  ;;  %v1214_v38 = vshrl.u32 %v6890_v25, 16  ;;  %v8205_v11 = vld [vmem:[#allocation2 + $0x1c] sm:$0xf] }
 0x113   :  { %v1217_v39 = vshll.u32 %v6890_v25, 16  ;;  %v1809_v37 = vsel %vm8072_vm13, %v1211_v28, %v1808_v24  ;;  %v1454_v18 = vrot.slane %v1452_v29, 7  ;;  %v6895_v42 = vpack.c.bf16 %v657_v20, %v657_v20  ;;  %v1822_v20 = vld [vmem:[#allocation2 + $0x54] sm:$0xf]  ;;  %v452_v24 = vpop.f32.mrf.mxu0  ;;  %v2114_v29 = vld [vmem:[#allocation2 + $0x18] sm:$0xe] }
 0x114   :  { %v6893_v44 = vpack.c.bf16 %v655_v27, %v655_v27  ;;  %v1212_v45 = vrot.slane %v1208_v17, 4  ;;  %1810 = vst [vmem:[#allocation2 + $0x3c] sm:$0xf] %v1809_v37  ;;  %v1233_v46 = vrot.slane %v1231_v35, 7  ;;  %v1216_v48 = vrot.slane %v1214_v38, 7 }
 0x115   :  { %v2587_v49 = vshll.u32 %v8175_v14, 16  ;;  %v1457_v50 = vor.u32 %v1455_v23, %v1454_v18  ;;  %v1459_v51 = vrot.slane %v1454_v18, 4  ;;  %v1257_v54 = vshrl.u32 %v6895_v42, 16  ;;  %v8239_v38 = vld [vmem:[#allocation2 + $0x20] sm:$0x1] }
 0x116   :  { %v1260_v56 = vshll.u32 %v6895_v42, 16  ;;  %v1236_v57 = vor.u32 %v1234_v34, %v1233_v46  ;;  %v1238_v58 = vrot.slane %v1233_v46, 4  ;;  %v1219_v59 = vor.u32 %v1217_v39, %v1216_v48 }
 0x117   :  { %v1221_v60 = vrot.slane %v1216_v48, 4  ;;  %v1458_v62 = vsel %vm8100_vm14, %v1450_v21, %v1457_v50  ;;  %v1911_v1 = vsel %vm7885_vm4, %v1459_v51, %v1910_v41  ;;  %v8192_v2 = vrot.slane %v1257_v54, 7 }
 0x118   :  { %v1240_v0 = vshrl.u32 %v6893_v44, 16  ;;  %1909 = vst.msk [vmem:[#allocation2 + $0x100] sm:$0xf] %vm739_vm0, %v1458_v62  ;;  %1912 = vst [vmem:[#allocation2 + $0x104] sm:$0x1] %v1911_v1  ;;  %v1237_v5 = vsel %vm8100_vm14, %v1229_v22, %v1236_v57  ;;  %v1820_v6 = vsel %vm7885_vm4, %v1238_v58, %v1819_v52  ;;  %v1220_v8 = vsel %vm8100_vm14, %v1212_v45, %v1219_v59  ;;  %v7343_v45 = vpop.f32.mrf.mxu0 }
 0x119   :  { %v1813_v55 = vsel %vm7885_vm4, %v1221_v60, %v1812_v32  ;;  %1818 = vst.msk [vmem:[#allocation2 + $0x4c] sm:$0xf] %vm739_vm0, %v1237_v5  ;;  %1821 = vst [vmem:[#allocation2 + $0x50] sm:$0x1] %v1820_v6  ;;  %v1262_v10 = vor.u32 %v1260_v56, %v8192_v2  ;;  %v1243_v17 = vshll.u32 %v6893_v44, 16  ;;  %v8214_v16 = vrot.slane %v11347_v47, 4 }
 0x11a   :  { %1811 = vst.msk [vmem:[#allocation2 + $0x40] sm:$0xf] %vm739_vm0, %v1220_v8  ;;  %1814 = vst [vmem:[#allocation2 + $0x44] sm:$0x1] %v1813_v55  ;;  %v8210_v13 = vrot.slane %v1240_v0, 7  ;;  %v8219_v21 = vcombine.low %v8175_v14, %v8194_v4  ;;  %v1263_v23 = vrot.slane %v8192_v2, 4  ;;  %v448_v34 = vadd.f32 %v8177_v12, %v8052_v26 }
 0x11b   :  { %v8221_v22 = vld [vmem:[#allocation2 + $0x18] sm:$0xf]  ;;  %v1830_v25 = vsel %vm8072_vm13, %v1262_v10, %v1829_v9  ;;  %v8231_v35 = vrot.slane %v2584_v33, 4  ;;  %v8233_v14 = vrot.slane %v2587_v49, 5  ;;  %v440_v33 = vadd.f32 %v8052_v26, %v8183_v40  ;;  %v1833_v1 = vld [vmem:[#allocation2 + $0x68] sm:$0x1] }
 0x11c   :  { %11448 = vst [vmem:[#allocation7_spill] sm:$0xff] %v8219_v21  ;;  %v1245_v27 = vor.u32 %v1243_v17, %v8210_v13  ;;  %v8228_v28 = vcombine.low %v8221_v22, %v8205_v11  ;;  %1831 = vst [vmem:[#allocation2 + $0x60] sm:$0xf] %v1830_v25  ;;  %4014 = vrot.lane.b32.xlu0 %v8219_v21, %s7725_s13  ;;  %v461_v18 = vadd.f32 %v7342_v61, %v8052_v26 }
 0x11d   :  { %v658_v41 = vmax.f32 %v448_v34, 0.0  ;;  %v6589_v42 = vrot.slane %v2114_v29, 9  ;;  %v3034_v12 = vrot.slane %v8205_v11, 5  ;;  %v453_v44 = vadd.f32 %v8052_v26, %v452_v24  ;;  %v7593_v24 = vld [vmem:[%s11341_s3 + $0x38] sm:$0xff]  }
 0x11e   :  { %11449 = vst [vmem:[#allocation8_spill] sm:$0xff] %v8228_v28  ;;  %v1823_v39 = vsel %vm8072_vm13, %v1245_v27, %v1822_v20  ;;  %3982 = vrot.lane.b32.xlu1 %v8228_v28, %s7725_s13  ;;  %v656_v46 = vmax.f32 %v440_v33, 0.0  ;;  %v661_v48 = vmax.f32 %v461_v18, 0.0  ;;  %v3037_v32 = vrot.slane %v8239_v38, 5  ;;  %v2132_v20 = vld [vmem:[#allocation2 + $0xf0] sm:$0xe]  ;;  %4885 = vmatpush1.bf16.msra.mxu1 %v7593_v24 }
 0x11f   :  { %1824 = vst [vmem:[#allocation2 + $0x54] sm:$0xf] %v1823_v39  ;;  %v464_v49 = vadd.f32 %v7343_v45, %v8052_v26  ;;  %v6896_v50 = vpack.c.bf16 %v658_v41, %v658_v41  ;;  %v3035_v40 = vsel %vm7919_vm8, %v6589_v42, %v3034_v12  ;;  %v3036_v51 = vrot.slane %v3034_v12, 4  ;;  %v1826_v29 = vld [vmem:[#allocation2 + $0x5c] sm:$0x1]  ;;  %v455_v12 = vpop.f32.mrf.mxu0  ;;  %4886 = vmatprep.subr.bf16.mxu1 %v11349_v30 }
 0x120   :  { %v659_v52 = vmax.f32 %v453_v44, 0.0  ;;  %v6894_v54 = vpack.c.bf16 %v656_v46, %v656_v46  ;;  %v6899_v56 = vpack.c.bf16 %v661_v48, %v661_v48  ;;  %v3146_v58 = vrot.slane %v8194_v4, 5  ;;  %v1843_v42 = vld [vmem:[#allocation2 + $0x78] sm:$0xf]  ;;  %v1836_v48 = vld [vmem:[#allocation2 + $0x6c] sm:$0xf] }
 0x121   :  { %v662_v57 = vmax.f32 %v464_v49, 0.0  ;;  %v1265_v59 = vshrl.u32 %v6896_v50, 16  ;;  %v1268_v60 = vshll.u32 %v6896_v50, 16  ;;  %v3038_v61 = vsel %vm7919_vm8, %v3036_v51, %v3037_v32  ;;  %v8278_v32 = vld [vmem:[#allocation2 + $0xf8] sm:$0x1] }
 0x122   :  { %3836 = vrot.lane.b32.xlu1 %v8228_v28, %s7727_s15  ;;  %v6897_v62 = vpack.c.bf16 %v659_v52, %v659_v52  ;;  %v1248_v0 = vshrl.u32 %v6894_v54, 16  ;;  %v1251_v5 = vshll.u32 %v6894_v54, 16  ;;  %v1291_v6 = vshrl.u32 %v6899_v56, 16  ;;  %v8289_v54 = vld [vmem:[#allocation2 + $0x10] sm:$0xf] }
 0x123   :  { %v1294_v8 = vshll.u32 %v6899_v56, 16  ;;  %v1267_v55 = vrot.slane %v1265_v59, 7  ;;  %v8260_v9 = vcombine.low %v3035_v40, %v3038_v61  ;;  %v1246_v25 = vrot.slane %v8210_v13, 4  ;;  %v7594_v56 = vld [vmem:[%s11341_s3 + $0x30] sm:$0xff]   ;;  %v1847_v24 = vld [vmem:[#allocation2 + $0x80] sm:$0x1] }
 0x124   :  { %v1274_v10 = vshrl.u32 %v6897_v62, 16  ;;  %v1277_v17 = vshll.u32 %v6897_v62, 16  ;;  %v1250_v27 = vrot.slane %v1248_v0, 7  ;;  %v8266_v34 = vrot.slane %v1291_v6, 7  ;;  %v7346_v0 = vpop.f32.mrf.mxu0  ;;  %4887 = vmatpush1.bf16.msra.mxu1 %v7594_v56 }
 0x125   :  { %v6900_v39 = vpack.c.bf16 %v662_v57, %v662_v57  ;;  %v2200_v33 = vshrl.u32 %v8221_v22, 16  ;;  %v1270_v18 = vor.u32 %v1268_v60, %v1267_v55  ;;  %v1272_v41 = vrot.slane %v1267_v55, 4  ;;  %3912 = vrot.lane.b32.xlu0 %v8260_v9, %s7726_s14  ;;  %7392 = vmatprep.mubr.msk.bf16.mxu0 %vm4122_vm15, %v8260_v9 }
 0x126   :  { %3868 = vrot.lane.b32.xlu1 %v8219_v21, %s7727_s15  ;;  %v8275_v13 = vrot.slane %v1274_v10, 7  ;;  %v1253_v44 = vor.u32 %v1251_v5, %v1250_v27  ;;  %v1255_v45 = vrot.slane %v1250_v27, 4  ;;  %v1296_v46 = vor.u32 %v1294_v8, %v8266_v34  ;;  %v8307_v5 = vld [vmem:[#allocation2 + $0xc] sm:$0xf]  ;;  %4888 = vmatprep.subr.bf16.mxu1 %v11349_v30 }
 0x127   :  { %v6605_v49 = vrot.slane %v2132_v20, 9  ;;  %v1271_v50 = vsel %vm8100_vm14, %v1263_v23, %v1270_v18  ;;  %v1834_v40 = vsel %vm7885_vm4, %v1272_v41, %v1833_v1  ;;  %v3148_v52 = vrot.slane %v3146_v58, 4 }
 0x128   :  { %v1279_v51 = vor.u32 %v1277_v17, %v8275_v13  ;;  %1832 = vst.msk [vmem:[#allocation2 + $0x64] sm:$0xf] %vm739_vm0, %v1271_v50  ;;  %1835 = vst [vmem:[#allocation2 + $0x68] sm:$0x1] %v1834_v40  ;;  %v1254_v2 = vsel %vm8100_vm14, %v1246_v25, %v1253_v44  ;;  %v1827_v23 = vsel %vm7885_vm4, %v1255_v45, %v1826_v29  ;;  %v1299_v59 = vshrl.u32 %v6900_v39, 16 }
 0x129   :  { %v1844_v57 = vsel %vm8072_vm13, %v1296_v46, %v1843_v42  ;;  %1825 = vst.msk [vmem:[#allocation2 + $0x58] sm:$0xf] %vm739_vm0, %v1254_v2  ;;  %1828 = vst [vmem:[#allocation2 + $0x5c] sm:$0x1] %v1827_v23  ;;  %v1302_v61 = vshll.u32 %v6900_v39, 16  ;;  %v3149_v62 = vrot.slane %v8278_v32, 5  ;;  %v456_v1 = vadd.f32 %v8052_v26, %v455_v12 }
 0x12a   :  { %1845 = vst [vmem:[#allocation2 + $0x78] sm:$0xf] %v1844_v57  ;;  %v1837_v60 = vsel %vm8072_vm13, %v1279_v51, %v1836_v48  ;;  %v1297_v6 = vrot.slane %v8266_v34, 4  ;;  %v1301_v8 = vrot.slane %v1299_v59, 7  ;;  %v477_v55 = vadd.f32 %v7346_v0, %v8052_v26  ;;  %v2113_v17 = vld [vmem:[#allocation2 + $0xc] sm:$0xe]  ;;  %v468_v48 = vpop.f32.mrf.mxu0 }
 0x12b   :  { %1838 = vst [vmem:[#allocation2 + $0x6c] sm:$0xf] %v1837_v60  ;;  %v8313_v10 = vcombine.low %v8307_v5, %v8289_v54  ;;  %v2203_v20 = vshll.u32 %v8221_v22, 16  ;;  %v3147_v25 = vsel %vm7919_vm8, %v6605_v49, %v3146_v58  ;;  %v3150_v27 = vsel %vm7919_vm8, %v3148_v52, %v3149_v62  ;;  %v7595_v34 = vld [vmem:[%s11341_s3 + $0x28] sm:$0xff]   ;;  %v2077_v12 = vld [vmem:[#allocation2 + $0x14] sm:$0x1] }
 0x12c   :  { %v660_v29 = vmax.f32 %v456_v1, 0.0  ;;  %v1304_v39 = vor.u32 %v1302_v61, %v1301_v8  ;;  %v1306_v18 = vrot.slane %v1301_v8, 4  ;;  %v8326_v41 = vcombine.low %v3147_v25, %v3150_v27  ;;  %v8339_v52 = vld [vmem:[#allocation2 + $0x28] sm:$0xf]  ;;  %4889 = vmatpush1.bf16.msra.mxu1 %v7595_v34  ;;  %v2079_v59 = vld [vmem:[#allocation2 + $0x2c] sm:$0x1] }
 0x12d   :  { %11450 = vst [vmem:[#allocation9_spill] sm:$0xff] %v8313_v10  ;;  %v665_v42 = vmax.f32 %v477_v55, 0.0  ;;  %3834 = vrot.lane.b32.xlu1 %v8313_v10, %s7727_s15  ;;  %v1280_v58 = vrot.slane %v8275_v13, 4  ;;  %v2176_v45 = vshrl.u32 %v8307_v5, 16  ;;  %v6588_v46 = vrot.slane %v2113_v17, 9  ;;  %4890 = vmatprep.subr.bf16.mxu1 %v11349_v30  ;;  %v7596_v60 = vld [vmem:[%s11341_s3 + $0x20] sm:$0xff]  }
 0x12e   :  { %v6898_v44 = vpack.c.bf16 %v660_v29, %v660_v29  ;;  %v1305_v49 = vsel %vm8100_vm14, %v1297_v6, %v1304_v39  ;;  %v1848_v50 = vsel %vm7885_vm4, %v1306_v18, %v1847_v24  ;;  %3944 = vrot.lane.b32.xlu0 %v8326_v41, %s7726_s14  ;;  %v3027_v51 = vrot.slane %v8289_v54, 5  ;;  %v2115_v13 = vld [vmem:[#allocation2 + $0x24] sm:$0xe]  ;;  %v7347_v24 = vpop.f32.mrf.mxu0  ;;  %v1840_v25 = vld [vmem:[#allocation2 + $0x74] sm:$0x1] }
 0x12f   :  { %v6903_v40 = vpack.c.bf16 %v665_v42, %v665_v42  ;;  %1846 = vst.msk [vmem:[#allocation2 + $0x7c] sm:$0xf] %vm739_vm0, %v1305_v49  ;;  %1849 = vst [vmem:[#allocation2 + $0x80] sm:$0x1] %v1848_v50  ;;  %v3030_v23 = vrot.slane %v2077_v12, 5  ;;  %v469_v57 = vadd.f32 %v8052_v26, %v468_v48  ;;  %v6590_v55 = vrot.slane %v2115_v13, 9 }
 0x130   :  { %v1282_v56 = vshrl.u32 %v6898_v44, 16  ;;  %v1285_v2 = vshll.u32 %v6898_v44, 16  ;;  %v3028_v1 = vsel %vm7919_vm8, %v6588_v46, %v3027_v51  ;;  %v3029_v0 = vrot.slane %v3027_v51, 4  ;;  %4891 = vmatpush1.bf16.msra.mxu1 %v7596_v60  ;;  %v1857_v12 = vld [vmem:[#allocation2 + $0x90] sm:$0xf]  ;;  %v7599_v51 = vld [vmem:[%s11341_s3 + $0x18] sm:$0xff]  }
 0x131   :  { %v1325_v61 = vshrl.u32 %v6903_v40, 16  ;;  %v1328_v62 = vshll.u32 %v6903_v40, 16  ;;  %v663_v8 = vmax.f32 %v469_v57, 0.0  ;;  %v3041_v17 = vrot.slane %v8339_v52, 5  ;;  %4892 = vmatprep.subr.bf16.mxu1 %v11349_v30  ;;  %v8371_v57 = vld [vmem:[#allocation2 + $0xe8] sm:$0xf] }
 0x132   :  { %v1284_v6 = vrot.slane %v1282_v56, 7  ;;  %v3031_v29 = vsel %vm7919_vm8, %v3029_v0, %v3030_v23  ;;  %v3044_v34 = vrot.slane %v2079_v59, 5  ;;  %v480_v39 = vadd.f32 %v7347_v24, %v8052_v26  ;;  %v1850_v60 = vld [vmem:[#allocation2 + $0x84] sm:$0xf]  ;;  %v471_v0 = vpop.f32.mrf.mxu0  ;;  %v7600_v24 = vld [vmem:[%s11341_s3 + $0x10] sm:$0xff]  }
 0x133   :  { %v8350_v27 = vrot.slane %v1325_v61, 7  ;;  %v8355_v44 = vcombine.low %v3028_v1, %v3031_v29  ;;  %v6901_v46 = vpack.c.bf16 %v663_v8, %v663_v8  ;;  %v2179_v49 = vshll.u32 %v8307_v5, 16  ;;  %v8382_v1 = vld [vmem:[#allocation2 + $0xe4] sm:$0xf] }
 0x134   :  { %v1287_v18 = vor.u32 %v1285_v2, %v1284_v6  ;;  %v1289_v42 = vrot.slane %v1284_v6, 4  ;;  %v3042_v50 = vsel %vm7919_vm8, %v6590_v55, %v3041_v17  ;;  %v3043_v40 = vrot.slane %v3041_v17, 4  ;;  %4893 = vmatpush1.bf16.msra.mxu1 %v7599_v51  ;;  %v2131_v17 = vld [vmem:[#allocation2 + $0xe4] sm:$0xe] }
 0x135   :  { %v1330_v48 = vor.u32 %v1328_v62, %v8350_v27  ;;  %3910 = vrot.lane.b32.xlu0 %v8355_v44, %s7726_s14  ;;  %v1308_v2 = vshrl.u32 %v6901_v46, 16  ;;  %v1311_v23 = vshll.u32 %v6901_v46, 16  ;;  %v8375_v59 = vrot.slane %v2200_v33, 4  ;;  %4894 = vmatprep.subr.bf16.mxu1 %v11349_v30 }
 0x136   :  { %v1288_v13 = vsel %vm8100_vm14, %v1280_v58, %v1287_v18  ;;  %v1841_v56 = vsel %vm7885_vm4, %v1289_v42, %v1840_v25  ;;  %v3045_v61 = vsel %vm7919_vm8, %v3043_v40, %v3044_v34  ;;  %v666_v62 = vmax.f32 %v480_v39, 0.0  ;;  %v8406_v34 = vld [vmem:[#allocation2 + $0xec] sm:$0x1]  ;;  %v2116_v39 = vld [vmem:[#allocation2 + $0x30] sm:$0xe] }
 0x137   :  { %1839 = vst.msk [vmem:[#allocation2 + $0x70] sm:$0xf] %vm739_vm0, %v1288_v13  ;;  %1842 = vst [vmem:[#allocation2 + $0x74] sm:$0x1] %v1841_v56  ;;  %v1858_v58 = vsel %vm8072_vm13, %v1330_v48, %v1857_v12  ;;  %v8386_v6 = vrot.slane %v2203_v20, 5  ;;  %v2213_v33 = vshrl.u32 %v8205_v11, 16  ;;  %v8391_v55 = vcombine.low %v3042_v50, %v3045_v61 }
 0x138   :  { %1859 = vst [vmem:[#allocation2 + $0x90] sm:$0xf] %v1858_v58  ;;  %v8389_v8 = vrot.slane %v1308_v2, 7  ;;  %v8400_v22 = vrot.slane %v2176_v45, 4  ;;  %v6904_v20 = vpack.c.bf16 %v666_v62, %v666_v62  ;;  %v8404_v29 = vcombine.low %v8382_v1, %v8371_v57  ;;  %v8418_v40 = vld [vmem:[#allocation2 + $0x38] sm:$0x1]  ;;  %4895 = vmatpush1.bf16.msra.mxu1 %v7600_v24 }
 0x139   :  { %v1331_v18 = vrot.slane %v8350_v27, 4  ;;  %v8409_v42 = vrot.slane %v2179_v49, 5  ;;  %7393 = vmatmul.mubr.msk.bf16.vlgmr.msra.gmra.mxu0 %vm4122_vm15, %v8391_v55  ;;  %v3139_v5 = vrot.slane %v8371_v57, 5  ;;  %v6604_v48 = vrot.slane %v2131_v17, 9  ;;  %v7350_v27 = vpop.f32.mrf.mxu0  ;;  %v8423_v56 = vld [vmem:[#allocation2 + $0x34] sm:$0xf]  ;;  %4896 = vmatprep.subr.bf16.mxu1 %v11349_v30 }
 0x13a   :  { %11451 = vst [vmem:[#allocation10_spill] sm:$0xff] %v8404_v29  ;;  %v1313_v12 = vor.u32 %v1311_v23, %v8389_v8  ;;  %v1333_v45 = vshrl.u32 %v6904_v20, 16  ;;  %v1336_v46 = vshll.u32 %v6904_v20, 16  ;;  %3866 = vrot.lane.b32.xlu1 %v8404_v29, %s7727_s15  ;;  %v472_v50 = vadd.f32 %v8052_v26, %v471_v0  ;;  %v7601_v23 = vld [vmem:[%s11341_s3 + $0x8] sm:$0xff]   ;;  %v8439_v20 = vld [vmem:[%s11342_s2] ss:$0 sm:$0xff] }
 0x13b   :  { %v3141_v51 = vrot.slane %v3139_v5, 4  ;;  %v3142_v13 = vrot.slane %v8406_v34, 5  ;;  %v6591_v2 = vrot.slane %v2116_v39, 9  ;;  %v2560_v58 = vshrl.u32 %v8382_v1, 16 }
 0x13c   :  { %v1851_v49 = vsel %vm8072_vm13, %v1313_v12, %v1850_v60  ;;  %v1335_v26 = vrot.slane %v1333_v45, 7  ;;  %v664_v61 = vmax.f32 %v472_v50, 0.0  ;;  %v3048_v62 = vrot.slane %v8423_v56, 5  ;;  %v1861_v60 = vld [vmem:[#allocation2 + $0x98] sm:$0x1]  ;;  %4897 = vmatpush1.bf16.msra.mxu1 %v7601_v23 }
 0x13d   :  { %1852 = vst [vmem:[#allocation2 + $0x84] sm:$0xf] %v1851_v49  ;;  %v3140_v0 = vsel %vm7919_vm8, %v6604_v48, %v3139_v5  ;;  %v3143_v17 = vsel %vm7919_vm8, %v3141_v51, %v3142_v13  ;;  %v3051_v24 = vrot.slane %v8418_v40, 5  ;;  %v493_v39 = vadd.f32 %v8439_v20, %v7350_v27  ;;  %v8446_v5 = vld [vmem:[#allocation2 + $0x30] sm:$0xf]  ;;  %v484_v48 = vpop.f32.mrf.mxu0  ;;  %4898 = vmatprep.subr.bf16.mxu1 %v11349_v30 }
 0x13e   :  { %v1338_v12 = vor.u32 %v1336_v46, %v1335_v26  ;;  %v1340_v45 = vrot.slane %v1335_v26, 4  ;;  %v8442_v50 = vcombine.low %v3140_v0, %v3143_v17  ;;  %v6902_v49 = vpack.c.bf16 %v664_v61, %v664_v61  ;;  %3766 = vrot.lane.b32.xlu1 %v8260_v9, %s7725_s13  ;;  %v2117_v27 = vld [vmem:[#allocation2 + $0x3c] sm:$0xe]  ;;  %v7602_v46 = vld [vmem:[%s11341_s3] sm:$0xff]  }
 0x13f   :  { %v2563_v51 = vshll.u32 %v8382_v1, 16  ;;  %v3049_v13 = vsel %vm7919_vm8, %v6591_v2, %v3048_v62  ;;  %v3050_v47 = vrot.slane %v3048_v62, 4  ;;  %v669_v19 = vmax.f32 %v493_v39, 0.0  ;;  %v2015_v61 = vld [vmem:[#allocation2 + $0x40] sm:$0xf]  ;;  %v7351_v25 = vpop.f32.mrf.mxu0 }
 0x140   :  { %v1339_v9 = vsel %vm8100_vm14, %v1331_v18, %v1338_v12  ;;  %v1862_v23 = vsel %vm7885_vm4, %v1340_v45, %v1861_v60  ;;  %3942 = vrot.lane.b32.xlu0 %v8442_v50, %s7726_s14  ;;  %v1316_v26 = vshrl.u32 %v6902_v49, 16  ;;  %v1319_v2 = vshll.u32 %v6902_v49, 16  ;;  %v2081_v62 = vld [vmem:[#allocation2 + $0x44] sm:$0x1]  ;;  %4899 = vmatpush1.bf16.msra.mxu1 %v7602_v46 }
 0x141   :  { %v1314_v0 = vrot.slane %v8389_v8, 4  ;;  %1860 = vst.msk [vmem:[#allocation2 + $0x94] sm:$0xf] %vm739_vm0, %v1339_v9  ;;  %1863 = vst [vmem:[#allocation2 + $0x98] sm:$0x1] %v1862_v23  ;;  %v3052_v17 = vsel %vm7919_vm8, %v3050_v47, %v3051_v24  ;;  %v6907_v39 = vpack.c.bf16 %v669_v19, %v669_v19  ;;  %v8467_v18 = vcombine.low %v8446_v5, %v8423_v56 }
 0x142   :  { %v1318_v60 = vrot.slane %v1316_v26, 7  ;;  %v8469_v12 = vcombine.low %v3049_v13, %v3052_v17  ;;  %v485_v45 = vadd.f32 %v8439_v20, %v484_v48  ;;  %v6592_v49 = vrot.slane %v2117_v27, 9  ;;  %3798 = vrot.lane.b32.xlu1 %v8326_v41, %s7725_s13  ;;  %v1854_v8 = vld [vmem:[#allocation2 + $0x8c] sm:$0x1]  ;;  %4900 = vmatprep.subr.bf16.mxu1 %v11349_v30  ;;  %v7603_v27 = vld [vmem:[%s11341_s3 + $0x78] sm:$0xff]  }
 0x143   :  { %11452 = vst [vmem:[#allocation11_spill] sm:$0xff] %v8467_v18  ;;  %v1359_v9 = vshrl.u32 %v6907_v39, 16  ;;  %v1362_v23 = vshll.u32 %v6907_v39, 16  ;;  %v3055_v47 = vrot.slane %v2015_v61, 5  ;;  %v3058_v19 = vrot.slane %v2081_v62, 5 }
 0x144   :  { %v1321_v24 = vor.u32 %v1319_v2, %v1318_v60  ;;  %v1323_v37 = vrot.slane %v1318_v60, 4  ;;  %7396 = vmatprep.mubr.msk.bf16.mxu0 %vm4122_vm15, %v8469_v12  ;;  %3986 = vrot.lane.b32.xlu0 %v8467_v18, %s7725_s13  ;;  %v667_v48 = vmax.f32 %v485_v45, 0.0  ;;  %v496_v13 = vadd.f32 %v8439_v20, %v7351_v25  ;;  %v1871_v39 = vld [vmem:[#allocation2 + $0xa8] sm:$0xf]  ;;  %v487_v45 = vpop.f32.mrf.mxu0 }
 0x145   :  { %v8484_v26 = vrot.slane %v1359_v9, 7  ;;  %v3056_v2 = vsel %vm7919_vm8, %v6592_v49, %v3055_v47  ;;  %v3057_v61 = vrot.slane %v3055_v47, 4  ;;  %4901 = vmatpush2.bf16.msra.mxu1 %v7603_v27  ;;  %v8496_v9 = vrot.slane %v2560_v58, 4  ;;  %v8510_v47 = vld [vmem:[#allocation2 + $0x108] sm:$0xf] }
 0x146   :  { %v1322_v62 = vsel %vm8100_vm14, %v1314_v0, %v1321_v24  ;;  %v1855_v17 = vsel %vm7885_vm4, %v1323_v37, %v1854_v8  ;;  %v6905_v25 = vpack.c.bf16 %v667_v48, %v667_v48  ;;  %v670_v60 = vmax.f32 %v496_v13, 0.0  ;;  %3764 = vrot.lane.b32.xlu1 %v8355_v44, %s7725_s13  ;;  %4902 = vmatprep.subr.bf16.mxu1 %v11349_v30  ;;  %v7604_v44 = vld [vmem:[%s11341_s3 + $0x70] sm:$0xff]   ;;  %v8512_v24 = vld [vmem:[#allocation2 + $0x10c] sm:$0xf] }
 0x147   :  { %v8498_v49 = vrot.slane %v2563_v51, 5  ;;  %1853 = vst.msk [vmem:[#allocation2 + $0x88] sm:$0xf] %vm739_vm0, %v1322_v62  ;;  %1856 = vst [vmem:[#allocation2 + $0x8c] sm:$0x1] %v1855_v17  ;;  %v1364_v0 = vor.u32 %v1362_v23, %v8484_v26  ;;  %v3059_v37 = vsel %vm7919_vm8, %v3057_v61, %v3058_v19  ;;  %v8520_v13 = vcombine.low %v8510_v47, %v8512_v24  ;;  %v7354_v17 = vpop.f32.mrf.mxu0 }
 0x148   :  { %v1342_v8 = vshrl.u32 %v6905_v25, 16  ;;  %v1345_v1 = vshll.u32 %v6905_v25, 16  ;;  %v8508_v58 = vcombine.low %v3056_v2, %v3059_v37  ;;  %v6908_v51 = vpack.c.bf16 %v670_v60, %v670_v60  ;;  %v1864_v25 = vld [vmem:[#allocation2 + $0x9c] sm:$0xf] }
 0x149   :  { %v1872_v23 = vsel %vm8072_vm13, %v1364_v0, %v1871_v39  ;;  %11453 = vst [vmem:[#allocation12_spill] sm:$0xff] %v8520_v13  ;;  %v488_v62 = vadd.f32 %v8439_v20, %v487_v45  ;;  %v1365_v39 = vrot.slane %v8484_v26, 4  ;;  %4018 = vrot.lane.b32.xlu0 %v8520_v13, %s7725_s13  ;;  %v509_v60 = vadd.f32 %v8439_v20, %v7354_v17  ;;  %v7605_v45 = vld [vmem:[%s11341_s3 + $0x68] sm:$0xff]  }
 0x14a   :  { %1873 = vst [vmem:[#allocation2 + $0xa8] sm:$0xf] %v1872_v23  ;;  %v8522_v27 = vrot.slane %v1342_v8, 7  ;;  %7397 = vmatmul.mubr.msk.bf16.gmra.mxu0 %vm4122_vm15, %v8508_v58  ;;  %v1367_v2 = vshrl.u32 %v6908_v51, 16  ;;  %v1370_v61 = vshll.u32 %v6908_v51, 16  ;;  %3796 = vrot.lane.b32.xlu1 %v8442_v50, %s7725_s13  ;;  %v2206_v0 = vor.u32 %v8386_v6, %v8375_v59 }
 0x14b   :  { %v2209_v37 = vshll.u32 %v8205_v11, 16  ;;  %4903 = vmatpush2.bf16.msra.mxu1 %v7604_v44  ;;  %v668_v51 = vmax.f32 %v488_v62, 0.0  ;;  %v1875_v23 = vld [vmem:[#allocation2 + $0xb0] sm:$0x1]  ;;  %v673_v17 = vmax.f32 %v509_v60, 0.0  ;;  %v2215_v59 = vrot.slane %v2213_v33, 4 }
 0x14c   :  { %v1347_v50 = vor.u32 %v1345_v1, %v8522_v27  ;;  %v1369_v8 = vrot.slane %v1367_v2, 7  ;;  %4904 = vmatprep.subr.bf16.mxu1 %v11349_v30  ;;  %v2207_v46 = vrot.slane %v2206_v0, 4  ;;  %v2219_v60 = vshll.u32 %v8239_v38, 16  ;;  %v500_v0 = vpop.f32.mrf.mxu0  ;;  %v8551_v11 = vld [vmem:[#allocation2 + $0x4c] sm:$0xf] }
 0x14d   :  { %v2211_v48 = vrot.slane %v2209_v37, 5  ;;  %v6906_v21 = vpack.c.bf16 %v668_v51, %v668_v51  ;;  %v6911_v1 = vpack.c.bf16 %v673_v17, %v673_v17  ;;  %v2118_v33 = vld [vmem:[#allocation2 + $0x48] sm:$0xe]  ;;  %v2119_v38 = vld [vmem:[#allocation2 + $0x54] sm:$0xe]  ;;  %v11456_v29 = vrot.slane %v8522_v27, 4 }
 0x14e   :  { %v1865_v6 = vsel %vm8072_vm13, %v1347_v50, %v1864_v25  ;;  %v1372_v44 = vor.u32 %v1370_v61, %v1369_v8  ;;  %v1374_v19 = vrot.slane %v1369_v8, 4  ;;  %3840 = vrot.lane.b32.xlu1 %v8467_v18, %s7727_s15  ;;  %v7607_v61 = vld [vmem:[%s11341_s3 + $0x60] sm:$0xff]   ;;  %v2221_v17 = vrot.slane %v2219_v60, 5  ;;  %v7355_v60 = vpop.f32.mrf.mxu0  ;;  %v936_v18 = vld [vmem:[#allocation2 + $0x11c] sm:$0x1] }
 0x14f   :  { %1866 = vst [vmem:[#allocation2 + $0x9c] sm:$0xf] %v1865_v6  ;;  %v2212_v2 = vsel %vm7948_vm11, %v2207_v46, %v2211_v48  ;;  %v2216_v62 = vor.u32 %v2215_v59, %v2211_v48  ;;  %4905 = vmatpush2.bf16.msra.mxu1 %v7605_v45  ;;  %v1350_v50 = vshrl.u32 %v6906_v21, 16  ;;  %v1353_v46 = vshll.u32 %v6906_v21, 16  ;;  %v8560_v48 = vld [vmem:[#allocation2 + $0x50] sm:$0x1] }
 0x150   :  { %v1373_v25 = vsel %vm8100_vm14, %v1365_v39, %v1372_v44  ;;  %v1876_v37 = vsel %vm7885_vm4, %v1374_v19, %v1875_v23  ;;  %4906 = vmatprep.subr.bf16.mxu1 %v11349_v30  ;;  %v1393_v45 = vshrl.u32 %v6911_v1, 16  ;;  %v1396_v8 = vshll.u32 %v6911_v1, 16  ;;  %v1868_v6 = vld [vmem:[#allocation2 + $0xa4] sm:$0x1]  ;;  %v2019_v1 = vld [vmem:[#allocation2 + $0x58] sm:$0xf] }
 0x151   :  { %1874 = vst.msk [vmem:[#allocation2 + $0xac] sm:$0xf] %vm739_vm0, %v1373_v25  ;;  %1877 = vst [vmem:[#allocation2 + $0xb0] sm:$0x1] %v1876_v37  ;;  %v2217_v51 = vrot.slane %v2216_v62, 4  ;;  %v1352_v59 = vrot.slane %v1350_v50, 7  ;;  %v501_v39 = vadd.f32 %v8439_v20, %v500_v0 }
 0x152   :  { %v6593_v44 = vrot.slane %v2118_v33, 9  ;;  %v3062_v19 = vrot.slane %v8551_v11, 5  ;;  %3872 = vrot.lane.b32.xlu1 %v8520_v13, %s7727_s15  ;;  %v8568_v21 = vrot.slane %v1393_v45, 7  ;;  %v3065_v25 = vrot.slane %v8560_v48, 5  ;;  %v7608_v0 = vld [vmem:[%s11341_s3 + $0x58] sm:$0xff]  }
 0x153   :  { %v2222_v23 = vsel %vm7948_vm11, %v2217_v51, %v2221_v17  ;;  %v6594_v62 = vrot.slane %v2119_v38, 9  ;;  %4907 = vmatpush2.bf16.msra.mxu1 %v7607_v61  ;;  %v1355_v33 = vor.u32 %v1353_v46, %v1352_v59  ;;  %v1357_v37 = vrot.slane %v1352_v59, 4  ;;  %v1885_v50 = vld [vmem:[#allocation2 + $0xc0] sm:$0xf]  ;;  %v2083_v30 = vld [vmem:[#allocation2 + $0x5c] sm:$0x1] }
 0x154   :  { %v8576_v26 = vcombine.low %v2212_v2, %v2222_v23  ;;  %v671_v45 = vmax.f32 %v501_v39, 0.0  ;;  %v11455_v13 = vmov 0   ;;  %v2632_v51 = vshrl.u32 %v8510_v47, 16 }
 0x155   :  { %4908 = vmatprep.subr.bf16.mxu1 %v11455_v13  ;;  %v1398_v17 = vor.u32 %v1396_v8, %v8568_v21  ;;  %v3063_v61 = vsel %vm7919_vm8, %v6593_v44, %v3062_v19  ;;  %v3064_v38 = vrot.slane %v3062_v19, 4  ;;  %v1356_v46 = vsel %vm8100_vm14, %v11456_v29, %v1355_v33  ;;  %v503_v44 = vpop.f32.mrf.mxu0  ;;  %v7609_v19 = vld [vmem:[%s11341_s3 + $0x50] sm:$0xff]  }
 0x156   :  { %11454 = vst [vmem:[#allocation13_spill] sm:$0xff] %v8576_v26  ;;  %v1869_v2 = vsel %vm7885_vm4, %v1357_v37, %v1868_v6  ;;  %4052 = vrot.lane.b32.xlu0 %v8576_v26, %s7727_s15  ;;  %v6909_v59 = vpack.c.bf16 %v671_v45, %v671_v45  ;;  %v3069_v39 = vrot.slane %v2019_v1, 5  ;;  %3606 = vrot.lane.b32.xlu1 %v8576_v26, %s7726_s14  ;;  %1867 = vst.msk [vmem:[#allocation2 + $0xa0] sm:$0xf] %vm739_vm0, %v1356_v46  ;;  %v1878_v45 = vld [vmem:[#allocation2 + $0xb4] sm:$0xf]  ;;  %v7366_v46 = vpop.f32.mrf.mxu1 }
 0x157   :  { %1870 = vst [vmem:[#allocation2 + $0xa4] sm:$0x1] %v1869_v2  ;;  %v1886_v27 = vsel %vm8072_vm13, %v1398_v17, %v1885_v50  ;;  %v3066_v29 = vsel %vm7919_vm8, %v3064_v38, %v3065_v25  ;;  %v3072_v8 = vrot.slane %v2083_v30, 5  ;;  %v512_v6 = vadd.f32 %v8439_v20, %v7355_v60  ;;  %4909 = vmatpush2.bf16.msra.mxu1 %v7608_v0 }
 0x158   :  { %1887 = vst [vmem:[#allocation2 + $0xc0] sm:$0xf] %v1886_v27  ;;  %v1376_v23 = vshrl.u32 %v6909_v59, 16  ;;  %v1379_v1 = vshll.u32 %v6909_v59, 16  ;;  %v8602_v33 = vcombine.low %v3063_v61, %v3066_v29  ;;  %v3070_v37 = vsel %vm7919_vm8, %v6594_v62, %v3069_v39  ;;  %4910 = vmatprep.subr.bf16.mxu1 %v11455_v13  ;;  %v7610_v27 = vld [vmem:[%s11341_s3 + $0x48] sm:$0xff]  }
 0x159   :  { %v3071_v25 = vrot.slane %v3069_v39, 4  ;;  %v674_v30 = vmax.f32 %v512_v6, 0.0  ;;  %v2590_v60 = vor.u32 %v8233_v14, %v8231_v35  ;;  %v2593_v0 = vshll.u32 %v8194_v4, 16  ;;  %v829_v39 = vld [vmem:[#allocation2 + $0x120] sm:$0x1] }
 0x15a   :  { %v8610_v50 = vrot.slane %v1376_v23, 7  ;;  %7400 = vmatprep.mubr.msk.bf16.mxu0 %vm4122_vm15, %v8602_v33  ;;  %v11457_v17 = vshrl.u32 %v8194_v4, 16  ;;  %v2603_v62 = vshll.u32 %v8278_v32, 16  ;;  %v504_v38 = vadd.f32 %v8439_v20, %v503_v44  ;;  %v826_v44 = vld [vmem:[#allocation2 + $0x114] sm:$0x1] }
 0x15b   :  { %v3073_v2 = vsel %vm7919_vm8, %v3071_v25, %v3072_v8  ;;  %v6912_v35 = vpack.c.bf16 %v674_v30, %v674_v30  ;;  %v2591_v14 = vrot.slane %v2590_v60, 4  ;;  %v2595_v59 = vrot.slane %v2593_v0, 5  ;;  %4911 = vmatpush2.bf16.msra.mxu1 %v7609_v19  ;;  %v548_v60 = vpop.f32.mrf.mxu1 }
 0x15c   :  { %v2599_v61 = vrot.slane %v11457_v17, 4  ;;  %v1399_v4 = vrot.slane %v8568_v21, 4  ;;  %v1381_v29 = vor.u32 %v1379_v1, %v8610_v50  ;;  %v8625_v32 = vcombine.low %v3070_v37, %v3073_v2  ;;  %4912 = vmatprep.subr.bf16.mxu1 %v11455_v13 }
 0x15d   :  { %v2605_v6 = vrot.slane %v2603_v62, 5  ;;  %v1401_v8 = vshrl.u32 %v6912_v35, 16  ;;  %v1404_v23 = vshll.u32 %v6912_v35, 16  ;;  %v2596_v25 = vsel %vm7948_vm11, %v2591_v14, %v2595_v59  ;;  %v1889_v14 = vld [vmem:[#allocation2 + $0xc8] sm:$0x1] }
 0x15e   :  { %v2600_v19 = vor.u32 %v2599_v61, %v2595_v59  ;;  %v1879_v30 = vsel %vm8072_vm13, %v1381_v29, %v1878_v45  ;;  %7401 = vmatmul.mubr.msk.bf16.gmra.mxu0 %vm4122_vm15, %v8625_v32  ;;  %v672_v21 = vmax.f32 %v504_v38, 0.0  ;;  %v557_v1 = vadd.f32 %v8439_v20, %v7366_v46  ;;  %v7611_v45 = vld [vmem:[%s11341_s3 + $0x40] sm:$0xff]  }
 0x15f   :  { %v830_v37 = vsel %vm7885_vm4, 0, %v829_v39  ;;  %1880 = vst [vmem:[#allocation2 + $0xb4] sm:$0xf] %v1879_v30  ;;  %v1403_v0 = vrot.slane %v1401_v8, 7  ;;  %v549_v62 = vadd.f32 %v8439_v20, %v548_v60  ;;  %v827_v61 = vsel %vm7885_vm4, 0, %v826_v44  ;;  %4913 = vmatpush2.bf16.msra.mxu1 %v7610_v27 }
 0x160   :  { %v2601_v17 = vrot.slane %v2600_v19, 4  ;;  %831 = vst [vmem:[#allocation2 + $0x120] sm:$0x1] %v830_v37  ;;  %v11458_v38 = vshrl.u32 %v8446_v5, 16  ;;  %v11459_v2 = vshll.u32 %v8446_v5, 16  ;;  %v6910_v59 = vpack.c.bf16 %v672_v21, %v672_v21  ;;  %4914 = vmatprep.subr.bf16.mxu1 %v11455_v13 }
 0x161   :  { %v685_v39 = vmax.f32 %v557_v1, 0.0  ;;  %828 = vst [vmem:[#allocation2 + $0x114] sm:$0x1] %v827_v61  ;;  %v1406_v29 = vor.u32 %v1404_v23, %v1403_v0  ;;  %v1408_v27 = vrot.slane %v1403_v0, 4  ;;  %v683_v8 = vmax.f32 %v549_v62, 0.0 }
 0x162   :  { %v8645_v46 = vrot.slane %v11458_v38, 4  ;;  %v8649_v35 = vrot.slane %v11459_v2, 5  ;;  %v2606_v44 = vsel %vm7948_vm11, %v2601_v17, %v2605_v6  ;;  %v1384_v30 = vshrl.u32 %v6910_v59, 16  ;;  %v2120_v5 = vld [vmem:[#allocation2 + $0x60] sm:$0xe]  ;;  %v7367_v2 = vpop.f32.mrf.mxu1 }
 0x163   :  { %v8654_v19 = vcombine.low %v2596_v25, %v2606_v44  ;;  %v1387_v37 = vshll.u32 %v6910_v59, 16  ;;  %v6923_v60 = vpack.c.bf16 %v685_v39, %v685_v39  ;;  %v939_v38 = vld [vmem:[#allocation2 + $0x128] sm:$0x1]  ;;  %v8658_v21 = vrot.slane %v2632_v51, 4  ;;  %v1882_v1 = vld [vmem:[#allocation2 + $0xbc] sm:$0x1]  ;;  %4915 = vmatpush2.bf16.msra.mxu1 %v7611_v45 }
 0x164   :  { %v1407_v13 = vsel %vm8100_vm14, %v1399_v4, %v1406_v29  ;;  %v1890_v23 = vsel %vm7885_vm4, %v1408_v27, %v1889_v14  ;;  %v6921_v6 = vpack.c.bf16 %v683_v8, %v683_v8  ;;  %v8664_v0 = vld [vmem:[#allocation2 + $0x24] sm:$0xf]  ;;  %v1382_v17 = vrot.slane %v8610_v50, 4  ;;  %v8672_v61 = vld [vmem:[#allocation2 + $0x68] sm:$0x1] }
 0x165   :  { %11460 = vst [vmem:[#allocation14_spill] sm:$0xff] %v8654_v19  ;;  %v8666_v25 = vld [vmem:[#allocation2 + $0x64] sm:$0xf]  ;;  %1888 = vst.msk [vmem:[#allocation2 + $0xc4] sm:$0xf] %vm739_vm0, %v1407_v13  ;;  %4084 = vrot.lane.b32.xlu0 %v8654_v19, %s7727_s15  ;;  %v1386_v51 = vrot.slane %v1384_v30, 7  ;;  %3638 = vrot.lane.b32.xlu1 %v8654_v19, %s7726_s14  ;;  %v8678_v50 = vcombine.low %v8664_v0, %v8339_v52 }
 0x166   :  { %1891 = vst [vmem:[#allocation2 + $0xc8] sm:$0x1] %v1890_v23  ;;  %v1495_v4 = vshrl.u32 %v6923_v60, 16  ;;  %v1498_v62 = vshll.u32 %v6923_v60, 16  ;;  %v1478_v14 = vshrl.u32 %v6921_v6, 16  ;;  %v1481_v59 = vshll.u32 %v6921_v6, 16 }
 0x167   :  { %11461 = vst [vmem:[#allocation15_spill] sm:$0xff] %v8678_v50  ;;  %v6595_v45 = vrot.slane %v2120_v5, 9  ;;  %v2121_v39 = vld [vmem:[#allocation2 + $0x6c] sm:$0xe]  ;;  %v1389_v29 = vor.u32 %v1387_v37, %v1386_v51  ;;  %v1391_v27 = vrot.slane %v1386_v51, 4  ;;  %v3076_v8 = vrot.slane %v8666_v25, 5 }
 0x168   :  { %v8680_v44 = vrot.slane %v1495_v4, 7  ;;  %v8683_v30 = vld [vmem:[#allocation2 + $0x70] sm:$0xf]  ;;  %v1927_v60 = vld [vmem:[#allocation2 + $0x120] sm:$0xf]  ;;  %v8685_v13 = vrot.slane %v1478_v14, 7  ;;  %v560_v6 = vadd.f32 %v8439_v20, %v7367_v2  ;;  %v551_v2 = vpop.f32.mrf.mxu1 }
 0x169   :  { %v3079_v23 = vrot.slane %v8672_v61, 5  ;;  %v940_v52 = vsel %vm7895_vm5, 0, %v939_v38  ;;  %v2635_v5 = vshll.u32 %v8510_v47, 16  ;;  %v1390_v37 = vsel %vm8100_vm14, %v1382_v17, %v1389_v29  ;;  %v1920_v19 = vld [vmem:[#allocation2 + $0x114] sm:$0xf]  ;;  %3984 = vrot.lane.b32.xlu0 %v8678_v50, %s7725_s13  ;;  %3838 = vrot.lane.b32.xlu1 %v8678_v50, %s7727_s15 }
 0x16a   :  { %v1883_v51 = vsel %vm7885_vm4, %v1391_v27, %v1882_v1  ;;  %v1500_v4 = vor.u32 %v1498_v62, %v8680_v44  ;;  %941 = vst [vmem:[#allocation2 + $0x128] sm:$0x1] %v940_v52  ;;  %v2085_v14 = vld [vmem:[#allocation2 + $0x74] sm:$0x1]  ;;  %1881 = vst.msk [vmem:[#allocation2 + $0xb8] sm:$0xf] %vm739_vm0, %v1390_v37  ;;  %v1483_v38 = vor.u32 %v1481_v59, %v8685_v13 }
 0x16b   :  { %1884 = vst [vmem:[#allocation2 + $0xbc] sm:$0x1] %v1883_v51  ;;  %v3077_v1 = vsel %vm7919_vm8, %v6595_v45, %v3076_v8  ;;  %v3078_v17 = vrot.slane %v3076_v8, 4  ;;  %v686_v29 = vmax.f32 %v560_v6, 0.0  ;;  %v6596_v27 = vrot.slane %v2121_v39, 9 }
 0x16c   :  { %v1928_v62 = vsel %vm8072_vm13, %v1500_v4, %v1927_v60  ;;  %v3083_v52 = vrot.slane %v8683_v30, 5  ;;  %v1921_v47 = vsel %vm8072_vm13, %v1483_v38, %v1920_v19  ;;  %v3086_v59 = vrot.slane %v2085_v14, 5  ;;  %v8718_v6 = vld [vmem:[#allocation2 + $0x7c] sm:$0xf]  ;;  %v2122_v4 = vld [vmem:[#allocation2 + $0x78] sm:$0xe] }
 0x16d   :  { %1929 = vst [vmem:[#allocation2 + $0x120] sm:$0xf] %v1928_v62  ;;  %v3080_v37 = vsel %vm7919_vm8, %v3078_v17, %v3079_v23  ;;  %v552_v51 = vadd.f32 %v8439_v20, %v551_v2  ;;  %1922 = vst [vmem:[#allocation2 + $0x114] sm:$0xf] %v1921_v47  ;;  %v6924_v8 = vpack.c.bf16 %v686_v29, %v686_v29  ;;  %v8720_v62 = vrot.slane %v2635_v5, 5 }
 0x16e   :  { %v8714_v45 = vcombine.low %v3077_v1, %v3080_v37  ;;  %v3084_v39 = vsel %vm7919_vm8, %v6596_v27, %v3083_v52  ;;  %v3085_v60 = vrot.slane %v3083_v52, 4  ;;  %v937_v23 = vsel %vm7895_vm5, 0, %v936_v18  ;;  %v8725_v20 = vld [vmem:[#allocation2 + $0xfc] sm:$0xf]  ;;  %v8727_v14 = vld [vmem:[#allocation2 + $0x80] sm:$0x1] }
 0x16f   :  { %v684_v38 = vmax.f32 %v552_v51, 0.0  ;;  %11462 = vst [vmem:[#allocation16_spill] sm:$0xff] %v8727_v14  ;;  %v1503_v47 = vshrl.u32 %v6924_v8, 16  ;;  %v1506_v1 = vshll.u32 %v6924_v8, 16  ;;  %938 = vst [vmem:[#allocation2 + $0x11c] sm:$0x1] %v937_v23 }
 0x170   :  { %7404 = vmatprep.mubr.msk.bf16.mxu0 %vm4122_vm15, %v8714_v45  ;;  %v3087_v5 = vsel %vm7919_vm8, %v3085_v60, %v3086_v59  ;;  %v2123_v17 = vld [vmem:[#allocation2 + $0x84] sm:$0xe]  ;;  %v1501_v29 = vrot.slane %v8680_v44, 4  ;;  %v1484_v18 = vrot.slane %v8685_v13, 4  ;;  %v8738_v37 = vld [vmem:[#allocation2 + $0x100] sm:$0xf] }
 0x171   :  { %v8736_v27 = vcombine.low %v3084_v39, %v3087_v5  ;;  %v6922_v52 = vpack.c.bf16 %v684_v38, %v684_v38  ;;  %v8740_v51 = vld [vmem:[#allocation2 + $0x88] sm:$0xf]  ;;  %v1505_v19 = vrot.slane %v1503_v47, 7  ;;  %v8744_v8 = vcombine.low %v8725_v20, %v8738_v37  ;;  %v2087_v23 = vld [vmem:[#allocation2 + $0x8c] sm:$0x1]  ;;  %v79_v44 = vld [vmem:[%s11340_s0 + $0xd0] sm:$0xff]  }
 0x172   :  { %11464 = vst [vmem:[#allocation18_spill] sm:$0xff] %v8740_v51  ;;  %v2134_v2 = vld [vmem:[#allocation2 + $0x108] sm:$0xe]  ;;  %v6597_v59 = vrot.slane %v2122_v4, 9  ;;  %v3090_v60 = vrot.slane %v8718_v6, 5  ;;  %v3093_v47 = vrot.slane %v8727_v14, 5  ;;  %7376 = vmatprep.mubr.bf16.mxu1 %v79_v44 }
 0x173   :  { %11463 = vst [vmem:[#allocation17_spill] sm:$0xff] %v8736_v27  ;;  %11465 = vst [vmem:[#allocation19_spill] sm:$0xff] %v8744_v8  ;;  %v1931_v13 = vld [vmem:[#allocation2 + $0x128] sm:$0x1]  ;;  %7405 = vmatmul.mubr.msk.bf16.gmra.mxu0 %vm4122_vm15, %v8736_v27  ;;  %v1486_v39 = vshrl.u32 %v6922_v52, 16  ;;  %v1489_v38 = vshll.u32 %v6922_v52, 16  ;;  %v1508_v50 = vor.u32 %v1506_v1, %v1505_v19  ;;  %4016 = vrot.lane.b32.xlu0 %v8744_v8, %s7725_s13 }
 0x174   :  { %v6598_v5 = vrot.slane %v2123_v17, 9  ;;  %v1510_v28 = vrot.slane %v1505_v19, 4  ;;  %v3091_v4 = vsel %vm7919_vm8, %v6597_v59, %v3090_v60  ;;  %v3092_v26 = vrot.slane %v3090_v60, 4  ;;  %3870 = vrot.lane.b32.xlu1 %v8744_v8, %s7727_s15  ;;  %v8760_v52 = vld [vmem:[#allocation2 + $0x110] sm:$0x1]  ;;  %v81_v19 = vld [vmem:[%s11340_s0 + $0xd8] sm:$0xff]  }
 0x175   :  { %v1488_v10 = vrot.slane %v1486_v39, 7  ;;  %v3097_v27 = vrot.slane %v8740_v51, 5  ;;  %v3100_v7 = vrot.slane %v2087_v23, 5  ;;  %v1509_v1 = vsel %vm8100_vm14, %v1501_v29, %v1508_v50  ;;  %v8771_v39 = vld [vmem:[#allocation2 + $0x94] sm:$0xf]  ;;  %7377 = vmatmul.mubr.bf16.gmra.mxu1 %v81_v19 }
 0x176   :  { %v1932_v17 = vsel %vm7885_vm4, %v1510_v28, %v1931_v13  ;;  %v3094_v59 = vsel %vm7919_vm8, %v3092_v26, %v3093_v47  ;;  %v6607_v60 = vrot.slane %v2134_v2, 9  ;;  %v2124_v8 = vld [vmem:[#allocation2 + $0x90] sm:$0xe]  ;;  %1930 = vst.msk [vmem:[#allocation2 + $0x124] sm:$0xf] %vm739_vm0, %v1509_v1  ;;  %v3160_v2 = vrot.slane %v8512_v24, 5 }
 0x177   :  { %1933 = vst [vmem:[#allocation2 + $0x128] sm:$0x1] %v1932_v17  ;;  %v1491_v23 = vor.u32 %v1489_v38, %v1488_v10  ;;  %v1493_v51 = vrot.slane %v1488_v10, 4  ;;  %v1924_v14 = vld [vmem:[#allocation2 + $0x11c] sm:$0x1]  ;;  %v8774_v36 = vcombine.low %v3091_v4, %v3094_v59  ;;  %v3098_v50 = vsel %vm7919_vm8, %v6598_v5, %v3097_v27  ;;  %3916 = vrot.lane.b32.xlu0 %v8469_v12, %s7726_s14 }
 0x178   :  { %v2088_v28 = vld [vmem:[#allocation2 + $0x98] sm:$0x1]  ;;  %v2133_v29 = vld [vmem:[#allocation2 + $0xfc] sm:$0xe]  ;;  %v3099_v26 = vrot.slane %v3097_v27, 4  ;;  %v3163_v13 = vrot.slane %v8760_v52, 5 }
 0x179   :  { %11466 = vst [vmem:[#allocation20_spill] sm:$0xff] %v8774_v36  ;;  %v2125_v47 = vld [vmem:[#allocation2 + $0x9c] sm:$0xe]  ;;  %v1492_v10 = vsel %vm8100_vm14, %v1484_v18, %v1491_v23  ;;  %v1925_v38 = vsel %vm7885_vm4, %v1493_v51, %v1924_v14  ;;  %7408 = vmatprep.mubr.msk.bf16.mxu0 %vm4122_vm15, %v8774_v36  ;;  %v6599_v44 = vrot.slane %v2124_v8, 9  ;;  %v3104_v5 = vrot.slane %v8771_v39, 5 }
 0x17a   :  { %v2031_v4 = vld [vmem:[#allocation2 + $0xa0] sm:$0xf]  ;;  %v2089_v1 = vld [vmem:[#allocation2 + $0xa4] sm:$0x1]  ;;  %1923 = vst.msk [vmem:[#allocation2 + $0x118] sm:$0xf] %vm739_vm0, %v1492_v10  ;;  %v3101_v27 = vsel %vm7919_vm8, %v3099_v26, %v3100_v7  ;;  %v3161_v18 = vsel %vm7919_vm8, %v6607_v60, %v3160_v2 }
 0x17b   :  { %1926 = vst [vmem:[#allocation2 + $0x11c] sm:$0x1] %v1925_v38  ;;  %v3162_v17 = vrot.slane %v3160_v2, 4  ;;  %v3107_v14 = vrot.slane %v2088_v28, 5  ;;  %v8794_v51 = vld [vmem:[#allocation2 + $0x104] sm:$0x1]  ;;  %v8796_v59 = vcombine.low %v3098_v50, %v3101_v27  ;;  %v3105_v8 = vsel %vm7919_vm8, %v6599_v44, %v3104_v5 }
 0x17c   :  { %v3106_v23 = vrot.slane %v3104_v5, 4  ;;  %v6600_v36 = vrot.slane %v2125_v47, 9  ;;  %v3111_v38 = vrot.slane %v2031_v4, 5  ;;  %v3114_v7 = vrot.slane %v2089_v1, 5  ;;  %v7659_v4 = vld [vmem:[#allocation2 + $0x10] sm:$0xf] }
 0x17d   :  { %11467 = vst [vmem:[#allocation21_spill] sm:$0xff] %v8796_v59  ;;  %v3164_v10 = vsel %vm7919_vm8, %v3162_v17, %v3163_v13  ;;  %v6606_v26 = vrot.slane %v2133_v29, 9  ;;  %7409 = vmatmul.mubr.msk.bf16.gmra.mxu0 %vm4122_vm15, %v8796_v59  ;;  %v3153_v50 = vrot.slane %v8738_v37, 5  ;;  %v3156_v28 = vrot.slane %v8794_v51, 5  ;;  %v2126_v17 = vld [vmem:[#allocation2 + $0xa8] sm:$0xe] }
 0x17e   :  { %v8804_v19 = vcombine.low %v3161_v18, %v3164_v10  ;;  %v3108_v60 = vsel %vm7919_vm8, %v3106_v23, %v3107_v14  ;;  %v3112_v13 = vsel %vm7919_vm8, %v6600_v36, %v3111_v38  ;;  %v3113_v47 = vrot.slane %v3111_v38, 4  ;;  %v2033_v23 = vld [vmem:[#allocation2 + $0xac] sm:$0xf]  ;;  %v2090_v10 = vld [vmem:[#allocation2 + $0xb0] sm:$0x1] }
 0x17f   :  { %v8810_v2 = vcombine.low %v3105_v8, %v3108_v60  ;;  %v2182_v29 = vor.u32 %v8409_v42, %v8400_v22  ;;  %v3154_v44 = vsel %vm7919_vm8, %v6606_v26, %v3153_v50  ;;  %v3155_v5 = vrot.slane %v3153_v50, 4  ;;  %v7660_v42 = vld [vmem:[#allocation2 + $0x14] sm:$0x1]  ;;  %v8826_v8 = vld [vmem:[#allocation2 + $0x48] sm:$0xf] }
 0x180   :  { %3948 = vrot.lane.b32.xlu0 %v8804_v19, %s7726_s14  ;;  %v2185_v1 = vshll.u32 %v7659_v4, 16  ;;  %v11469_v27 = vshrl.u32 %v8289_v54, 16  ;;  %v3115_v36 = vsel %vm7919_vm8, %v3113_v47, %v3114_v7  ;;  %v2195_v14 = vshll.u32 %v7660_v42, 16  ;;  %v2035_v4 = vld [vmem:[#allocation2 + $0xb8] sm:$0xf] }
 0x181   :  { %11468 = vst [vmem:[#allocation22_spill] sm:$0xff] %v8810_v2  ;;  %7412 = vmatprep.mubr.msk.bf16.mxu0 %vm4122_vm15, %v8810_v2  ;;  %v2183_v22 = vrot.slane %v2182_v29, 4  ;;  %v11470_v38 = vshrl.u32 %v8664_v0, 16  ;;  %v8832_v54 = vcombine.low %v3112_v13, %v3115_v36  ;;  %v3157_v60 = vsel %vm7919_vm8, %v3155_v5, %v3156_v28  ;;  %v2091_v2 = vld [vmem:[#allocation2 + $0xbc] sm:$0x1] }
 0x182   :  { %v2191_v18 = vrot.slane %v11469_v27, 4  ;;  %v2187_v50 = vrot.slane %v2185_v1, 5  ;;  %v2127_v27 = vld [vmem:[#allocation2 + $0xb4] sm:$0xe]  ;;  %v11471_v7 = vshll.u32 %v8664_v0, 16  ;;  %v2608_v29 = vshrl.u32 %v8725_v20, 16 }
 0x183   :  { %v8830_v26 = vrot.slane %v11470_v38, 4  ;;  %v8841_v42 = vcombine.low %v3154_v44, %v3157_v60  ;;  %v2197_v59 = vrot.slane %v2195_v14, 5  ;;  %v8849_v5 = vcombine.low %v8826_v8, %v8551_v11 }
 0x184   :  { %v8838_v47 = vrot.slane %v11471_v7, 5  ;;  %3914 = vrot.lane.b32.xlu0 %v8391_v55, %s7726_s14  ;;  %v2188_v13 = vsel %vm7948_vm11, %v2183_v22, %v2187_v50  ;;  %v2192_v28 = vor.u32 %v2191_v18, %v2187_v50  ;;  %v6601_v0 = vrot.slane %v2126_v17, 9 }
 0x185   :  { %11472 = vst [vmem:[#allocation23_spill] sm:$0xff] %v8849_v5  ;;  %v3118_v1 = vrot.slane %v2033_v23, 5  ;;  %v3121_v36 = vrot.slane %v2090_v10, 5  ;;  %v6602_v38 = vrot.slane %v2127_v27, 9  ;;  %v3125_v7 = vrot.slane %v2035_v4, 5  ;;  %7413 = vmatmul.mubr.msk.bf16.gmra.mxu0 %vm4122_vm15, %v8832_v54 }
 0x186   :  { %v2193_v44 = vrot.slane %v2192_v28, 4  ;;  %v3128_v14 = vrot.slane %v2091_v2, 5  ;;  %v2566_v60 = vor.u32 %v8498_v49, %v8496_v9  ;;  %v2569_v22 = vshll.u32 %v8371_v57, 16 }
 0x187   :  { %v3119_v18 = vsel %vm7919_vm8, %v6601_v0, %v3118_v1  ;;  %v3120_v50 = vrot.slane %v3118_v1, 4  ;;  %v3126_v17 = vsel %vm7919_vm8, %v6602_v38, %v3125_v7  ;;  %v3127_v23 = vrot.slane %v3125_v7, 4 }
 0x188   :  { %3946 = vrot.lane.b32.xlu0 %v8841_v42, %s7726_s14  ;;  %v2198_v10 = vsel %vm7948_vm11, %v2193_v44, %v2197_v59  ;;  %v2567_v2 = vrot.slane %v2566_v60, 4  ;;  %v2571_v4 = vrot.slane %v2569_v22, 5  ;;  %v11473_v9 = vshrl.u32 %v8371_v57, 16 }
 0x189   :  { %v8866_v27 = vcombine.low %v2188_v13, %v2198_v10  ;;  %v3122_v28 = vsel %vm7919_vm8, %v3120_v50, %v3121_v36  ;;  %v3129_v0 = vsel %vm7919_vm8, %v3127_v23, %v3128_v14  ;;  %v2579_v1 = vshll.u32 %v8406_v34, 16  ;;  %v2128_v50 = vld [vmem:[#allocation2 + $0xc0] sm:$0xe] }
 0x18a   :  { %v2575_v49 = vrot.slane %v11473_v9, 4  ;;  %v8873_v38 = vcombine.low %v3119_v18, %v3122_v28  ;;  %v8875_v7 = vcombine.low %v3126_v17, %v3129_v0  ;;  %v2572_v59 = vsel %vm7948_vm11, %v2567_v2, %v2571_v4  ;;  %v2037_v2 = vld [vmem:[#allocation2 + $0xc4] sm:$0xf] }
 0x18b   :  { %3604 = vrot.lane.b32.xlu1 %v8866_v27, %s7726_s14  ;;  %v2581_v57 = vrot.slane %v2579_v1, 5  ;;  %v2254_v13 = vor.u32 %v8649_v35, %v8645_v46  ;;  %v2257_v36 = vshll.u32 %v8423_v56, 16  ;;  %v2261_v14 = vshrl.u32 %v8423_v56, 16  ;;  %v2129_v46 = vld [vmem:[#allocation2 + $0xcc] sm:$0xe] }
 0x18c   :  { %v2576_v44 = vor.u32 %v2575_v49, %v2571_v4  ;;  %3990 = vrot.lane.b32.xlu0 %v8849_v5, %s7725_s13  ;;  %7416 = vmatprep.mubr.msk.bf16.mxu0 %vm4122_vm15, %v8873_v38  ;;  %v2267_v60 = vshll.u32 %v8418_v40, 16  ;;  %v2638_v22 = vor.u32 %v8720_v62, %v8658_v21  ;;  %v2641_v18 = vshll.u32 %v8512_v24, 16  ;;  %v2092_v62 = vld [vmem:[#allocation2 + $0xc8] sm:$0x1] }
 0x18d   :  { %v2255_v35 = vrot.slane %v2254_v13, 4  ;;  %v2259_v17 = vrot.slane %v2257_v36, 5  ;;  %v2263_v23 = vrot.slane %v2261_v14, 4  ;;  %v11474_v56 = vshrl.u32 %v8512_v24, 16  ;;  %7417 = vmatmul.mubr.msk.bf16.gmra.mxu0 %vm4122_vm15, %v8875_v7 }
 0x18e   :  { %v2577_v34 = vrot.slane %v2576_v44, 4  ;;  %v2269_v4 = vrot.slane %v2267_v60, 5  ;;  %v2639_v9 = vrot.slane %v2638_v22, 4  ;;  %v2643_v21 = vrot.slane %v2641_v18, 5  ;;  %v8911_v22 = vpop.permute.xlu0 %4012 }
 0x18f   :  { %v2647_v10 = vrot.slane %v11474_v56, 4  ;;  %v2260_v28 = vsel %vm7948_vm11, %v2255_v35, %v2259_v17  ;;  %v2264_v0 = vor.u32 %v2263_v23, %v2259_v17  ;;  %v2651_v24 = vshll.u32 %v8760_v52, 16  ;;  %11476 = vst [vmem:[#allocation25_spill] sm:$0xff] %v8911_v22 }
 0x190   :  { %v2582_v40 = vsel %vm7948_vm11, %v2577_v34, %v2581_v57  ;;  %v2644_v1 = vsel %vm7948_vm11, %v2639_v9, %v2643_v21  ;;  %v6619_v13 = vrot.slane %v2128_v50, 9  ;;  %v3298_v36 = vrot.slane %v2037_v2, 5  ;;  %v83_v57 = vld [vmem:[%s11340_s0 + $0xe0] sm:$0xff]   ;;  %v85_v2 = vld [vmem:[%s11340_s0 + $0xe8] sm:$0xff]  }
 0x191   :  { %v8899_v49 = vcombine.low %v2572_v59, %v2582_v40  ;;  %v2648_v44 = vor.u32 %v2647_v10, %v2643_v21  ;;  %v2265_v59 = vrot.slane %v2264_v0, 4  ;;  %v2653_v14 = vrot.slane %v2651_v24, 5  ;;  %v8930_v40 = vpop.permute.xlu1 %3762  ;;  %7380 = vmatprep.mubr.bf16.mxu1 %v83_v57 }
 0x192   :  { %v3301_v34 = vrot.slane %v2092_v62, 5  ;;  %v6621_v60 = vrot.slane %v2129_v46, 9  ;;  %v3299_v18 = vsel %vm7919_vm8, %v6619_v13, %v3298_v36  ;;  %v3300_v35 = vrot.slane %v3298_v36, 4  ;;  %7381 = vmatmul.mubr.bf16.gmra.mxu1 %v85_v2  ;;  %v7662_v36 = vld [vmem:[#allocation2 + $0x2c] sm:$0x1] }
 0x193   :  { %11475 = vst [vmem:[#allocation24_spill] sm:$0xff] %v8899_v49  ;;  %3636 = vrot.lane.b32.xlu1 %v8899_v49, %s7726_s14  ;;  %v2649_v52 = vrot.slane %v2648_v44, 4  ;;  %v11477_v50 = vrot.slane %v7970_v15, 5  ;;  %v2611_v23 = vshll.u32 %v8725_v20, 16  ;;  %v2270_v56 = vsel %vm7948_vm11, %v2265_v59, %v2269_v4  ;;  %v8965_v59 = vld [vmem:[#allocation2 + $0x3c] sm:$0xf] }
 0x194   :  { %v11478_v46 = vrot.slane %v7923_v3, 5  ;;  %v8932_v15 = vcombine.low %v2260_v28, %v2270_v56  ;;  %v3302_v9 = vsel %vm7919_vm8, %v3300_v35, %v3301_v34  ;;  %v2621_v62 = vshrl.u32 %v8738_v37, 16  ;;  %v8949_v28 = vpop.permute.xlu0 %3602  ;;  %v8980_v56 = vld [vmem:[#allocation2 + $0x11c] sm:$0x1] }
 0x195   :  { %v3370_v17 = vsel %vm7919_vm8, %v8214_v16, %v11477_v50  ;;  %v2654_v16 = vsel %vm7948_vm11, %v2649_v52, %v2653_v14  ;;  %v8942_v21 = vcombine.low %v3299_v18, %v3302_v9  ;;  %v2610_v0 = vrot.slane %v2608_v29, 4  ;;  %v8961_v29 = vpop.permute.xlu1 %3794  ;;  %v2136_v52 = vld [vmem:[#allocation2 + $0x120] sm:$0xe]  ;;  %v8978_v50 = vld [vmem:[#allocation2 + $0x114] sm:$0xf] }
 0x196   :  { %v3367_v10 = vsel %vm7919_vm8, %v6621_v60, %v11478_v46  ;;  %v8940_v3 = vcombine.low %v2644_v1, %v2654_v16  ;;  %4056 = vrot.lane.b32.xlu0 %v8932_v15, %s7727_s15  ;;  %v2613_v24 = vrot.slane %v2611_v23, 5  ;;  %v7661_v1 = vld [vmem:[#allocation2 + $0x28] sm:$0xf]  ;;  %v2243_v57 = vshll.u32 %v7662_v36, 16  ;;  %11480 = vst [vmem:[#allocation27_spill] sm:$0xff] %v8961_v29  ;;  %v87_v46 = vld [vmem:[%s11340_s0 + $0xf0] sm:$0xff]  }
 0x197   :  { %v6729_v4 = vcombine.low %v3367_v10, %v3370_v17  ;;  %3770 = vrot.lane.b32.xlu1 %v8469_v12, %s7725_s13  ;;  %7420 = vmatprep.mubr.msk.bf16.mxu0 %vm4122_vm15, %v8942_v21  ;;  %v2230_v12 = vor.u32 %v8838_v47, %v8830_v26  ;;  %v2233_v44 = vshll.u32 %v7661_v1, 16  ;;  %v2237_v13 = vshrl.u32 %v7661_v1, 16  ;;  %v8967_v26 = vld [vmem:[#allocation2 + $0x118] sm:$0xf]  ;;  %v2135_v60 = vld [vmem:[#allocation2 + $0x114] sm:$0xe] }
 0x198   :  { %11479 = vst [vmem:[#allocation26_spill] sm:$0xff] %v8940_v3  ;;  %v2617_v20 = vshll.u32 %v8738_v37, 16  ;;  %v2623_v14 = vrot.slane %v2621_v62, 4  ;;  %v8970_v18 = vpop.permute.xlu0 %4082  ;;  %v8972_v37 = vld [vmem:[#allocation2 + $0x40] sm:$0xf]  ;;  %v2614_v23 = vor.u32 %v2613_v24, %v2610_v0  ;;  %v2245_v2 = vrot.slane %v2243_v57, 5  ;;  %7384 = vmatprep.mubr.bf16.mxu1 %v87_v46 }
 0x199   :  { %7421 = vmatmul.mubr.msk.bf16.gmra.mxu0 %vm4122_vm15, %v6729_v4  ;;  %v2235_v47 = vrot.slane %v2233_v44, 5  ;;  %v2239_v34 = vrot.slane %v2237_v13, 4  ;;  %11481 = vst [vmem:[#allocation28_spill] sm:$0xff] %v8970_v18  ;;  %v8976_v35 = vcombine.low %v8965_v59, %v8972_v37  ;;  %v2231_v17 = vrot.slane %v2230_v12, 4  ;;  %v2053_v4 = vld [vmem:[#allocation2 + $0x124] sm:$0xf]  ;;  %v8995_v36 = vpop.permute.xlu1 %3634 }
 0x19a   :  { %7424 = vmatprep.mubr.msk.bf16.mxu0 %vm4122_vm15, %v8326_v41  ;;  %4088 = vrot.lane.b32.xlu0 %v8940_v3, %s7727_s15  ;;  %v3167_v41 = vrot.slane %v8967_v26, 5  ;;  %v2627_v9 = vshll.u32 %v8794_v51, 16  ;;  %v2100_v62 = vld [vmem:[#allocation2 + $0x128] sm:$0x1]  ;;  %v8992_v0 = vcombine.low %v8978_v50, %v8967_v26  ;;  %v6608_v24 = vrot.slane %v2135_v60, 9  ;;  %11484 = vst [vmem:[#allocation31_spill] sm:$0xff] %v8995_v36 }
 0x19b   :  { %3768 = vrot.lane.b32.xlu1 %v8391_v55, %s7725_s13  ;;  %v2619_v55 = vrot.slane %v2617_v20, 5  ;;  %11482 = vst [vmem:[#allocation29_spill] sm:$0xff] %v8976_v35  ;;  %v2240_v10 = vor.u32 %v2239_v34, %v2235_v47  ;;  %v3174_v12 = vrot.slane %v2053_v4, 5  ;;  %v3170_v13 = vrot.slane %v8980_v56, 5  ;;  %v89_v34 = vld [vmem:[%s11340_s0 + $0xf8] sm:$0xff]  }
 0x19c   :  { %11483 = vst [vmem:[#allocation30_spill] sm:$0xff] %v8992_v0  ;;  %v3169_v44 = vrot.slane %v3167_v41, 4  ;;  %v2615_v51 = vrot.slane %v2614_v23, 4  ;;  %v6609_v57 = vrot.slane %v2136_v52, 9  ;;  %v2236_v60 = vsel %vm7948_vm11, %v2231_v17, %v2235_v47  ;;  %7385 = vmatmul.mubr.bf16.gmra.mxu1 %v89_v34 }
 0x19d   :  { %v2624_v16 = vor.u32 %v2623_v14, %v2619_v55  ;;  %v2241_v1 = vrot.slane %v2240_v10, 4  ;;  %v3176_v20 = vrot.slane %v3174_v12, 4  ;;  %v3177_v14 = vrot.slane %v2100_v62, 5  ;;  %v9010_v10 = vpop.permute.xlu0 %4014  ;;  %v9019_v47 = vpop.permute.xlu1 %3982 }
 0x19e   :  { %3988 = vrot.lane.b32.xlu0 %v8976_v35, %s7725_s13  ;;  %v2629_v52 = vrot.slane %v2627_v9, 5  ;;  %11485 = vst [vmem:[#allocation32_spill] sm:$0xff] %v9010_v10  ;;  %v2296_v4 = vshrl.u32 %v8826_v8, 16  ;;  %v3168_v62 = vsel %vm7919_vm8, %v6608_v24, %v3167_v41  ;;  %v3171_v29 = vsel %vm7919_vm8, %v3169_v44, %v3170_v13  ;;  %v832_v10 = vld [vmem:[#allocation2 + $0x12c] sm:$0x1] }
 0x19f   :  { %3800 = vrot.lane.b32.xlu1 %v8841_v42, %s7725_s13  ;;  %v2625_v23 = vrot.slane %v2624_v16, 4  ;;  %v2299_v17 = vshll.u32 %v8826_v8, 16  ;;  %v3175_v16 = vsel %vm7919_vm8, %v6609_v57, %v3174_v12  ;;  %v3178_v46 = vsel %vm7919_vm8, %v3176_v20, %v3177_v14 }
 0x1a0   :  { %v2620_v41 = vsel %vm7948_vm11, %v2615_v51, %v2619_v55  ;;  %v2305_v8 = vshll.u32 %v8551_v11, 16  ;;  %v2309_v24 = vshrl.u32 %v8551_v11, 16  ;;  %v9038_v12 = vcombine.low %v3168_v62, %v3171_v29 }
 0x1a1   :  { %7425 = vmatmul.mubr.msk.bf16.gmra.mxu0 %vm4122_vm15, %v8841_v42  ;;  %v2246_v42 = vsel %vm7948_vm11, %v2241_v1, %v2245_v2  ;;  %v2630_v9 = vsel %vm7948_vm11, %v2625_v23, %v2629_v52  ;;  %v9040_v1 = vcombine.low %v3175_v16, %v3178_v46  ;;  %v9042_v44 = vpop.permute.xlu0 %3912  ;;  %v2298_v13 = vrot.slane %v2296_v4, 4  ;;  %v9052_v51 = vpop.permute.xlu1 %3836 }
 0x1a2   :  { %7428 = vmatprep.mubr.msk.bf16.mxu0 %vm4122_vm15, %v8804_v19  ;;  %4020 = vrot.lane.b32.xlu0 %v8992_v0, %s7725_s13  ;;  %v9022_v2 = vcombine.low %v2236_v60, %v2246_v42  ;;  %11486 = vst [vmem:[#allocation33_spill] sm:$0xff] %v9038_v12  ;;  %v2301_v57 = vrot.slane %v2299_v17, 5  ;;  %v9044_v55 = vcombine.low %v2620_v41, %v2630_v9  ;;  %v2307_v11 = vrot.slane %v2305_v8, 5  ;;  %v853_v0 = vld [vmem:[#allocation2 + $0x180] sm:$0x1] }
 0x1a3   :  { %3844 = vrot.lane.b32.xlu1 %v8849_v5, %s7727_s15  ;;  %11487 = vst [vmem:[#allocation34_spill] sm:$0xff] %v9040_v1  ;;  %v2311_v29 = vrot.slane %v2309_v24, 4  ;;  %v2272_v20 = vshrl.u32 %v8965_v59, 16  ;;  %v2275_v14 = vshll.u32 %v8965_v59, 16  ;;  %v2315_v60 = vshll.u32 %v8560_v48, 16 }
 0x1a4   :  { %11488 = vst [vmem:[#allocation35_spill] sm:$0xff] %v9044_v55  ;;  %v2302_v34 = vor.u32 %v2301_v57, %v2298_v13  ;;  %v2281_v23 = vshll.u32 %v8972_v37, 16  ;;  %v2285_v52 = vshrl.u32 %v8972_v37, 16  ;;  %v2656_v17 = vshrl.u32 %v8978_v50, 16 }
 0x1a5   :  { %v2312_v42 = vor.u32 %v2311_v29, %v2307_v11  ;;  %v9063_v4 = vpop.permute.xlu0 %3944  ;;  %v2274_v62 = vrot.slane %v2272_v20, 4  ;;  %v2659_v59 = vshll.u32 %v8978_v50, 16  ;;  %v9069_v16 = vpop.permute.xlu1 %3868  ;;  %v2277_v48 = vrot.slane %v2275_v14, 5  ;;  %v2020_v29 = vld [vmem:[#allocation2 + $0x60] sm:$0xf] }
 0x1a6   :  { %4054 = vrot.lane.b32.xlu0 %v9022_v2, %s7727_s15  ;;  %11489 = vst [vmem:[#allocation36_spill] sm:$0xff] %v9063_v4  ;;  %11490 = vst [vmem:[#allocation37_spill] sm:$0xff] %v9069_v16  ;;  %v2669_v46 = vshrl.u32 %v8967_v26, 16  ;;  %v2303_v41 = vrot.slane %v2302_v34, 4  ;;  %v2317_v9 = vrot.slane %v2315_v60, 5  ;;  %v2283_v8 = vrot.slane %v2281_v23, 5 }
 0x1a7   :  { %3610 = vrot.lane.b32.xlu1 %v8932_v15, %s7726_s14  ;;  %v2313_v37 = vrot.slane %v2312_v42, 4  ;;  %v2287_v24 = vrot.slane %v2285_v52, 4  ;;  %v2665_v13 = vshll.u32 %v8967_v26, 16  ;;  %v2658_v57 = vrot.slane %v2656_v17, 4  ;;  %v7664_v42 = vld [vmem:[#allocation2 + $0x44] sm:$0x1] }
 0x1a8   :  { %v2661_v50 = vrot.slane %v2659_v59, 5  ;;  %v9080_v14 = vcombine.low %v2020_v29, %v8666_v25  ;;  %v2308_v34 = vsel %vm7948_vm11, %v2303_v41, %v2307_v11  ;;  %v2278_v60 = vor.u32 %v2277_v48, %v2274_v62  ;;  %v835_v4 = vld [vmem:[#allocation2 + $0x138] sm:$0x1] }
 0x1a9   :  { %7429 = vmatmul.mubr.msk.bf16.gmra.mxu0 %vm4122_vm15, %v9038_v12  ;;  %v9077_v20 = vpop.permute.xlu0 %3910  ;;  %v2291_v23 = vshll.u32 %v7664_v42, 16  ;;  %v2318_v26 = vsel %vm7948_vm11, %v2313_v37, %v2317_v9  ;;  %v2288_v52 = vor.u32 %v2287_v24, %v2283_v8  ;;  %v2667_v17 = vrot.slane %v2665_v13, 5  ;;  %v9088_v16 = vpop.permute.xlu1 %3834  ;;  %v9103_v13 = vld [vmem:[#allocation2 + $0x58] sm:$0xf] }
 0x1aa   :  { %7432 = vmatprep.mubr.msk.bf16.mxu0 %vm4122_vm15, %v9040_v1  ;;  %4086 = vrot.lane.b32.xlu0 %v9044_v55, %s7727_s15  ;;  %11491 = vst [vmem:[#allocation38_spill] sm:$0xff] %v9080_v14  ;;  %v2671_v59 = vrot.slane %v2669_v46, 4  ;;  %v2279_v11 = vrot.slane %v2278_v60, 4  ;;  %v2662_v62 = vor.u32 %v2661_v50, %v2658_v57  ;;  %v2675_v9 = vshll.u32 %v8980_v56, 16  ;;  %v2018_v46 = vld [vmem:[#allocation2 + $0x54] sm:$0xf] }
 0x1ab   :  { %3842 = vrot.lane.b32.xlu1 %v8976_v35, %s7727_s15  ;;  %v2289_v48 = vrot.slane %v2288_v52, 4  ;;  %v9106_v57 = vcombine.low %v2018_v46, %v9103_v13  ;;  %v2344_v42 = vshrl.u32 %v2020_v29, 16 }
 0x1ac   :  { %v2672_v41 = vor.u32 %v2671_v59, %v2667_v17  ;;  %v2663_v50 = vrot.slane %v2662_v62, 4  ;;  %v2677_v60 = vrot.slane %v2675_v9, 5  ;;  %v2357_v62 = vshrl.u32 %v8666_v25, 16  ;;  %v7667_v9 = vld [vmem:[#allocation2] sm:$0xf] }
 0x1ad   :  { %v9101_v24 = vpop.permute.xlu1 %3866  ;;  %11495 = vst [vmem:[#allocation42_spill] sm:$0xff] %v9106_v57 }
 0x1ae   :  { %3920 = vrot.lane.b32.xlu0 %v8602_v33, %s7726_s14  ;;  %11494 = vst [vmem:[#allocation41_spill] sm:$0xff] %v9101_v24  ;;  %v2323_v24 = vshll.u32 %v2018_v46, 16 }
 0x1af   :  { %3608 = vrot.lane.b32.xlu1 %v9022_v2, %s7726_s14 }
 0x1b2   :  { %3918 = vrot.lane.b32.xlu0 %v8508_v58, %s7726_s14  ;;  %v9097_v37 = vpop.permute.xlu0 %3942 }
 0x1b3   :  { %3640 = vrot.lane.b32.xlu1 %v9044_v55, %s7726_s14  ;;  %v9092_v55 = vcombine.low %v2308_v34, %v2318_v26  ;;  %11493 = vst [vmem:[#allocation40_spill] sm:$0xff] %v9097_v37  ;;  %v2673_v34 = vrot.slane %v2672_v41, 4  ;;  %v7666_v41 = vld [vmem:[#allocation2 + $0x4] sm:$0xf] }
 0x1b5   :  { %11492 = vst [vmem:[#allocation39_spill] sm:$0xff] %v9092_v55  ;;  %v2678_v59 = vsel %vm7948_vm11, %v2673_v34, %v2677_v60  ;;  %v7370_v34 = vpop.f32.mrf.mxu1  ;;  %v2359_v60 = vrot.slane %v2357_v62, 4  ;;  %v4383_v62 = vsel %vm4122_vm15, %v8866_v27, %v9077_v20 }
 0x1b6   :  { %3994 = vrot.lane.b32.xlu0 %v9080_v14, %s7725_s13  ;;  %v9116_v26 = vpop.permute.xlu0 %3986 }
 0x1b7   :  { %3774 = vrot.lane.b32.xlu1 %v8602_v33, %s7725_s13  ;;  %v2293_v33 = vrot.slane %v2291_v23, 5  ;;  %v2347_v23 = vshll.u32 %v2020_v29, 16  ;;  %v2346_v29 = vrot.slane %v2344_v42, 4  ;;  %v564_v36 = vpop.f32.mrf.mxu1 }
 0x1b9   :  { %v2294_v56 = vsel %vm7948_vm11, %v2289_v48, %v2293_v33  ;;  %v9128_v48 = vpop.permute.xlu1 %3766  ;;  %v2349_v33 = vrot.slane %v2347_v23, 5  ;;  %v7371_v18 = vpop.f32.mrf.mxu1 }
 0x1ba   :  { %4060 = vrot.lane.b32.xlu0 %v9092_v55, %s7727_s15 }
 0x1bb   :  { %3772 = vrot.lane.b32.xlu1 %v8508_v58, %s7725_s13  ;;  %v2284_v58 = vsel %vm7948_vm11, %v2279_v11, %v2283_v8  ;;  %v2668_v8 = vsel %vm7948_vm11, %v2663_v50, %v2667_v17  ;;  %v2353_v11 = vshll.u32 %v8666_v25, 16  ;;  %v2024_v17 = vld [vmem:[#allocation2 + $0x78] sm:$0xf]  ;;  %v9138_v42 = vpop.permute.xlu0 %4018 }
 0x1bc   :  { %v9118_v52 = vcombine.low %v2284_v58, %v2294_v56  ;;  %v6623_v58 = vcombine.low %v7667_v9, %v7666_v41  ;;  %v2320_v56 = vshrl.u32 %v2018_v46, 16  ;;  %v9132_v50 = vcombine.low %v2668_v8, %v2678_v59  ;;  %11497 = vst [vmem:[#allocation44_spill] sm:$0xff] %v9138_v42 }
 0x1bd   :  { %v9136_v25 = vrot.slane %v2353_v11, 5  ;;  %v2392_v23 = vshrl.u32 %v2024_v17, 16  ;;  %v9146_v8 = vrot.slane %v2323_v24, 5  ;;  %v2350_v59 = vor.u32 %v2349_v33, %v2346_v29  ;;  %v9148_v9 = vpop.permute.xlu1 %3798 }
 0x1be   :  { %3992 = vrot.lane.b32.xlu0 %v9106_v57, %s7725_s13  ;;  %11496 = vst [vmem:[#allocation43_spill] sm:$0xff] %v9132_v50  ;;  %v4125_v41 = vsel %vm4122_vm15, %v6623_v58, %v8949_v28  ;;  %v9144_v46 = vrot.slane %v2320_v56, 4  ;;  %11498 = vst [vmem:[#allocation45_spill] sm:$0xff] %v9148_v9  ;;  %v2395_v11 = vshll.u32 %v2024_v17, 16  ;;  %v2363_v42 = vshll.u32 %v8672_v61, 16 }
 0x1bf   :  { %3848 = vrot.lane.b32.xlu1 %v9080_v14, %s7727_s15  ;;  %v2360_v28 = vor.u32 %v2359_v60, %v9136_v25  ;;  %v2329_v24 = vshll.u32 %v9103_v13, 16  ;;  %v2333_v29 = vshrl.u32 %v9103_v13, 16  ;;  %v9161_v33 = vrot.slane %v2392_v23, 4  ;;  %v9169_v61 = vld [vmem:[%s11342_s2] ss:$0 sm:$0xff] }
 0x1c0   :  { %v9164_v27 = vcombine.low %v2024_v17, %v8718_v6  ;;  %v573_v20 = vadd.f32 %v9169_v61, %v7370_v34  ;;  %v836_v58 = vsel %vm7885_vm4, 0, %v835_v4  ;;  %v4221_v13 = vsel %vm4219_vm1, %v4125_v41, %v8930_v40  ;;  %v2022_v60 = vld [vmem:[#allocation2 + $0x6c] sm:$0xf] }
 0x1c1   :  { %v2351_v56 = vrot.slane %v2350_v59, 4  ;;  %v4478_v17 = vsel %vm4219_vm1, %v4383_v62, %v9019_v47  ;;  %837 = vst [vmem:[#allocation2 + $0x138] sm:$0x1] %v836_v58  ;;  %v565_v9 = vadd.f32 %v9169_v61, %v564_v36  ;;  %v9179_v49 = vrot.slane %v2395_v11, 5  ;;  %v9188_v59 = vpop.permute.xlu1 %3764  ;;  %v945_v11 = vld [vmem:[#allocation2 + $0x140] sm:$0x1] }
 0x1c2   :  { %4058 = vrot.lane.b32.xlu0 %v9118_v52, %s7727_s15  ;;  %11499 = vst [vmem:[#allocation46_spill] sm:$0xff] %v9164_v27  ;;  %v4286_v34 = vsel %vm4284_vm2, %v4221_v13, %v9088_v16  ;;  %v2365_v37 = vrot.slane %v2363_v42, 5  ;;  %v2361_v40 = vrot.slane %v2360_v28, 4  ;;  %v9186_v41 = vrot.slane %v2329_v24, 5 }
 0x1c3   :  { %3614 = vrot.lane.b32.xlu1 %v9092_v55, %s7726_s14  ;;  %v2335_v47 = vrot.slane %v2333_v29, 4  ;;  %v689_v36 = vmax.f32 %v573_v20, 0.0  ;;  %v2368_v16 = vshrl.u32 %v2022_v60, 16  ;;  %v2371_v42 = vshll.u32 %v2022_v60, 16  ;;  %v7669_v20 = vld [vmem:[#allocation2 + $0x5c] sm:$0x1] }
 0x1c4   :  { %v687_v62 = vmax.f32 %v565_v9, 0.0  ;;  %v833_v58 = vsel %vm7885_vm4, 0, %v832_v10  ;;  %v9198_v28 = vcombine.low %v2022_v60, %v8683_v30  ;;  %v2326_v24 = vor.u32 %v9146_v8, %v9144_v46 }
 0x1c5   :  { %v6927_v29 = vpack.c.bf16 %v689_v36, %v689_v36  ;;  %834 = vst [vmem:[#allocation2 + $0x12c] sm:$0x1] %v833_v58  ;;  %v2339_v13 = vshll.u32 %v7669_v20, 16  ;;  %v576_v9 = vadd.f32 %v9169_v61, %v7371_v18  ;;  %v946_v10 = vsel %vm7895_vm5, 0, %v945_v11 }
 0x1c6   :  { %4090 = vrot.lane.b32.xlu0 %v9132_v50, %s7727_s15  ;;  %11500 = vst [vmem:[#allocation47_spill] sm:$0xff] %v9198_v28  ;;  %v2366_v30 = vsel %vm7948_vm11, %v2361_v40, %v2365_v37  ;;  %947 = vst [vmem:[#allocation2 + $0x140] sm:$0x1] %v946_v10  ;;  %v9212_v18 = vrot.slane %v2368_v16, 4  ;;  %v9214_v11 = vrot.slane %v2371_v42, 5 }
 0x1c7   :  { %3846 = vrot.lane.b32.xlu1 %v9106_v57, %s7727_s15  ;;  %v1529_v46 = vshrl.u32 %v6927_v29, 16  ;;  %v1532_v8 = vshll.u32 %v6927_v29, 16  ;;  %v690_v36 = vmax.f32 %v576_v9, 0.0  ;;  %v2327_v29 = vrot.slane %v2326_v24, 4 }
 0x1c8   :  { %v4053_v23 = vpop.permute.xlu0 %4052  ;;  %v1941_v16 = vld [vmem:[#allocation2 + $0x138] sm:$0xf]  ;;  %v2341_v9 = vrot.slane %v2339_v13, 5 }
 0x1c9   :  { %v4542_v4 = vsel %vm4284_vm2, %v4478_v17, %v4053_v23  ;;  %v6925_v23 = vpack.c.bf16 %v687_v62, %v687_v62  ;;  %v9216_v62 = vpop.permute.xlu1 %3796  ;;  %v1531_v37 = vrot.slane %v1529_v46, 7 }
 0x1ca   :  { %3924 = vrot.lane.b32.xlu0 %v8714_v45, %s7726_s14  ;;  %4916 = vmatprep.mubr.bf16.mxu1 %v4542_v4  ;;  %v942_v4 = vld [vmem:[#allocation2 + $0x134] sm:$0x1]  ;;  %11502 = vst [vmem:[#allocation3_spill] sm:$0xff] %v9216_v62 }
 0x1cb   :  { %3612 = vrot.lane.b32.xlu1 %v9118_v52, %s7726_s14  ;;  %4917 = vmatmul.mubr.bf16.vlgmr.msra.gmra.mxu1 %v4286_v34  ;;  %v567_v34 = vpop.f32.mrf.mxu1  ;;  %v1515_v60 = vshll.u32 %v6925_v23, 16  ;;  %v1534_v10 = vor.u32 %v1532_v8, %v1531_v37  ;;  %v2405_v8 = vshrl.u32 %v8718_v6, 16 }
 0x1cc   :  { %v568_v40 = vadd.f32 %v9169_v61, %v567_v34  ;;  %v1934_v24 = vld [vmem:[#allocation2 + $0x12c] sm:$0xf] }
 0x1ce   :  { %3922 = vrot.lane.b32.xlu0 %v8625_v32, %s7726_s14  ;;  %v688_v46 = vmax.f32 %v568_v40, 0.0  ;;  %v1535_v40 = vrot.slane %v1531_v37, 4 }
 0x1cf   :  { %3778 = vrot.lane.b32.xlu1 %v8714_v45, %s7725_s13  ;;  %v2356_v45 = vsel %vm7948_vm11, %v2351_v56, %v9136_v25  ;;  %v2336_v25 = vor.u32 %v2335_v47, %v9186_v41  ;;  %v1512_v56 = vshrl.u32 %v6925_v23, 16  ;;  %v943_v47 = vsel %vm7895_vm5, 0, %v942_v4 }
 0x1d0   :  { %v9223_v58 = vcombine.low %v2356_v45, %v2366_v30  ;;  %v6928_v23 = vpack.c.bf16 %v690_v36, %v690_v36  ;;  %944 = vst [vmem:[#allocation2 + $0x134] sm:$0x1] %v943_v47  ;;  %v2401_v36 = vshll.u32 %v8718_v6, 16  ;;  %v6926_v13 = vpack.c.bf16 %v688_v46, %v688_v46  ;;  %v1945_v6 = vld [vmem:[#allocation2 + $0x140] sm:$0x1] }
 0x1d1   :  { %v9225_v20 = vrot.slane %v1512_v56, 7  ;;  %v2337_v42 = vrot.slane %v2336_v25, 4  ;;  %v1942_v25 = vsel %vm8072_vm13, %v1534_v10, %v1941_v16  ;;  %v9247_v16 = vpop.permute.xlu1 %3840 }
 0x1d2   :  { %3998 = vrot.lane.b32.xlu0 %v9164_v27, %s7725_s13  ;;  %11503 = vst [vmem:[#allocation48_spill] sm:$0xff] %v9223_v58  ;;  %v1537_v4 = vshrl.u32 %v6928_v23, 16  ;;  %v1540_v30 = vshll.u32 %v6928_v23, 16  ;;  %1943 = vst [vmem:[#allocation2 + $0x138] sm:$0xf] %v1942_v25  ;;  %v1520_v37 = vshrl.u32 %v6926_v13, 16 }
 0x1d3   :  { %3776 = vrot.lane.b32.xlu1 %v8625_v32, %s7725_s13  ;;  %v9218_v32 = vld [vmem:[#allocation2 + $0x90] sm:$0xf]  ;;  %v1517_v45 = vor.u32 %v1515_v60, %v9225_v20  ;;  %v2332_v60 = vsel %vm7948_vm11, %v2327_v29, %v9186_v41  ;;  %v2342_v23 = vsel %vm7948_vm11, %v2337_v42, %v2341_v9  ;;  %11505 = vst [vmem:[#allocation49_spill] sm:$0xff] %v9247_v16  ;;  %v1523_v10 = vshll.u32 %v6926_v13, 16  ;;  %v2026_v41 = vld [vmem:[#allocation2 + $0x84] sm:$0xf]  ;;  %v7374_v42 = vpop.f32.mrf.mxu1 }
 0x1d4   :  { %v2440_v34 = vshrl.u32 %v9218_v32, 16  ;;  %v2443_v56 = vshll.u32 %v9218_v32, 16  ;;  %v1539_v22 = vrot.slane %v1537_v4, 7  ;;  %v9253_v46 = vcombine.low %v9218_v32, %v8771_v39  ;;  %v11508_v4 = vld [vmem:[#allocation16_spill] sm:$0xff] }
 0x1d5   :  { %v1935_v62 = vsel %vm8072_vm13, %v1517_v45, %v1934_v24  ;;  %v2398_v45 = vor.u32 %v9179_v49, %v9161_v33  ;;  %v2411_v25 = vshll.u32 %v11508_v4, 16  ;;  %v1518_v13 = vrot.slane %v9225_v20, 4  ;;  %v9285_v4 = vpop.permute.xlu1 %3872 }
 0x1d6   :  { %4064 = vrot.lane.b32.xlu0 %v9223_v58, %s7727_s15  ;;  %1936 = vst [vmem:[#allocation2 + $0x12c] sm:$0xf] %v1935_v62  ;;  %11506 = vst [vmem:[#allocation50_spill] sm:$0xff] %v9253_v46  ;;  %v1542_v29 = vor.u32 %v1540_v30, %v1539_v22  ;;  %v1544_v24 = vrot.slane %v1539_v22, 4  ;;  %v9259_v62 = vrot.slane %v2401_v36, 5  ;;  %v9263_v57 = vcombine.low %v2332_v60, %v2342_v23 }
 0x1d7   :  { %3852 = vrot.lane.b32.xlu1 %v9164_v27, %s7727_s15  ;;  %v9257_v9 = vpop.permute.xlu0 %4084  ;;  %v1522_v27 = vrot.slane %v1520_v37, 7  ;;  %v2407_v39 = vrot.slane %v2405_v8, 4  ;;  %v1938_v22 = vld [vmem:[#allocation2 + $0x134] sm:$0x1]  ;;  %v9271_v33 = vrot.slane %v2440_v34, 4  ;;  %v2416_v30 = vshrl.u32 %v2026_v41, 16  ;;  %v580_v34 = vpop.f32.mrf.mxu1 }
 0x1d8   :  { %11507 = vst [vmem:[#allocation51_spill] sm:$0xff] %v9257_v9  ;;  %11509 = vst [vmem:[#allocation16_spill] sm:$0xff] %v9263_v57  ;;  %v1543_v32 = vsel %vm8100_vm14, %v1535_v40, %v1542_v29  ;;  %v1946_v49 = vsel %vm7885_vm4, %v1544_v24, %v1945_v6  ;;  %v841_v60 = vld [vmem:[#allocation2 + $0x150] sm:$0x1]  ;;  %v9276_v8 = vrot.slane %v2443_v56, 5  ;;  %v9278_v40 = vrot.slane %v2398_v45, 4 }
 0x1d9   :  { %1944 = vst.msk [vmem:[#allocation2 + $0x13c] sm:$0xf] %vm739_vm0, %v1543_v32  ;;  %1947 = vst [vmem:[#allocation2 + $0x140] sm:$0x1] %v1946_v49  ;;  %v1525_v20 = vor.u32 %v1523_v10, %v1522_v27  ;;  %v1527_v36 = vrot.slane %v1522_v27, 4  ;;  %v2419_v23 = vshll.u32 %v2026_v41, 16  ;;  %v2374_v27 = vor.u32 %v9214_v11, %v9212_v18 }
 0x1da   :  { %3996 = vrot.lane.b32.xlu0 %v9198_v28, %s7725_s13  ;;  %v11510_v6 = vld [vmem:[#allocation18_spill] sm:$0xff]  ;;  %v838_v29 = vld [vmem:[#allocation2 + $0x144] sm:$0x1]  ;;  %v9283_v24 = vrot.slane %v2411_v25, 5  ;;  %11512 = vst [vmem:[#allocation52_spill] sm:$0xff] %v9285_v4  ;;  %v2408_v45 = vor.u32 %v2407_v39, %v9259_v62  ;;  %v842_v25 = vsel %vm7885_vm4, 0, %v841_v60  ;;  %v581_v18 = vadd.f32 %v9169_v61, %v580_v34  ;;  %v7375_v34 = vpop.f32.mrf.mxu1 }
 0x1db   :  { %3618 = vrot.lane.b32.xlu1 %v9223_v58, %s7726_s14  ;;  %v9281_v37 = vcombine.low %v2026_v41, %v11510_v6  ;;  %v1526_v10 = vsel %vm8100_vm14, %v1518_v13, %v1525_v20  ;;  %v1939_v56 = vsel %vm7885_vm4, %v1527_v36, %v1938_v22  ;;  %v9294_v32 = vld [vmem:[#allocation2 + $0xa8] sm:$0xf]  ;;  %v589_v41 = vadd.f32 %v9169_v61, %v7374_v42  ;;  %v9303_v11 = vpop.permute.xlu0 %3984  ;;  %v7670_v39 = vld [vmem:[#allocation2 + $0x70] sm:$0xf]  ;;  %v11513_v42 = vld [vmem:[#allocation20_spill] sm:$0xff] }
 0x1dc   :  { %1937 = vst.msk [vmem:[#allocation2 + $0x130] sm:$0xf] %vm739_vm0, %v1526_v10  ;;  %1940 = vst [vmem:[#allocation2 + $0x134] sm:$0x1] %v1939_v56  ;;  %v9305_v13 = vrot.slane %v2416_v30, 4  ;;  %v2377_v49 = vshll.u32 %v7670_v39, 16  ;;  %v2404_v36 = vsel %vm7948_vm11, %v9278_v40, %v9259_v62  ;;  %v592_v4 = vadd.f32 %v9169_v61, %v7375_v34  ;;  %v9324_v40 = vpop.permute.xlu1 %3606 }
 0x1dd   :  { %11511 = vst [vmem:[#allocation18_spill] sm:$0xff] %v9281_v37  ;;  %v2381_v22 = vshrl.u32 %v7670_v39, 16  ;;  %843 = vst [vmem:[#allocation2 + $0x150] sm:$0x1] %v842_v25  ;;  %v839_v20 = vsel %vm7885_vm4, 0, %v838_v29  ;;  %v9315_v60 = vrot.slane %v2419_v23, 5 }
 0x1de   :  { %4062 = vrot.lane.b32.xlu0 %v9263_v57, %s7727_s15  ;;  %v693_v6 = vmax.f32 %v589_v41, 0.0  ;;  %v691_v30 = vmax.f32 %v581_v18, 0.0  ;;  %840 = vst [vmem:[#allocation2 + $0x144] sm:$0x1] %v839_v20  ;;  %v951_v10 = vld [vmem:[#allocation2 + $0x158] sm:$0x1] }
 0x1df   :  { %3850 = vrot.lane.b32.xlu1 %v9198_v28, %s7727_s15  ;;  %v9317_v56 = vrot.slane %v2374_v27, 4  ;;  %v7671_v25 = vld [vmem:[#allocation2 + $0x74] sm:$0x1]  ;;  %v2488_v29 = vshrl.u32 %v9294_v32, 16  ;;  %v2409_v9 = vrot.slane %v2408_v45, 4  ;;  %v2491_v28 = vshll.u32 %v9294_v32, 16 }
 0x1e0   :  { %v2387_v39 = vshll.u32 %v7671_v25, 16  ;;  %v6931_v14 = vpack.c.bf16 %v693_v6, %v693_v6  ;;  %v6929_v62 = vpack.c.bf16 %v691_v30, %v691_v30  ;;  %v9326_v23 = vrot.slane %v2377_v49, 5  ;;  %v11514_v20 = vld [vmem:[#allocation17_spill] sm:$0xff]  ;;  %v583_v30 = vpop.f32.mrf.mxu1 }
 0x1e1   :  { %v2383_v27 = vrot.slane %v2381_v22, 4  ;;  %v694_v41 = vmax.f32 %v592_v4, 0.0  ;;  %v952_v18 = vsel %vm7895_vm5, 0, %v951_v10  ;;  %v2422_v49 = vor.u32 %v9315_v60, %v9305_v13  ;;  %v11555_v17 = vld [vmem:[#allocation49_spill] sm:$0xff] }
 0x1e2   :  { %3928 = vrot.lane.b32.xlu0 %v11513_v42, %s7726_s14  ;;  %v1563_v45 = vshrl.u32 %v6931_v14, 16  ;;  %v1566_v34 = vshll.u32 %v6931_v14, 16  ;;  %v1546_v25 = vshrl.u32 %v6929_v62, 16  ;;  %v1549_v6 = vshll.u32 %v6929_v62, 16  ;;  %953 = vst [vmem:[#allocation2 + $0x158] sm:$0x1] %v952_v18 }
 0x1e3   :  { %3616 = vrot.lane.b32.xlu1 %v9263_v57, %s7726_s14  ;;  %v9338_v4 = vrot.slane %v2488_v29, 4  ;;  %v6932_v22 = vpack.c.bf16 %v694_v41, %v694_v41  ;;  %v2414_v10 = vsel %vm7948_vm11, %v2409_v9, %v9283_v24  ;;  %v9343_v5 = vrot.slane %v2491_v28, 5  ;;  %v948_v18 = vld [vmem:[#allocation2 + $0x14c] sm:$0x1]  ;;  %v7672_v28 = vld [vmem:[#allocation2 + $0x94] sm:$0xf]  ;;  %v9354_v57 = vpop.permute.xlu1 %3638 }
 0x1e4   :  { %v1565_v14 = vrot.slane %v1563_v45, 7  ;;  %v9345_v62 = vrot.slane %v1546_v25, 7  ;;  %v2384_v13 = vor.u32 %v2383_v27, %v9326_v23  ;;  %v1955_v60 = vld [vmem:[#allocation2 + $0x150] sm:$0xf]  ;;  %v584_v41 = vadd.f32 %v9169_v61, %v583_v30  ;;  %11516 = vst [vmem:[#allocation17_spill] sm:$0xff] %v9354_v57 }
 0x1e5   :  { %v9332_v58 = vpop.permute.xlu0 %4016  ;;  %v1571_v29 = vshrl.u32 %v6932_v22, 16  ;;  %v2449_v9 = vshll.u32 %v7672_v28, 16  ;;  %v2453_v24 = vshrl.u32 %v7672_v28, 16  ;;  %v949_v35 = vsel %vm7895_vm5, 0, %v948_v18  ;;  %v9374_v28 = vld [vmem:[#allocation2 + $0x130] sm:$0xf] }
 0x1e6   :  { %3926 = vrot.lane.b32.xlu0 %v11514_v20, %s7726_s14  ;;  %11515 = vst [vmem:[#allocation20_spill] sm:$0xff] %v9332_v58  ;;  %v1574_v58 = vshll.u32 %v6932_v22, 16  ;;  %v1568_v45 = vor.u32 %v1566_v34, %v1565_v14  ;;  %v1551_v25 = vor.u32 %v1549_v6, %v9345_v62  ;;  %v692_v27 = vmax.f32 %v584_v41, 0.0  ;;  %950 = vst [vmem:[#allocation2 + $0x14c] sm:$0x1] %v949_v35 }
 0x1e7   :  { %3782 = vrot.lane.b32.xlu1 %v11513_v42, %s7725_s13  ;;  %v9336_v42 = vrot.slane %v2387_v39, 5  ;;  %v1948_v39 = vld [vmem:[#allocation2 + $0x144] sm:$0xf]  ;;  %v1573_v55 = vrot.slane %v1571_v29, 7  ;;  %v9358_v22 = vcombine.low %v2404_v36, %v2414_v10  ;;  %v2446_v30 = vor.u32 %v9276_v8, %v9271_v33  ;;  %v2137_v41 = vld [vmem:[#allocation2 + $0x12c] sm:$0xe] }
 0x1e8   :  { %v1956_v34 = vsel %vm8072_vm13, %v1568_v45, %v1955_v60  ;;  %v1949_v6 = vsel %vm8072_vm13, %v1551_v25, %v1948_v39  ;;  %v6930_v29 = vpack.c.bf16 %v692_v27, %v692_v27  ;;  %v9372_v33 = vrot.slane %v2449_v9, 5  ;;  %v7673_v60 = vld [vmem:[#allocation2 + $0x88] sm:$0xf]  ;;  %11518 = vst [vmem:[#allocation54_spill] sm:$0xff] %v9374_v28  ;;  %v9380_v25 = vld [vmem:[#allocation2 + $0x134] sm:$0x1] }
 0x1e9   :  { %11517 = vst [vmem:[#allocation53_spill] sm:$0xff] %v9358_v22  ;;  %v9360_v61 = vpop.permute.xlu0 %3916  ;;  %1957 = vst [vmem:[#allocation2 + $0x150] sm:$0xf] %v1956_v34  ;;  %v1576_v36 = vor.u32 %v1574_v58, %v1573_v55  ;;  %v1578_v10 = vrot.slane %v1573_v55, 4  ;;  %v1959_v18 = vld [vmem:[#allocation2 + $0x158] sm:$0x1]  ;;  %v2380_v9 = vsel %vm7948_vm11, %v9317_v56, %v9326_v23  ;;  %v9396_v34 = vpop.permute.xlu1 %3838 }
 0x1ea   :  { %4002 = vrot.lane.b32.xlu0 %v9253_v46, %s7725_s13  ;;  %1950 = vst [vmem:[#allocation2 + $0x144] sm:$0xf] %v1949_v6  ;;  %v2455_v8 = vrot.slane %v2453_v24, 4  ;;  %v2425_v39 = vshll.u32 %v7673_v60, 16  ;;  %v2429_v35 = vshrl.u32 %v7673_v60, 16  ;;  %v1554_v58 = vshrl.u32 %v6930_v29, 16 }
 0x1eb   :  { %3780 = vrot.lane.b32.xlu1 %v11514_v20, %s7725_s13  ;;  %v1569_v20 = vrot.slane %v1565_v14, 4  ;;  %v2385_v14 = vrot.slane %v2384_v13, 4  ;;  %v1960_v55 = vsel %vm7885_vm4, %v1578_v10, %v1959_v18  ;;  %v1557_v45 = vshll.u32 %v6930_v29, 16  ;;  %v9398_v6 = vld [vmem:[#allocation2 + $0x9c] sm:$0xf] }
 0x1ec   :  { %v9382_v27 = vrot.slane %v2422_v49, 4  ;;  %v2494_v24 = vor.u32 %v9343_v5, %v9338_v4  ;;  %1961 = vst [vmem:[#allocation2 + $0x158] sm:$0x1] %v1960_v55  ;;  %v1552_v56 = vrot.slane %v9345_v62, 4  ;;  %v1556_v23 = vrot.slane %v1554_v58, 7 }
 0x1ed   :  { %v1577_v13 = vsel %vm8100_vm14, %v1569_v20, %v1576_v36  ;;  %v6610_v20 = vrot.slane %v2137_v41, 9  ;;  %v2390_v49 = vsel %vm7948_vm11, %v2385_v14, %v9336_v42  ;;  %v3181_v5 = vrot.slane %v9374_v28, 5  ;;  %v7674_v10 = vld [vmem:[#allocation2 + $0x98] sm:$0x1]  ;;  %v2138_v14 = vld [vmem:[#allocation2 + $0x138] sm:$0xe] }
 0x1ee   :  { %4068 = vrot.lane.b32.xlu0 %v9358_v22, %s7727_s15  ;;  %1958 = vst.msk [vmem:[#allocation2 + $0x154] sm:$0xf] %vm739_vm0, %v1577_v13  ;;  %v9406_v36 = vrot.slane %v2446_v30, 4  ;;  %v2459_v18 = vshll.u32 %v7674_v10, 16  ;;  %v9408_v29 = vrot.slane %v2425_v39, 5  ;;  %v3184_v42 = vrot.slane %v9380_v25, 5 }
 0x1ef   :  { %3856 = vrot.lane.b32.xlu1 %v9253_v46, %s7727_s15  ;;  %v2456_v41 = vor.u32 %v2455_v8, %v9372_v33  ;;  %v2431_v62 = vrot.slane %v2429_v35, 4  ;;  %v1559_v60 = vor.u32 %v1557_v45, %v1556_v23  ;;  %v1561_v13 = vrot.slane %v1556_v23, 4  ;;  %v1952_v55 = vld [vmem:[#allocation2 + $0x14c] sm:$0x1]  ;;  %v9412_v58 = vld [vmem:[#allocation2 + $0x140] sm:$0x1] }
 0x1f0   :  { %v9414_v57 = vcombine.low %v2380_v9, %v2390_v49  ;;  %v2464_v30 = vshrl.u32 %v9398_v6, 16  ;;  %v3182_v10 = vsel %vm7919_vm8, %v6610_v20, %v3181_v5  ;;  %v3183_v39 = vrot.slane %v3181_v5, 4  ;;  %v847_v5 = vld [vmem:[#allocation2 + $0x168] sm:$0x1]  ;;  %v7675_v46 = vld [vmem:[#allocation2 + $0x8c] sm:$0x1] }
 0x1f1   :  { %v1560_v8 = vsel %vm8100_vm14, %v1552_v56, %v1559_v60  ;;  %v1953_v35 = vsel %vm7885_vm4, %v1561_v13, %v1952_v55  ;;  %v6611_v45 = vrot.slane %v2138_v14, 9  ;;  %v9432_v20 = vrot.slane %v2459_v18, 5  ;;  %v844_v60 = vld [vmem:[#allocation2 + $0x15c] sm:$0x1]  ;;  %v9438_v14 = vpop.permute.xlu1 %3870  ;;  %v9443_v18 = vld [vmem:[#allocation2 + $0x12c] sm:$0xf] }
 0x1f2   :  { %4000 = vrot.lane.b32.xlu0 %v9281_v37, %s7725_s13  ;;  %v9404_v4 = vpop.permute.xlu0 %3948  ;;  %11520 = vst [vmem:[#allocation56_spill] sm:$0xff] %v9414_v57  ;;  %1951 = vst.msk [vmem:[#allocation2 + $0x148] sm:$0xf] %vm739_vm0, %v1560_v8  ;;  %v3185_v23 = vsel %vm7919_vm8, %v3183_v39, %v3184_v42  ;;  %v3191_v56 = vrot.slane %v9412_v58, 5  ;;  %v2457_v13 = vrot.slane %v2456_v41, 4  ;;  %v2432_v55 = vor.u32 %v2431_v62, %v9408_v29  ;;  %v11525_v62 = vld [vmem:[#allocation22_spill] sm:$0xff] }
 0x1f3   :  { %3622 = vrot.lane.b32.xlu1 %v9358_v22, %s7726_s14  ;;  %11519 = vst [vmem:[#allocation55_spill] sm:$0xff] %v9404_v4  ;;  %v9419_v4 = vld [vmem:[#allocation2 + $0x13c] sm:$0xf]  ;;  %1954 = vst [vmem:[#allocation2 + $0x14c] sm:$0x1] %v1953_v35  ;;  %v9441_v22 = vcombine.low %v3182_v10, %v3185_v23  ;;  %v9445_v8 = vrot.slane %v2494_v24, 4 }
 0x1f4   :  { %v3188_v9 = vrot.slane %v9419_v4, 5  ;;  %11521 = vst [vmem:[#allocation57_spill] sm:$0xff] %v9438_v14  ;;  %11523 = vst [vmem:[#allocation59_spill] sm:$0xff] %v9443_v18  ;;  %v7676_v35 = vld [vmem:[#allocation2 + $0xac] sm:$0xf]  ;;  %v9454_v41 = vrot.slane %v2464_v30, 4  ;;  %v2452_v30 = vsel %vm7948_vm11, %v9406_v36, %v9372_v33 }
 0x1f5   :  { %11522 = vst [vmem:[#allocation58_spill] sm:$0xff] %v9441_v22  ;;  %v9448_v42 = vcombine.low %v9294_v32, %v7676_v35  ;;  %7433 = vmatmul.mubr.msk.bf16.gmra.mxu0 %vm4122_vm15, %v9441_v22  ;;  %v848_v24 = vsel %vm7885_vm4, 0, %v847_v5  ;;  %v845_v32 = vsel %vm7885_vm4, 0, %v844_v60  ;;  %v957_v23 = vld [vmem:[#allocation2 + $0x170] sm:$0x1]  ;;  %v2462_v60 = vsel %vm7948_vm11, %v2457_v13, %v9432_v20 }
 0x1f6   :  { %4066 = vrot.lane.b32.xlu0 %v9414_v57, %s7727_s15  ;;  %v9430_v49 = vpop.permute.xlu0 %3914  ;;  %v3189_v39 = vsel %vm7919_vm8, %v6611_v45, %v3188_v9  ;;  %v3190_v53 = vrot.slane %v3188_v9, 4  ;;  %849 = vst [vmem:[#allocation2 + $0x168] sm:$0x1] %v848_v24  ;;  %846 = vst [vmem:[#allocation2 + $0x15c] sm:$0x1] %v845_v32  ;;  %v2704_v45 = vshrl.u32 %v9443_v18, 16 }
 0x1f7   :  { %3854 = vrot.lane.b32.xlu1 %v9281_v37, %s7727_s15  ;;  %v2435_v37 = vshll.u32 %v7675_v46, 16  ;;  %11524 = vst [vmem:[#allocation60_spill] sm:$0xff] %v9448_v42  ;;  %v2467_v46 = vshll.u32 %v9398_v6, 16  ;;  %v2707_v9 = vshll.u32 %v9443_v18, 16  ;;  %v954_v5 = vld [vmem:[#allocation2 + $0x164] sm:$0x1] }
 0x1f8   :  { %v3192_v10 = vsel %vm7919_vm8, %v3190_v53, %v3191_v56  ;;  %v2433_v14 = vrot.slane %v2432_v55, 4  ;;  %v2497_v36 = vshll.u32 %v7676_v35, 16  ;;  %v2501_v53 = vshrl.u32 %v7676_v35, 16  ;;  %v2139_v32 = vld [vmem:[#allocation2 + $0x144] sm:$0xe] }
 0x1f9   :  { %v9476_v22 = vcombine.low %v3189_v39, %v3192_v10  ;;  %v2706_v56 = vrot.slane %v2704_v45, 4  ;;  %v2709_v24 = vrot.slane %v2707_v9, 5  ;;  %v7677_v18 = vld [vmem:[#allocation2 + $0xb0] sm:$0x1]  ;;  %v955_v20 = vsel %vm7895_vm5, 0, %v954_v5  ;;  %v11528_v55 = vld [vmem:[#allocation21_spill] sm:$0xff] }
 0x1fa   :  { %3932 = vrot.lane.b32.xlu0 %v11525_v62, %s7726_s14  ;;  %v9478_v33 = vpop.permute.xlu0 %3946  ;;  %v2507_v1 = vshll.u32 %v7677_v18, 16  ;;  %v2713_v13 = vshll.u32 %v9374_v28, 16  ;;  %v9493_v35 = vld [vmem:[#allocation2 + $0xa0] sm:$0xf]  ;;  %956 = vst [vmem:[#allocation2 + $0x164] sm:$0x1] %v955_v20  ;;  %v2428_v5 = vsel %vm7948_vm11, %v9382_v27, %v9408_v29 }
 0x1fb   :  { %3620 = vrot.lane.b32.xlu1 %v9414_v57, %s7726_s14  ;;  %v2437_v57 = vrot.slane %v2435_v37, 5  ;;  %11526 = vst [vmem:[#allocation22_spill] sm:$0xff] %v9476_v22  ;;  %11527 = vst [vmem:[#allocation61_spill] sm:$0xff] %v9478_v33  ;;  %7436 = vmatprep.mubr.msk.bf16.mxu0 %vm4122_vm15, %v9476_v22  ;;  %v958_v37 = vsel %vm7895_vm5, 0, %v957_v23  ;;  %v9497_v39 = vcombine.low %v9398_v6, %v9493_v35  ;;  %v2723_v10 = vshll.u32 %v9380_v25, 16 }
 0x1fc   :  { %959 = vst [vmem:[#allocation2 + $0x170] sm:$0x1] %v958_v37  ;;  %v2710_v18 = vor.u32 %v2709_v24, %v2706_v56  ;;  %v9501_v45 = vld [vmem:[#allocation2 + $0x148] sm:$0xf]  ;;  %v9503_v9 = vld [vmem:[#allocation2 + $0x14c] sm:$0x1]  ;;  %v9513_v56 = vcombine.low %v2452_v30, %v2462_v60 }
 0x1fd   :  { %v9482_v47 = vpop.permute.xlu1 %3604  ;;  %11529 = vst [vmem:[#allocation21_spill] sm:$0xff] %v9497_v39  ;;  %v9505_v23 = vrot.slane %v2467_v46, 5  ;;  %v2715_v6 = vrot.slane %v2713_v13, 5  ;;  %v6612_v33 = vrot.slane %v2139_v32, 9  ;;  %v9511_v37 = vld [vmem:[#allocation2 + $0x138] sm:$0xf]  ;;  %v2438_v25 = vsel %vm7948_vm11, %v2433_v14, %v2437_v57 }
 0x1fe   :  { %3930 = vrot.lane.b32.xlu0 %v11528_v55, %s7726_s14  ;;  %11530 = vst [vmem:[#allocation62_spill] sm:$0xff] %v9511_v37  ;;  %11531 = vst [vmem:[#allocation63_spill] sm:$0xff] %v9513_v56  ;;  %v2711_v24 = vrot.slane %v2710_v18, 4  ;;  %v2140_v22 = vld [vmem:[#allocation2 + $0x150] sm:$0xe]  ;;  %v9519_v46 = vrot.slane %v2497_v36, 5  ;;  %v9527_v30 = vpop.permute.xlu0 %3990 }
 0x1ff   :  { %3786 = vrot.lane.b32.xlu1 %v11525_v62, %s7725_s13  ;;  %v2717_v62 = vshrl.u32 %v9374_v28, 16  ;;  %v9521_v28 = vrot.slane %v2501_v53, 4  ;;  %v3195_v27 = vrot.slane %v9501_v45, 5  ;;  %v3198_v29 = vrot.slane %v9503_v9, 5  ;;  %11532 = vst [vmem:[#allocation64_spill] sm:$0xff] %v9527_v30 }
 0x200   :  { %v9529_v57 = vrot.slane %v2507_v1, 5  ;;  %v2725_v60 = vrot.slane %v2723_v10, 5  ;;  %v2728_v32 = vshrl.u32 %v9511_v37, 16  ;;  %v9532_v13 = vld [vmem:[#allocation2 + $0x158] sm:$0x1]  ;;  %v2731_v18 = vshll.u32 %v9511_v37, 16 }
 0x201   :  { %v2719_v20 = vrot.slane %v2717_v62, 4  ;;  %v3196_v53 = vsel %vm7919_vm8, %v6612_v33, %v3195_v27  ;;  %v9539_v62 = vld [vmem:[#allocation2 + $0x154] sm:$0xf]  ;;  %v6613_v50 = vrot.slane %v2140_v22, 9  ;;  %v2716_v1 = vsel %vm7948_vm11, %v2711_v24, %v2715_v6  ;;  %v963_v30 = vld [vmem:[#allocation2 + $0x188] sm:$0x1] }
 0x202   :  { %4006 = vrot.lane.b32.xlu0 %v9448_v42, %s7725_s13  ;;  %v2730_v10 = vrot.slane %v2728_v32, 4  ;;  %v3202_v12 = vrot.slane %v9539_v62, 5  ;;  %v3205_v37 = vrot.slane %v9532_v13, 5  ;;  %v850_v22 = vld [vmem:[#allocation2 + $0x174] sm:$0x1] }
 0x203   :  { %3784 = vrot.lane.b32.xlu1 %v11528_v55, %s7725_s13  ;;  %v2720_v14 = vor.u32 %v2719_v20, %v2715_v6  ;;  %v3197_v55 = vrot.slane %v3195_v27, 4  ;;  %v2733_v27 = vrot.slane %v2731_v18, 5  ;;  %v2741_v18 = vshrl.u32 %v9419_v4, 16 }
 0x205   :  { %v9534_v36 = vpop.permute.xlu1 %3636  ;;  %v2721_v20 = vrot.slane %v2720_v14, 4  ;;  %v3199_v33 = vsel %vm7919_vm8, %v3197_v55, %v3198_v29  ;;  %v2734_v32 = vor.u32 %v2733_v27, %v2730_v10  ;;  %v2737_v55 = vshll.u32 %v9419_v4, 16 }
 0x206   :  { %11533 = vst [vmem:[#allocation65_spill] sm:$0xff] %v9534_v36  ;;  %v9546_v36 = vcombine.low %v2428_v5, %v2438_v25  ;;  %4072 = vrot.lane.b32.xlu0 %v9513_v56, %s7727_s15  ;;  %v9555_v24 = vcombine.low %v3196_v53, %v3199_v33  ;;  %v3203_v5 = vsel %vm7919_vm8, %v6613_v50, %v3202_v12  ;;  %v3204_v25 = vrot.slane %v3202_v12, 4 }
 0x207   :  { %3860 = vrot.lane.b32.xlu1 %v9448_v42, %s7727_s15  ;;  %v2726_v6 = vsel %vm7948_vm11, %v2721_v20, %v2725_v60  ;;  %v9565_v42 = vld [vmem:[#allocation2 + $0x144] sm:$0xf]  ;;  %v2747_v50 = vshll.u32 %v9412_v58, 16  ;;  %v854_v60 = vsel %vm7885_vm4, 0, %v853_v0  ;;  %v851_v53 = vsel %vm7885_vm4, 0, %v850_v22 }
 0x208   :  { %11534 = vst [vmem:[#allocation66_spill] sm:$0xff] %v9555_v24  ;;  %v9561_v29 = vcombine.low %v2716_v1, %v2726_v6  ;;  %11536 = vst [vmem:[#allocation68_spill] sm:$0xff] %v9565_v42  ;;  %v9567_v16 = vpop.permute.xlu0 %4056  ;;  %7437 = vmatmul.mubr.msk.bf16.gmra.mxu0 %vm4122_vm15, %v9555_v24  ;;  %v3206_v12 = vsel %vm7919_vm8, %v3204_v25, %v3205_v37  ;;  %v960_v1 = vld [vmem:[#allocation2 + $0x17c] sm:$0x1]  ;;  %v2504_v20 = vor.u32 %v9521_v28, %v9519_v46  ;;  %v9589_v6 = vld [vmem:[#allocation2 + $0x150] sm:$0xf] }
 0x209   :  { %v9559_v14 = vpop.permute.xlu1 %3770  ;;  %v9583_v33 = vcombine.low %v3203_v5, %v3206_v12  ;;  %v2739_v37 = vrot.slane %v2737_v55, 5  ;;  %855 = vst [vmem:[#allocation2 + $0x180] sm:$0x1] %v854_v60  ;;  %852 = vst [vmem:[#allocation2 + $0x174] sm:$0x1] %v851_v53  ;;  %v2735_v0 = vrot.slane %v2734_v32, 4 }
 0x20a   :  { %11535 = vst [vmem:[#allocation67_spill] sm:$0xff] %v9561_v29  ;;  %4004 = vrot.lane.b32.xlu0 %v9497_v39, %s7725_s13  ;;  %v2743_v58 = vrot.slane %v2741_v18, 4  ;;  %v2752_v27 = vshrl.u32 %v9565_v42, 16  ;;  %v2755_v22 = vshll.u32 %v9565_v42, 16  ;;  %11538 = vst [vmem:[#allocation70_spill] sm:$0xff] %v9589_v6  ;;  %v2749_v28 = vrot.slane %v2747_v50, 5 }
 0x20b   :  { %3626 = vrot.lane.b32.xlu1 %v9513_v56, %s7726_s14  ;;  %11537 = vst [vmem:[#allocation69_spill] sm:$0xff] %v9583_v33  ;;  %7440 = vmatprep.mubr.msk.bf16.mxu0 %vm4122_vm15, %v9583_v33  ;;  %v964_v5 = vsel %vm7895_vm5, 0, %v963_v30  ;;  %v961_v55 = vsel %vm7895_vm5, 0, %v960_v1  ;;  %v2761_v32 = vshll.u32 %v9501_v45, 16  ;;  %v2765_v10 = vshrl.u32 %v9501_v45, 16 }
 0x20c   :  { %v9600_v18 = vpop.permute.xlu0 %4088  ;;  %v2744_v12 = vor.u32 %v2743_v58, %v2739_v37  ;;  %v2754_v60 = vrot.slane %v2752_v27, 4  ;;  %v2757_v53 = vrot.slane %v2755_v22, 5  ;;  %965 = vst [vmem:[#allocation2 + $0x188] sm:$0x1] %v964_v5  ;;  %962 = vst [vmem:[#allocation2 + $0x17c] sm:$0x1] %v961_v55  ;;  %v2740_v58 = vsel %vm7948_vm11, %v2735_v0, %v2739_v37 }
 0x20d   :  { %v9591_v25 = vpop.permute.xlu1 %3768  ;;  %11539 = vst [vmem:[#allocation71_spill] sm:$0xff] %v9600_v18  ;;  %v2763_v50 = vrot.slane %v2761_v32, 5  ;;  %v2771_v30 = vshll.u32 %v9503_v9, 16  ;;  %v2776_v56 = vshrl.u32 %v9589_v6, 16  ;;  %v2779_v1 = vshll.u32 %v9589_v6, 16 }
 0x20e   :  { %4070 = vrot.lane.b32.xlu0 %v9546_v36, %s7727_s15  ;;  %v2745_v27 = vrot.slane %v2744_v12, 4  ;;  %v2758_v22 = vor.u32 %v2757_v53, %v2754_v60  ;;  %v2767_v5 = vrot.slane %v2765_v10, 4  ;;  %v2785_v9 = vshll.u32 %v9539_v62, 16  ;;  %v859_v37 = vld [vmem:[#allocation2 + $0x198] sm:$0x1] }
 0x20f   :  { %3858 = vrot.lane.b32.xlu1 %v9497_v39, %s7727_s15  ;;  %v2773_v18 = vrot.slane %v2771_v30, 5  ;;  %v2778_v39 = vrot.slane %v2776_v56, 4  ;;  %v2781_v32 = vrot.slane %v2779_v1, 5  ;;  %v2789_v42 = vshrl.u32 %v9539_v62, 16  ;;  %v856_v60 = vld [vmem:[#allocation2 + $0x18c] sm:$0x1] }
 0x210   :  { %v9615_v33 = vpop.permute.xlu0 %3988  ;;  %v2750_v24 = vsel %vm7948_vm11, %v2745_v27, %v2749_v28  ;;  %v2759_v63 = vrot.slane %v2758_v22, 4  ;;  %v2768_v6 = vor.u32 %v2767_v5, %v2763_v50  ;;  %v2477_v10 = vshrl.u32 %v9493_v35, 16  ;;  %v969_v27 = vld [vmem:[#allocation2 + $0x1a0] sm:$0x1] }
 0x211   :  { %v9612_v55 = vpop.permute.xlu1 %3800  ;;  %v9623_v0 = vcombine.low %v2740_v58, %v2750_v24  ;;  %v2782_v56 = vor.u32 %v2781_v32, %v2778_v39  ;;  %v2787_v12 = vrot.slane %v2785_v9, 5  ;;  %v2791_v30 = vrot.slane %v2789_v42, 4  ;;  %v11542_v22 = vld [vmem:[#allocation9_spill] sm:$0xff]  ;;  %v966_v9 = vld [vmem:[#allocation2 + $0x194] sm:$0x1] }
 0x212   :  { %11540 = vst [vmem:[#allocation72_spill] sm:$0xff] %v9612_v55  ;;  %3936 = vrot.lane.b32.xlu0 %v8873_v38, %s7726_s14  ;;  %v2764_v28 = vsel %vm7948_vm11, %v2759_v63, %v2763_v50  ;;  %v2769_v53 = vrot.slane %v2768_v6, 4  ;;  %v2795_v1 = vshll.u32 %v9532_v13, 16  ;;  %v4128_v5 = vsel %vm4122_vm15, %v11542_v22, %v9482_v47 }
 0x213   :  { %3624 = vrot.lane.b32.xlu1 %v9546_v36, %s7726_s14  ;;  %11541 = vst [vmem:[#allocation73_spill] sm:$0xff] %v9623_v0  ;;  %v2505_v39 = vrot.slane %v2504_v20, 4  ;;  %v2783_v58 = vrot.slane %v2782_v56, 4  ;;  %v860_v32 = vsel %vm7885_vm4, 0, %v859_v37  ;;  %v2792_v42 = vor.u32 %v2791_v30, %v2787_v12  ;;  %v11546_v56 = vld [vmem:[#allocation13_spill] sm:$0xff] }
 0x214   :  { %v9637_v55 = vpop.permute.xlu0 %4020  ;;  %v2774_v63 = vsel %vm7948_vm11, %v2769_v53, %v2773_v18  ;;  %v2797_v13 = vrot.slane %v2795_v1, 5  ;;  %861 = vst [vmem:[#allocation2 + $0x198] sm:$0x1] %v860_v32  ;;  %v857_v6 = vsel %vm7885_vm4, 0, %v856_v60  ;;  %v11544_v47 = vshll.u32 %v9493_v35, 16 }
 0x215   :  { %v9633_v24 = vpop.permute.xlu1 %3844  ;;  %11543 = vst [vmem:[#allocation9_spill] sm:$0xff] %v9637_v55  ;;  %v2479_v50 = vrot.slane %v2477_v10, 4  ;;  %v9649_v37 = vcombine.low %v2764_v28, %v2774_v63  ;;  %858 = vst [vmem:[#allocation2 + $0x18c] sm:$0x1] %v857_v6  ;;  %v970_v18 = vsel %vm7895_vm5, 0, %v969_v27  ;;  %v4386_v53 = vsel %vm4122_vm15, %v11546_v56, %v9042_v44 }
 0x216   :  { %v9647_v20 = vrot.slane %v11544_v47, 5  ;;  %3934 = vrot.lane.b32.xlu0 %v8832_v54, %s7726_s14  ;;  %v2036_v60 = vld [vmem:[#allocation2 + $0xc0] sm:$0xf]  ;;  %v2793_v35 = vrot.slane %v2792_v42, 4  ;;  %971 = vst [vmem:[#allocation2 + $0x1a0] sm:$0x1] %v970_v18  ;;  %v4389_v28 = vsel %vm4122_vm15, %v9022_v2, %v9430_v49  ;;  %v2470_v30 = vor.u32 %v9505_v23, %v9454_v41 }
 0x217   :  { %3790 = vrot.lane.b32.xlu1 %v8873_v38, %s7725_s13  ;;  %11545 = vst [vmem:[#allocation74_spill] sm:$0xff] %v9649_v37  ;;  %v2788_v38 = vsel %vm7948_vm11, %v2783_v58, %v2787_v12  ;;  %v967_v10 = vsel %vm7895_vm5, 0, %v966_v9  ;;  %v7679_v44 = vld [vmem:[#allocation2 + $0xc4] sm:$0xf]  ;;  %v4223_v22 = vsel %vm4219_vm1, %v4128_v5, %v9188_v59  ;;  %v4480_v12 = vsel %vm4219_vm1, %v4386_v53, %v9303_v11  ;;  %v1983_v55 = vld [vmem:[#allocation2 + $0x180] sm:$0xf] }
 0x218   :  { %v6719_v1 = vcombine.low %v2036_v60, %v7679_v44  ;;  %968 = vst [vmem:[#allocation2 + $0x194] sm:$0x1] %v967_v10  ;;  %v4055_v58 = vpop.permute.xlu0 %4054  ;;  %v2500_v2 = vsel %vm7948_vm11, %v9445_v8, %v9519_v46  ;;  %v2510_v49 = vsel %vm7948_vm11, %v2505_v39, %v9529_v57  ;;  %v2798_v41 = vsel %vm7948_vm11, %v2793_v35, %v2797_v13  ;;  %v7680_v11 = vld [vmem:[#allocation2 + $0xa4] sm:$0x1]  ;;  %v2034_v13 = vld [vmem:[#allocation2 + $0xb4] sm:$0xf] }
 0x219   :  { %v9667_v27 = vpop.permute.xlu1 %3610  ;;  %v4545_v23 = vsel %vm4284_vm2, %v4480_v12, %v4055_v58  ;;  %v2480_v59 = vor.u32 %v2479_v50, %v9647_v20  ;;  %v2483_v5 = vshll.u32 %v7680_v11, 16  ;;  %v9686_v32 = vcombine.low %v2788_v38, %v2798_v41 }
 0x21a   :  { %4010 = vrot.lane.b32.xlu0 %v6719_v1, %s7725_s13  ;;  %4924 = vmatprep.mubr.bf16.mxu1 %v4545_v23  ;;  %v4289_v8 = vsel %vm4284_vm2, %v4223_v22, %v9052_v51  ;;  %v4482_v46 = vsel %vm4219_vm1, %v4389_v28, %v9116_v26  ;;  %v3243_v57 = vshrl.u32 %v2036_v60, 16  ;;  %v3246_v39 = vshll.u32 %v2036_v60, 16  ;;  %v11549_v51 = vld [vmem:[#allocation8_spill] sm:$0xff] }
 0x21b   :  { %3788 = vrot.lane.b32.xlu1 %v8832_v54, %s7725_s13  ;;  %4925 = vmatmul.mubr.bf16.gmra.mxu1 %v4289_v8  ;;  %v4548_v54 = vsel %vm4284_vm2, %v4482_v46, %v9567_v16  ;;  %v9699_v42 = vcombine.low %v2500_v2, %v2510_v49  ;;  %v3252_v6 = vshll.u32 %v7679_v44, 16  ;;  %v3256_v47 = vshrl.u32 %v7679_v44, 16  ;;  %v7681_v28 = vld [vmem:[#allocation2 + $0xb8] sm:$0xf]  ;;  %v7682_v8 = vld [vmem:[#allocation2 + $0xc8] sm:$0x1] }
 0x21c   :  { %v9697_v63 = vpop.permute.xlu0 %4086  ;;  %4932 = vmatprep.mubr.bf16.mxu1 %v4548_v54  ;;  %v4131_v26 = vsel %vm4122_vm15, %v11549_v51, %v9324_v40  ;;  %v2471_v50 = vrot.slane %v2470_v30, 4  ;;  %v2481_v18 = vrot.slane %v2480_v59, 4  ;;  %v2485_v56 = vrot.slane %v2483_v5, 5 }
 0x21d   :  { %v9695_v9 = vpop.permute.xlu1 %3842  ;;  %11547 = vst [vmem:[#allocation13_spill] sm:$0xff] %v9697_v63  ;;  %11548 = vst [vmem:[#allocation75_spill] sm:$0xff] %v9699_v42  ;;  %v3245_v16 = vrot.slane %v3243_v57, 4  ;;  %v3248_v53 = vrot.slane %v3246_v39, 5  ;;  %v2512_v60 = vshrl.u32 %v2034_v13, 16  ;;  %v2515_v38 = vshll.u32 %v2034_v13, 16 }
 0x21e   :  { %4076 = vrot.lane.b32.xlu0 %v9699_v42, %s7727_s15  ;;  %v9709_v44 = vcombine.low %v2034_v13, %v7681_v28  ;;  %v4225_v40 = vsel %vm4219_vm1, %v4131_v26, %v9128_v48  ;;  %v3254_v30 = vrot.slane %v3252_v6, 5  ;;  %v2476_v22 = vsel %vm7948_vm11, %v2471_v50, %v9647_v20  ;;  %v7683_v26 = vld [vmem:[#allocation2 + $0xbc] sm:$0x1] }
 0x21f   :  { %3864 = vrot.lane.b32.xlu1 %v6719_v1, %s7727_s15  ;;  %v3258_v1 = vrot.slane %v3256_v47, 4  ;;  %v2486_v12 = vsel %vm7948_vm11, %v2481_v18, %v2485_v56  ;;  %v2521_v58 = vshll.u32 %v7681_v28, 16  ;;  %v2525_v2 = vshrl.u32 %v7681_v28, 16  ;;  %v2052_v56 = vld [vmem:[#allocation2 + $0x120] sm:$0xf] }
 0x220   :  { %v9707_v10 = vpop.permute.xlu0 %3920  ;;  %11550 = vst [vmem:[#allocation8_spill] sm:$0xff] %v9709_v44  ;;  %v4292_v48 = vsel %vm4284_vm2, %v4225_v40, %v9396_v34  ;;  %v2514_v49 = vrot.slane %v2512_v60, 4  ;;  %v3249_v23 = vor.u32 %v3248_v53, %v3245_v16  ;;  %v2517_v59 = vrot.slane %v2515_v38, 5 }
 0x221   :  { %v3609_v35 = vpop.permute.xlu1 %3608  ;;  %v9726_v5 = vcombine.low %v2476_v22, %v2486_v12  ;;  %v3259_v20 = vor.u32 %v3258_v1, %v3254_v30  ;;  %v3262_v46 = vshll.u32 %v7682_v8, 16  ;;  %v2523_v57 = vrot.slane %v2521_v58, 5  ;;  %v7684_v58 = vld [vmem:[#allocation2 + $0x124] sm:$0xf] }
 0x222   :  { %4008 = vrot.lane.b32.xlu0 %v9709_v44, %s7725_s13  ;;  %v2527_v39 = vrot.slane %v2525_v2, 4  ;;  %v3250_v54 = vrot.slane %v3249_v23, 4  ;;  %v2518_v51 = vor.u32 %v2517_v59, %v2514_v49  ;;  %v2531_v50 = vshll.u32 %v7683_v26, 16 }
 0x223   :  { %3630 = vrot.lane.b32.xlu1 %v9699_v42, %s7726_s14  ;;  %4933 = vmatmul.mubr.bf16.gmra.mxu1 %v4292_v48  ;;  %v3260_v6 = vrot.slane %v3259_v20, 4  ;;  %v3264_v47 = vrot.slane %v3262_v46, 5  ;;  %v2680_v1 = vshrl.u32 %v2052_v56, 16  ;;  %v2683_v12 = vshll.u32 %v2052_v56, 16 }
 0x224   :  { %v3919_v11 = vpop.permute.xlu0 %3918  ;;  %v2528_v18 = vor.u32 %v2527_v39, %v2523_v57  ;;  %v3255_v53 = vsel %vm7948_vm11, %v3250_v54, %v3254_v30  ;;  %v2519_v28 = vrot.slane %v2518_v51, 4  ;;  %v2533_v40 = vrot.slane %v2531_v50, 5  ;;  %v11552_v30 = vld [vmem:[#allocation15_spill] sm:$0xff] }
 0x225   :  { %v9724_v41 = vpop.permute.xlu1 %3640  ;;  %v3265_v38 = vsel %vm7948_vm11, %v3260_v6, %v3264_v47  ;;  %v2689_v2 = vshll.u32 %v7684_v58, 16  ;;  %v4134_v49 = vsel %vm4122_vm15, %v11552_v30, %v3609_v35  ;;  %v2682_v8 = vrot.slane %v2680_v1, 4  ;;  %v972_v35 = vld [vmem:[#allocation2 + $0x1ac] sm:$0x1]  ;;  %v11559_v30 = vld [vmem:[#allocation11_spill] sm:$0xff] }
 0x226   :  { %11551 = vst [vmem:[#allocation76_spill] sm:$0xff] %v9724_v41  ;;  %4074 = vrot.lane.b32.xlu0 %v9726_v5, %s7727_s15  ;;  %v2529_v22 = vrot.slane %v2528_v18, 4  ;;  %v9756_v59 = vcombine.low %v3255_v53, %v3265_v38  ;;  %v2524_v20 = vsel %vm7948_vm11, %v2519_v28, %v2523_v57  ;;  %v4392_v6 = vsel %vm4122_vm15, %v8932_v15, %v9360_v61 }
 0x227   :  { %3862 = vrot.lane.b32.xlu1 %v9709_v44, %s7727_s15  ;;  %v2691_v39 = vrot.slane %v2689_v2, 5  ;;  %v4395_v57 = vsel %vm4122_vm15, %v9118_v52, %v3919_v11  ;;  %v4227_v51 = vsel %vm4219_vm1, %v4134_v49, %v9591_v25  ;;  %v973_v26 = vsel %vm7895_vm5, 0, %v972_v35  ;;  %v7685_v11 = vld [vmem:[#allocation2 + $0x128] sm:$0x1]  ;;  %v11556_v25 = vld [vmem:[#allocation64_spill] sm:$0xff] }
 0x228   :  { %v9734_v13 = vpop.permute.xlu0 %3994  ;;  %11553 = vst [vmem:[#allocation15_spill] sm:$0xff] %v9756_v59  ;;  %v2534_v46 = vsel %vm7948_vm11, %v2529_v22, %v2533_v40  ;;  %v4484_v50 = vsel %vm4219_vm1, %v4392_v6, %v9615_v33  ;;  %974 = vst [vmem:[#allocation2 + $0x1ac] sm:$0x1] %v973_v26  ;;  %v2699_v38 = vshll.u32 %v7685_v11, 16  ;;  %v4295_v33 = vsel %vm4284_vm2, %v4227_v51, %v11555_v17  ;;  %v11558_v22 = vld [vmem:[#allocation30_spill] sm:$0xff] }
 0x229   :  { %v9732_v34 = vpop.permute.xlu1 %3774  ;;  %v9779_v53 = vcombine.low %v2524_v20, %v2534_v46  ;;  %v4486_v28 = vsel %vm4219_vm1, %v4395_v57, %v11556_v25  ;;  %v4137_v49 = vsel %vm4122_vm15, %v11559_v30, %v9667_v27  ;;  %v11560_v20 = vld [vmem:[#allocation33_spill] sm:$0xff] }
 0x22a   :  { %3940 = vrot.lane.b32.xlu0 %v8942_v21, %s7726_s14  ;;  %v2693_v21 = vshrl.u32 %v7684_v58, 16  ;;  %v4229_v27 = vsel %vm4219_vm1, %v4137_v49, %v9559_v14  ;;  %v862_v11 = vld [vmem:[#allocation2 + $0x1a4] sm:$0x1] }
 0x22b   :  { %3628 = vrot.lane.b32.xlu1 %v9726_v5, %s7726_s14  ;;  %11554 = vst [vmem:[#allocation77_spill] sm:$0xff] %v9779_v53  ;;  %v4298_v57 = vsel %vm4284_vm2, %v4229_v27, %v9695_v9  ;;  %v863_v17 = vsel %vm7885_vm4, 0, %v862_v11  ;;  %v1969_v27 = vld [vmem:[#allocation2 + $0x168] sm:$0xf] }
 0x22c   :  { %v4061_v60 = vpop.permute.xlu0 %4060  ;;  %v2695_v54 = vrot.slane %v2693_v21, 4  ;;  %v2701_v21 = vrot.slane %v2699_v38, 5  ;;  %v11563_v38 = vld [vmem:[#allocation43_spill] sm:$0xff]  ;;  %864 = vst [vmem:[#allocation2 + $0x1a4] sm:$0x1] %v863_v17 }
 0x22d   :  { %v9740_v16 = vpop.permute.xlu1 %3772  ;;  %v4554_v40 = vsel %vm4284_vm2, %v4486_v28, %v4061_v60 }
 0x22e   :  { %3938 = vrot.lane.b32.xlu0 %v8875_v7, %s7726_s14  ;;  %v2696_v61 = vor.u32 %v2695_v54, %v2691_v39  ;;  %v9811_v54 = vld [vmem:[%s11342_s2] ss:$0 sm:$0xff] }
 0x22f   :  { %3792 = vrot.lane.b32.xlu1 %v8875_v7, %s7725_s13  ;;  %v2685_v7 = vrot.slane %v2683_v12, 5 }
 0x230   :  { %v9754_v23 = vpop.permute.xlu0 %3992  ;;  %v2697_v2 = vrot.slane %v2696_v61, 4 }
 0x231   :  { %v9750_v48 = vpop.permute.xlu1 %3848  ;;  %v2686_v52 = vor.u32 %v2685_v7, %v2682_v8  ;;  %v9806_v7 = vcombine.low %v2052_v56, %v7684_v58 }
 0x232   :  { %4080 = vrot.lane.b32.xlu0 %v9756_v59, %s7727_s15  ;;  %v2702_v56 = vsel %vm7948_vm11, %v2697_v2, %v2701_v21  ;;  %v1987_v59 = vld [vmem:[#allocation2 + $0x188] sm:$0x1] }
 0x233   :  { %3642 = vrot.lane.b32.xlu1 %v8940_v3, %s7726_s14  ;;  %v2687_v12 = vrot.slane %v2686_v52, 4  ;;  %11561 = vst [vmem:[#allocation64_spill] sm:$0xff] %v9806_v7 }
 0x234   :  { %v4059_v18 = vpop.permute.xlu0 %4058 }
 0x235   :  { %v9771_v47 = vpop.permute.xlu1 %3614  ;;  %v4551_v15 = vsel %vm4284_vm2, %v4484_v50, %v4059_v18  ;;  %v7378_v60 = vpop.f32.mrf.mxu1  ;;  %v2692_v6 = vsel %vm7948_vm11, %v2687_v12, %v2691_v39 }
 0x236   :  { %4078 = vrot.lane.b32.xlu0 %v9779_v53, %s7727_s15  ;;  %4940 = vmatprep.mubr.bf16.mxu1 %v4551_v15  ;;  %v605_v35 = vadd.f32 %v9811_v54, %v7378_v60  ;;  %v9831_v39 = vcombine.low %v2692_v6, %v2702_v56  ;;  %v11564_v56 = vld [vmem:[#allocation34_spill] sm:$0xff] }
 0x237   :  { %3802 = vrot.lane.b32.xlu1 %v8804_v19, %s7725_s13  ;;  %4941 = vmatmul.mubr.bf16.gmra.mxu1 %v4295_v33  ;;  %v596_v58 = vpop.f32.mrf.mxu1 }
 0x238   :  { %v9793_v19 = vpop.permute.xlu0 %4090  ;;  %4948 = vmatprep.mubr.bf16.mxu1 %v4554_v40  ;;  %v697_v51 = vmax.f32 %v605_v35, 0.0  ;;  %v597_v26 = vadd.f32 %v9811_v54, %v596_v58  ;;  %11562 = vst [vmem:[#allocation11_spill] sm:$0xff] %v9831_v39 }
 0x239   :  { %v9791_v1 = vpop.permute.xlu1 %3846  ;;  %11557 = vst [vmem:[#allocation49_spill] sm:$0xff] %v9793_v19  ;;  %v7379_v50 = vpop.f32.mrf.mxu1 }
 0x23a   :  { %3950 = vrot.lane.b32.xlu0 %v11560_v20, %s7726_s14  ;;  %v6935_v15 = vpack.c.bf16 %v697_v51, %v697_v51  ;;  %v695_v52 = vmax.f32 %v597_v26, 0.0  ;;  %v608_v61 = vadd.f32 %v9811_v54, %v7379_v50  ;;  %v1962_v26 = vld [vmem:[#allocation2 + $0x15c] sm:$0xf]  ;;  %v11565_v50 = vld [vmem:[#allocation54_spill] sm:$0xff] }
 0x23b   :  { %3874 = vrot.lane.b32.xlu1 %v11558_v22, %s7727_s15  ;;  %v599_v9 = vpop.f32.mrf.mxu1 }
 0x23c   :  { %v9804_v46 = vpop.permute.xlu0 %3924  ;;  %v1597_v33 = vshrl.u32 %v6935_v15, 16  ;;  %v1600_v25 = vshll.u32 %v6935_v15, 16  ;;  %v6933_v28 = vpack.c.bf16 %v695_v52, %v695_v52  ;;  %v698_v40 = vmax.f32 %v608_v61, 0.0  ;;  %v11566_v15 = vld [vmem:[#allocation59_spill] sm:$0xff] }
 0x23d   :  { %v9802_v8 = vpop.permute.xlu1 %3612  ;;  %v600_v2 = vadd.f32 %v9811_v54, %v599_v9  ;;  %v9851_v52 = vcombine.low %v11566_v15, %v11565_v50 }
 0x23e   :  { %4022 = vrot.lane.b32.xlu0 %v9806_v7, %s7725_s13  ;;  %v1599_v30 = vrot.slane %v1597_v33, 7  ;;  %v1580_v49 = vshrl.u32 %v6933_v28, 16  ;;  %v1583_v60 = vshll.u32 %v6933_v28, 16  ;;  %v6936_v35 = vpack.c.bf16 %v698_v40, %v698_v40  ;;  %v11589_v33 = vld [vmem:[#allocation69_spill] sm:$0xff] }
 0x23f   :  { %3632 = vrot.lane.b32.xlu1 %v9779_v53, %s7726_s14  ;;  %4949 = vmatmul.mubr.bf16.gmra.mxu1 %v4298_v57  ;;  %v696_v6 = vmax.f32 %v600_v2, 0.0  ;;  %11567 = vst [vmem:[#allocation33_spill] sm:$0xff] %v9851_v52  ;;  %v2001_v53 = vld [vmem:[#allocation2 + $0x1a0] sm:$0x1] }
 0x240   :  { %v9829_v18 = vpop.permute.xlu0 %3922  ;;  %v1602_v58 = vor.u32 %v1600_v25, %v1599_v30  ;;  %v1582_v57 = vrot.slane %v1580_v49, 7  ;;  %v1605_v51 = vshrl.u32 %v6936_v35, 16  ;;  %v1608_v61 = vshll.u32 %v6936_v35, 16  ;;  %v1973_v25 = vld [vmem:[#allocation2 + $0x170] sm:$0x1] }
 0x241   :  { %v9827_v14 = vpop.permute.xlu1 %3778  ;;  %v6934_v9 = vpack.c.bf16 %v696_v6, %v696_v6  ;;  %v1603_v17 = vrot.slane %v1599_v30, 4 }
 0x242   :  { %4092 = vrot.lane.b32.xlu0 %v9831_v39, %s7727_s15  ;;  %v1585_v40 = vor.u32 %v1583_v60, %v1582_v57  ;;  %v1607_v2 = vrot.slane %v1605_v51, 7  ;;  %v1586_v50 = vrot.slane %v1582_v57, 4 }
 0x243   :  { %3644 = vrot.lane.b32.xlu1 %v11563_v38, %s7726_s14  ;;  %v1588_v49 = vshrl.u32 %v6934_v9, 16  ;;  %v1591_v22 = vshll.u32 %v6934_v9, 16 }
 0x244   :  { %v9843_v21 = vpop.permute.xlu0 %3998  ;;  %v1963_v35 = vsel %vm8072_vm13, %v1585_v40, %v1962_v26  ;;  %v1610_v30 = vor.u32 %v1608_v61, %v1607_v2  ;;  %v1612_v6 = vrot.slane %v1607_v2, 4  ;;  %v1966_v40 = vld [vmem:[#allocation2 + $0x164] sm:$0x1]  ;;  %v11571_v2 = vld [vmem:[#allocation39_spill] sm:$0xff] }
 0x245   :  { %v9840_v12 = vpop.permute.xlu1 %3776  ;;  %1964 = vst [vmem:[#allocation2 + $0x15c] sm:$0xf] %v1963_v35 }
 0x246   :  { %3952 = vrot.lane.b32.xlu0 %v11564_v56, %s7726_s14  ;;  %v1611_v9 = vsel %vm8100_vm14, %v1603_v17, %v1610_v30  ;;  %v11572_v17 = vld [vmem:[#allocation16_spill] sm:$0xff] }
 0x247   :  { %3804 = vrot.lane.b32.xlu1 %v11560_v20, %s7725_s13  ;;  %v1970_v20 = vsel %vm8072_vm13, %v1602_v58, %v1969_v27  ;;  %v1590_v27 = vrot.slane %v1588_v49, 7  ;;  %v11569_v58 = vld [vmem:[#allocation29_spill] sm:$0xff]  ;;  %1972 = vst.msk [vmem:[#allocation2 + $0x16c] sm:$0xf] %vm739_vm0, %v1611_v9 }
 0x248   :  { %v4065_v28 = vpop.permute.xlu0 %4064  ;;  %1971 = vst [vmem:[#allocation2 + $0x168] sm:$0xf] %v1970_v20  ;;  %v4140_v51 = vsel %vm4122_vm15, %v11569_v58, %v9802_v8  ;;  %v1974_v20 = vsel %vm7885_vm4, %v1612_v6, %v1973_v25  ;;  %v4398_v8 = vsel %vm4122_vm15, %v11571_v2, %v9707_v10  ;;  %v4401_v25 = vsel %vm4122_vm15, %v11572_v17, %v9829_v18  ;;  %v11574_v58 = vld [vmem:[#allocation23_spill] sm:$0xff]  ;;  %v9917_v2 = vld [vmem:[#allocation2 + $0x1a8] sm:$0xf]  ;;  %v11577_v17 = vld [vmem:[#allocation68_spill] sm:$0xff] }
 0x249   :  { %v9853_v11 = vpop.permute.xlu1 %3852  ;;  %1975 = vst [vmem:[#allocation2 + $0x170] sm:$0x1] %v1974_v20  ;;  %v1593_v57 = vor.u32 %v1591_v22, %v1590_v27  ;;  %v1595_v61 = vrot.slane %v1590_v27, 4  ;;  %v4231_v30 = vsel %vm4219_vm1, %v4140_v51, %v9740_v16  ;;  %v4488_v10 = vsel %vm4219_vm1, %v4398_v8, %v9754_v23 }
 0x24a   :  { %4024 = vrot.lane.b32.xlu0 %v9851_v52, %s7725_s13  ;;  %v4301_v27 = vsel %vm4284_vm2, %v4231_v30, %v9633_v24  ;;  %v4490_v16 = vsel %vm4219_vm1, %v4401_v25, %v9734_v13  ;;  %v4143_v51 = vsel %vm4122_vm15, %v11574_v58, %v9771_v47  ;;  %v9929_v25 = vcombine.low %v11577_v17, %v9501_v45 }
 0x24b   :  { %3876 = vrot.lane.b32.xlu1 %v9806_v7, %s7727_s15  ;;  %v1594_v49 = vsel %vm8100_vm14, %v1586_v50, %v1593_v57  ;;  %v1967_v22 = vsel %vm7885_vm4, %v1595_v61, %v1966_v40  ;;  %v11573_v50 = vld [vmem:[#allocation58_spill] sm:$0xff]  ;;  %v4560_v9 = vsel %vm4284_vm2, %v4490_v16, %v4065_v28 }
 0x24c   :  { %v9870_v26 = vpop.permute.xlu0 %3996  ;;  %1965 = vst.msk [vmem:[#allocation2 + $0x160] sm:$0xf] %vm739_vm0, %v1594_v49  ;;  %1968 = vst [vmem:[#allocation2 + $0x164] sm:$0x1] %v1967_v22  ;;  %v11575_v57 = vld [vmem:[#allocation62_spill] sm:$0xff] }
 0x24d   :  { %v3619_v60 = vpop.permute.xlu1 %3618  ;;  %v9911_v61 = vcombine.low %v11575_v57, %v9419_v4  ;;  %v4233_v4 = vsel %vm4219_vm1, %v4143_v51, %v9732_v34  ;;  %11578 = vst [vmem:[#allocation54_spill] sm:$0xff] %v9929_v25  ;;  %v9931_v22 = vld [vmem:[#allocation2 + $0x15c] sm:$0xf]  ;;  %v11582_v51 = vld [vmem:[#allocation38_spill] sm:$0xff] }
 0x24e   :  { %4094 = vrot.lane.b32.xlu0 %v9561_v29, %s7727_s15  ;;  %v9913_v24 = vld [vmem:[#allocation2 + $0x16c] sm:$0xf] }
 0x24f   :  { %3646 = vrot.lane.b32.xlu1 %v9831_v39, %s7726_s14  ;;  %v2142_v23 = vld [vmem:[#allocation2 + $0x168] sm:$0xe]  ;;  %11576 = vst [vmem:[#allocation34_spill] sm:$0xff] %v9911_v61  ;;  %v3216_v28 = vrot.slane %v9913_v24, 5 }
 0x250   :  { %v4063_v6 = vpop.permute.xlu0 %4062  ;;  %v9915_v13 = vld [vmem:[#allocation2 + $0x170] sm:$0x1]  ;;  %v6615_v47 = vrot.slane %v2142_v23, 9  ;;  %v11581_v23 = vld [vmem:[#allocation48_spill] sm:$0xff] }
 0x251   :  { %v9887_v35 = vpop.permute.xlu1 %3850  ;;  %v4557_v18 = vsel %vm4284_vm2, %v4488_v10, %v4063_v6  ;;  %v3219_v8 = vrot.slane %v9915_v13, 5  ;;  %v4304_v10 = vsel %vm4284_vm2, %v4233_v4, %v9791_v1  ;;  %v3218_v34 = vrot.slane %v3216_v28, 4  ;;  %v9953_v4 = vld [vmem:[#allocation2 + $0x168] sm:$0xf] }
 0x252   :  { %3954 = vrot.lane.b32.xlu0 %v11573_v50, %s7726_s14  ;;  %4956 = vmatprep.mubr.bf16.mxu1 %v4557_v18  ;;  %v4404_v58 = vsel %vm4122_vm15, %v11581_v23, %v9804_v46  ;;  %v2800_v23 = vshrl.u32 %v9931_v22, 16 }
 0x253   :  { %3806 = vrot.lane.b32.xlu1 %v11564_v56, %s7725_s13  ;;  %4957 = vmatmul.mubr.bf16.gmra.mxu1 %v4301_v27  ;;  %v2141_v56 = vld [vmem:[#allocation2 + $0x15c] sm:$0xe]  ;;  %v9937_v6 = vld [vmem:[#allocation2 + $0x160] sm:$0xf]  ;;  %v9939_v18 = vld [vmem:[#allocation2 + $0x164] sm:$0x1]  ;;  %v3220_v46 = vsel %vm7919_vm8, %v3218_v34, %v3219_v8 }
 0x254   :  { %v9907_v40 = vpop.permute.xlu0 %3928  ;;  %4964 = vmatprep.mubr.bf16.mxu1 %v4560_v9  ;;  %v6614_v49 = vrot.slane %v2141_v56, 9  ;;  %v11579_v27 = vld [vmem:[#allocation70_spill] sm:$0xff]  ;;  %v4149_v9 = vsel %vm4122_vm15, %v11582_v51, %v3619_v60  ;;  %v3209_v1 = vrot.slane %v9937_v6, 5  ;;  %v3212_v57 = vrot.slane %v9939_v18, 5 }
 0x255   :  { %v3617_v20 = vpop.permute.xlu1 %3616  ;;  %v9943_v16 = vcombine.low %v11579_v27, %v9539_v62  ;;  %v7382_v62 = vpop.f32.mrf.mxu1  ;;  %v3217_v27 = vsel %vm7919_vm8, %v6615_v47, %v3216_v28  ;;  %v2803_v60 = vshll.u32 %v9931_v22, 16  ;;  %v9965_v51 = vsel %vm4219_vm1, %v4404_v58, %v9870_v26  ;;  %v11584_v28 = vld [vmem:[#allocation42_spill] sm:$0xff] }
 0x256   :  { %4026 = vrot.lane.b32.xlu0 %v9911_v61, %s7725_s13  ;;  %v621_v45 = vadd.f32 %v9811_v54, %v7382_v62  ;;  %v3211_v47 = vrot.slane %v3209_v1, 4  ;;  %v4146_v8 = vsel %vm4122_vm15, %v11584_v28, %v3617_v20  ;;  %v4237_v26 = vsel %vm4219_vm1, %v4149_v9, %v9827_v14 }
 0x257   :  { %3878 = vrot.lane.b32.xlu1 %v9851_v52, %s7727_s15  ;;  %11580 = vst [vmem:[#allocation59_spill] sm:$0xff] %v9943_v16  ;;  %v3210_v52 = vsel %vm7919_vm8, %v6614_v49, %v3209_v1  ;;  %v612_v7 = vpop.f32.mrf.mxu1  ;;  %v2824_v58 = vshrl.u32 %v9953_v4, 16  ;;  %v9985_v20 = vcombine.low %v3217_v27, %v3220_v46  ;;  %v9993_v14 = vsel %vm4284_vm2, %v4237_v26, %v9887_v35 }
 0x258   :  { %v3927_v56 = vpop.permute.xlu0 %3926  ;;  %v701_v62 = vmax.f32 %v621_v45, 0.0  ;;  %v613_v49 = vadd.f32 %v9811_v54, %v612_v7  ;;  %v3213_v1 = vsel %vm7919_vm8, %v3211_v47, %v3212_v57  ;;  %v2802_v9 = vrot.slane %v2800_v23, 4  ;;  %v11585_v45 = vld [vmem:[#allocation22_spill] sm:$0xff] }
 0x259   :  { %v9933_v30 = vpop.permute.xlu1 %3782  ;;  %v9989_v28 = vcombine.low %v3210_v52, %v3213_v1  ;;  %v2805_v38 = vrot.slane %v2803_v60, 5  ;;  %v4235_v27 = vsel %vm4219_vm1, %v4146_v8, %v9840_v12  ;;  %v2809_v35 = vshll.u32 %v9937_v6, 16  ;;  %v11586_v8 = vld [vmem:[#allocation56_spill] sm:$0xff] }
 0x25a   :  { %4096 = vrot.lane.b32.xlu0 %v9623_v0, %s7727_s15  ;;  %v6939_v7 = vpack.c.bf16 %v701_v62, %v701_v62  ;;  %v699_v41 = vmax.f32 %v613_v49, 0.0  ;;  %v2813_v46 = vshrl.u32 %v9937_v6, 16  ;;  %v10006_v23 = vrot.slane %v2824_v58, 4 }
 0x25b   :  { %3648 = vrot.lane.b32.xlu1 %v9561_v29, %s7726_s14  ;;  %4965 = vmatmul.mubr.bf16.gmra.mxu1 %v4304_v10  ;;  %v2827_v29 = vshll.u32 %v9953_v4, 16  ;;  %v7383_v10 = vpop.f32.mrf.mxu1  ;;  %v4407_v1 = vsel %vm4122_vm15, %v11586_v8, %v3927_v56  ;;  %v2806_v58 = vor.u32 %v2805_v38, %v2802_v9 }
 0x25c   :  { %v9980_v39 = vpop.permute.xlu0 %4002  ;;  %v624_v57 = vadd.f32 %v9811_v54, %v7383_v10  ;;  %7441 = vmatmul.mubr.msk.bf16.gmra.mxu0 %vm4122_vm15, %v9989_v28  ;;  %v1631_v47 = vshrl.u32 %v6939_v7, 16  ;;  %v1634_v26 = vshll.u32 %v6939_v7, 16  ;;  %v6937_v49 = vpack.c.bf16 %v699_v41, %v699_v41 }
 0x25d   :  { %v9974_v34 = vpop.permute.xlu1 %3780  ;;  %v615_v52 = vpop.f32.mrf.mxu1  ;;  %v10008_v60 = vrot.slane %v2827_v29, 5  ;;  %7444 = vmatprep.mubr.msk.bf16.mxu0 %vm4122_vm15, %v9985_v20  ;;  %v10021_v29 = vsel %vm4284_vm2, %v4235_v27, %v9750_v48  ;;  %v10029_v8 = vrot.slane %v2813_v46, 4  ;;  %v10040_v46 = vrot.slane %v2806_v58, 4 }
 0x25e   :  { %3956 = vrot.lane.b32.xlu0 %v11585_v45, %s7726_s14  ;;  %v702_v12 = vmax.f32 %v624_v57, 0.0  ;;  %v616_v10 = vadd.f32 %v9811_v54, %v615_v52  ;;  %v1633_v7 = vrot.slane %v1631_v47, 7  ;;  %v1614_v19 = vshrl.u32 %v6937_v49, 16 }
 0x25f   :  { %3808 = vrot.lane.b32.xlu1 %v11573_v50, %s7725_s13  ;;  %v1617_v41 = vshll.u32 %v6937_v49, 16  ;;  %v10027_v52 = vrot.slane %v2809_v35, 5  ;;  %v4494_v47 = vsel %vm4219_vm1, %v4407_v1, %v9843_v21  ;;  %v1976_v49 = vld [vmem:[#allocation2 + $0x174] sm:$0xf]  ;;  %v7386_v35 = vpop.f32.mrf.mxu1 }
 0x260   :  { %v10010_v62 = vpop.permute.xlu0 %4068  ;;  %v6940_v57 = vpack.c.bf16 %v702_v12, %v702_v12  ;;  %v700_v3 = vmax.f32 %v616_v10, 0.0  ;;  %v1636_v48 = vor.u32 %v1634_v26, %v1633_v7  ;;  %v10032_v27 = vrot.slane %v1614_v19, 7 }
 0x261   :  { %v10000_v50 = vpop.permute.xlu1 %3856  ;;  %v1637_v26 = vrot.slane %v1633_v7, 4  ;;  %v637_v58 = vadd.f32 %v9811_v54, %v7386_v35 }
 0x262   :  { %4028 = vrot.lane.b32.xlu0 %v9929_v25, %s7725_s13  ;;  %v1639_v38 = vshrl.u32 %v6940_v57, 16  ;;  %v1642_v12 = vshll.u32 %v6940_v57, 16  ;;  %v6938_v10 = vpack.c.bf16 %v700_v3, %v700_v3  ;;  %v1984_v19 = vsel %vm8072_vm13, %v1636_v48, %v1983_v55  ;;  %v628_v57 = vpop.f32.mrf.mxu1 }
 0x263   :  { %3880 = vrot.lane.b32.xlu1 %v9911_v61, %s7727_s15  ;;  %v2819_v61 = vshll.u32 %v9939_v18, 16  ;;  %v1619_v63 = vor.u32 %v1617_v41, %v10032_v27  ;;  %1985 = vst [vmem:[#allocation2 + $0x180] sm:$0xf] %v1984_v19  ;;  %v2816_v18 = vor.u32 %v10029_v8, %v10027_v52  ;;  %v1620_v19 = vrot.slane %v10032_v27, 4 }
 0x264   :  { %v10034_v9 = vpop.permute.xlu0 %4000  ;;  %v1641_v44 = vrot.slane %v1639_v38, 7  ;;  %v1622_v3 = vshrl.u32 %v6938_v10, 16  ;;  %v1625_v21 = vshll.u32 %v6938_v10, 16  ;;  %v629_v38 = vadd.f32 %v9811_v54, %v628_v57  ;;  %v7624_v10 = vld [vmem:[%s11343_s5 + $0x8] sm:$0xff]   ;;  %v7387_v8 = vpop.f32.mrf.mxu1 }
 0x265   :  { %v10025_v56 = vpop.permute.xlu1 %3622  ;;  %v1977_v55 = vsel %vm8072_vm13, %v1619_v63, %v1976_v49  ;;  %v705_v63 = vmax.f32 %v637_v58, 0.0  ;;  %7456 = vmatprep.subr.bf16.mxu0 %v7624_v10 }
 0x266   :  { %4098 = vrot.lane.b32.xlu0 %v9649_v37, %s7727_s15  ;;  %v1644_v7 = vor.u32 %v1642_v12, %v1641_v44  ;;  %v1646_v41 = vrot.slane %v1641_v44, 4  ;;  %1978 = vst [vmem:[#allocation2 + $0x174] sm:$0xf] %v1977_v55  ;;  %v1624_v35 = vrot.slane %v1622_v3, 7  ;;  %v7625_v44 = vld [vmem:[%s11343_s5] sm:$0xff]   ;;  %v11587_v3 = vld [vmem:[#allocation66_spill] sm:$0xff]  ;;  %7457 = vmatpush3.bf16.msra.mxu0 %v7624_v10 }
 0x267   :  { %3650 = vrot.lane.b32.xlu1 %v9623_v0, %s7726_s14  ;;  %v1980_v12 = vld [vmem:[#allocation2 + $0x17c] sm:$0x1]  ;;  %7458 = vmatprep.subr.bf16.mxu0 %v7625_v44 }
 0x268   :  { %v4067_v48 = vpop.permute.xlu0 %4066  ;;  %v1645_v49 = vsel %vm8100_vm14, %v1637_v26, %v1644_v7  ;;  %v1988_v27 = vsel %vm7885_vm4, %v1646_v41, %v1987_v59  ;;  %v1627_v58 = vor.u32 %v1625_v21, %v1624_v35  ;;  %v1629_v57 = vrot.slane %v1624_v35, 4  ;;  %v631_v7 = vpop.f32.mrf.mxu1 }
 0x269   :  { %v10048_v1 = vpop.permute.xlu1 %3854  ;;  %v4563_v0 = vsel %vm4284_vm2, %v9965_v51, %v4067_v48  ;;  %v703_v51 = vmax.f32 %v629_v38, 0.0  ;;  %1986 = vst.msk [vmem:[#allocation2 + $0x184] sm:$0xf] %vm739_vm0, %v1645_v49  ;;  %1989 = vst [vmem:[#allocation2 + $0x188] sm:$0x1] %v1988_v27  ;;  %v4566_v26 = vsel %vm4284_vm2, %v4494_v47, %v10010_v62  ;;  %v6943_v59 = vpack.c.bf16 %v705_v63, %v705_v63 }
 0x26a   :  { %3958 = vrot.lane.b32.xlu0 %v11587_v3, %s7726_s14  ;;  %4972 = vmatprep.mubr.bf16.mxu1 %v4563_v0  ;;  %v632_v38 = vadd.f32 %v9811_v54, %v631_v7  ;;  %v2837_v21 = vshrl.u32 %v9913_v24, 16  ;;  %v1981_v62 = vsel %vm7885_vm4, %v1629_v57, %v1980_v12  ;;  %v10090_v35 = vrot.slane %v2819_v61, 5  ;;  %v1997_v12 = vld [vmem:[#allocation2 + $0x198] sm:$0xf] }
 0x26b   :  { %3810 = vrot.lane.b32.xlu1 %v11585_v45, %s7725_s13  ;;  %v640_v45 = vadd.f32 %v9811_v54, %v7387_v8  ;;  %4973 = vmatmul.mubr.bf16.gmra.mxu1 %v10021_v29  ;;  %v6941_v0 = vpack.c.bf16 %v703_v51, %v703_v51  ;;  %v1628_v29 = vsel %vm8100_vm14, %v1620_v19, %v1627_v58  ;;  %v1665_v47 = vshrl.u32 %v6943_v59, 16  ;;  %v2144_v8 = vld [vmem:[#allocation2 + $0x180] sm:$0xe] }
 0x26c   :  { %v10080_v41 = vpop.permute.xlu0 %3932  ;;  %4980 = vmatprep.mubr.bf16.mxu1 %v4566_v26  ;;  %1979 = vst.msk [vmem:[#allocation2 + $0x178] sm:$0xf] %vm739_vm0, %v1628_v29  ;;  %1982 = vst [vmem:[#allocation2 + $0x17c] sm:$0x1] %v1981_v62  ;;  %v1668_v54 = vshll.u32 %v6943_v59, 16  ;;  %v704_v51 = vmax.f32 %v632_v38, 0.0  ;;  %7459 = vmatpush3.bf16.msra.mxu0 %v7625_v44 }
 0x26d   :  { %v10078_v55 = vpop.permute.xlu1 %3620  ;;  %v706_v48 = vmax.f32 %v640_v45, 0.0  ;;  %v1648_v10 = vshrl.u32 %v6941_v0, 16  ;;  %v1651_v63 = vshll.u32 %v6941_v0, 16  ;;  %v1667_v27 = vrot.slane %v1665_v47, 7  ;;  %v2143_v29 = vld [vmem:[#allocation2 + $0x174] sm:$0xe] }
 0x26e   :  { %4030 = vrot.lane.b32.xlu0 %v9943_v16, %s7725_s13  ;;  %v10097_v45 = vrot.slane %v2816_v18, 4  ;;  %v11588_v61 = vshll.u32 %v9913_v24, 16  ;;  %v10105_v0 = vrot.slane %v2837_v21, 4  ;;  %v1990_v18 = vld [vmem:[#allocation2 + $0x18c] sm:$0xf]  ;;  %v6942_v62 = vpack.c.bf16 %v704_v51, %v704_v51 }
 0x26f   :  { %3882 = vrot.lane.b32.xlu1 %v9929_v25, %s7727_s15  ;;  %v6944_v19 = vpack.c.bf16 %v706_v48, %v706_v48  ;;  %v1650_v26 = vrot.slane %v1648_v10, 7  ;;  %v1670_v48 = vor.u32 %v1668_v54, %v1667_v27  ;;  %v1671_v38 = vrot.slane %v1667_v27, 4 }
 0x270   :  { %v10101_v58 = vrot.slane %v11588_v61, 5  ;;  %v10103_v57 = vpop.permute.xlu0 %3930  ;;  %v6617_v47 = vrot.slane %v2144_v8, 9  ;;  %v1656_v54 = vshrl.u32 %v6942_v62, 16  ;;  %v1659_v27 = vshll.u32 %v6942_v62, 16  ;;  %v10118_v8 = vld [vmem:[#allocation2 + $0x188] sm:$0x1] }
 0x271   :  { %v10095_v49 = vpop.permute.xlu1 %3786  ;;  %v1673_v7 = vshrl.u32 %v6944_v19, 16  ;;  %v1676_v59 = vshll.u32 %v6944_v19, 16  ;;  %v1653_v61 = vor.u32 %v1651_v63, %v1650_v26  ;;  %v1654_v25 = vrot.slane %v1650_v26, 4 }
 0x272   :  { %4100 = vrot.lane.b32.xlu0 %v9686_v32, %s7727_s15  ;;  %v6616_v19 = vrot.slane %v2143_v29, 9  ;;  %v1998_v44 = vsel %vm8072_vm13, %v1670_v48, %v1997_v12  ;;  %v1658_v12 = vrot.slane %v1656_v54, 7  ;;  %v3233_v62 = vrot.slane %v10118_v8, 5 }
 0x273   :  { %3652 = vrot.lane.b32.xlu1 %v9649_v37, %s7726_s14  ;;  %v1675_v10 = vrot.slane %v1673_v7, 7  ;;  %4981 = vmatmul.mubr.bf16.gmra.mxu1 %v9993_v14  ;;  %v10116_v37 = vld [vmem:[#allocation2 + $0x184] sm:$0xf]  ;;  %1999 = vst [vmem:[#allocation2 + $0x198] sm:$0xf] %v1998_v44  ;;  %v1991_v63 = vsel %vm8072_vm13, %v1653_v61, %v1990_v18  ;;  %v2830_v44 = vor.u32 %v10008_v60, %v10006_v23 }
 0x274   :  { %v10120_v51 = vpop.permute.xlu0 %4006  ;;  %v3230_v14 = vrot.slane %v10116_v37, 5  ;;  %1992 = vst [vmem:[#allocation2 + $0x18c] sm:$0xf] %v1991_v63  ;;  %v10127_v29 = vld [vmem:[#allocation2 + $0x178] sm:$0xf]  ;;  %v1661_v23 = vor.u32 %v1659_v27, %v1658_v12  ;;  %v1663_v60 = vrot.slane %v1658_v12, 4 }
 0x275   :  { %v10114_v21 = vpop.permute.xlu1 %3784  ;;  %v1678_v26 = vor.u32 %v1676_v59, %v1675_v10  ;;  %v1680_v7 = vrot.slane %v1675_v10, 4  ;;  %v10129_v48 = vld [vmem:[#allocation2 + $0x17c] sm:$0x1]  ;;  %v3223_v61 = vrot.slane %v10127_v29, 5 }
 0x276   :  { %3960 = vrot.lane.b32.xlu0 %v11589_v33, %s7726_s14  ;;  %v3226_v10 = vrot.slane %v10129_v48, 5  ;;  %v3231_v63 = vsel %vm7919_vm8, %v6617_v47, %v3230_v14  ;;  %v3232_v42 = vrot.slane %v3230_v14, 4  ;;  %v1662_v12 = vsel %vm8100_vm14, %v1654_v25, %v1661_v23 }
 0x277   :  { %3812 = vrot.lane.b32.xlu1 %v11587_v3, %s7725_s13  ;;  %v1679_v59 = vsel %vm8100_vm14, %v1671_v38, %v1678_v26  ;;  %v2002_v18 = vsel %vm7885_vm4, %v1680_v7, %v2001_v53  ;;  %v1994_v3 = vld [vmem:[#allocation2 + $0x194] sm:$0x1]  ;;  %v10151_v53 = vcombine.low %v9931_v22, %v9937_v6  ;;  %v2812_v26 = vsel %vm7948_vm11, %v10040_v46, %v10027_v52  ;;  %v10171_v52 = vld [vmem:[#allocation2 + $0x1a4] sm:$0xe] }
 0x278   :  { %2000 = vst.msk [vmem:[#allocation2 + $0x19c] sm:$0xf] %vm739_vm0, %v1679_v59  ;;  %2003 = vst [vmem:[#allocation2 + $0x1a0] sm:$0x1] %v2002_v18  ;;  %v10147_v38 = vpop.permute.xlu0 %4072  ;;  %v3224_v7 = vsel %vm7919_vm8, %v6616_v19, %v3223_v61  ;;  %v3225_v27 = vrot.slane %v3223_v61, 4  ;;  %v1995_v47 = vsel %vm7885_vm4, %v1663_v60, %v1994_v3  ;;  %v2822_v22 = vsel %vm7948_vm11, %v10097_v45, %v10090_v35 }
 0x279   :  { %v10143_v54 = vpop.permute.xlu1 %3860  ;;  %v3234_v6 = vsel %vm7919_vm8, %v3232_v42, %v3233_v62  ;;  %1993 = vst.msk [vmem:[#allocation2 + $0x190] sm:$0xf] %vm739_vm0, %v1662_v12  ;;  %1996 = vst [vmem:[#allocation2 + $0x194] sm:$0x1] %v1995_v47  ;;  %v2840_v25 = vor.u32 %v10105_v0, %v10101_v58  ;;  %v2843_v46 = vshll.u32 %v9915_v13, 16  ;;  %v11590_v42 = vld [vmem:[#allocation47_spill] sm:$0xff]  ;;  %v10194_v59 = vcombine.low %v2812_v26, %v2822_v22 }
 0x27a   :  { %4032 = vrot.lane.b32.xlu0 %v10151_v53, %s7725_s13  ;;  %v3227_v31 = vsel %vm7919_vm8, %v3225_v27, %v3226_v10  ;;  %v10178_v15 = vcombine.low %v3231_v63, %v3234_v6  ;;  %v10183_v35 = vld [vmem:[#allocation2 + $0x1ac] sm:$0x1]  ;;  %v4152_v45 = vsel %vm4122_vm15, %v11590_v42, %v10078_v55  ;;  %v10196_v18 = vld [vmem:[#allocation2 + $0x174] sm:$0xf]  ;;  %v2146_v3 = vld [vmem:[#allocation2 + $0x198] sm:$0xe]  ;;  %v4413_v12 = vsel %vm4122_vm15, %v9546_v36, %v10103_v57 }
 0x27b   :  { %3884 = vrot.lane.b32.xlu1 %v9943_v16, %s7727_s15  ;;  %v10190_v14 = vcombine.low %v3224_v7, %v3227_v31  ;;  %v11591_v13 = vld [vmem:[#allocation53_spill] sm:$0xff]  ;;  %v2831_v55 = vrot.slane %v2830_v44, 4  ;;  %v2145_v10 = vld [vmem:[#allocation2 + $0x18c] sm:$0xe]  ;;  %v11592_v23 = vrot.slane %v9917_v2, 5  ;;  %v3376_v63 = vrot.slane %v10183_v35, 5 }
 0x27c   :  { %v10192_v62 = vpop.permute.xlu0 %4004  ;;  %v4410_v61 = vsel %vm4122_vm15, %v11591_v13, %v9907_v40  ;;  %v4239_v40 = vsel %vm4219_vm1, %v4152_v45, %v9974_v34  ;;  %v2841_v7 = vrot.slane %v2840_v25, 4  ;;  %v2845_v44 = vrot.slane %v2843_v46, 5 }
 0x27d   :  { %v10188_v19 = vpop.permute.xlu1 %3626  ;;  %7445 = vmatmul.mubr.msk.bf16.gmra.mxu0 %vm4122_vm15, %v10190_v14  ;;  %v3375_v60 = vrot.slane %v11592_v23, 4  ;;  %v4496_v26 = vsel %vm4219_vm1, %v4410_v61, %v10034_v9  ;;  %v2848_v9 = vshrl.u32 %v10196_v18, 16  ;;  %v6620_v6 = vrot.slane %v2146_v3, 9 }
 0x27e   :  { %4102 = vrot.lane.b32.xlu0 %v10194_v59, %s7727_s15  ;;  %7448 = vmatprep.mubr.msk.bf16.mxu0 %vm4122_vm15, %v10178_v15  ;;  %v2851_v42 = vshll.u32 %v10196_v18, 16  ;;  %v2857_v25 = vshll.u32 %v10127_v29, 16  ;;  %v6618_v46 = vrot.slane %v2145_v10, 9  ;;  %v2861_v36 = vshrl.u32 %v10127_v29, 16 }
 0x27f   :  { %3654 = vrot.lane.b32.xlu1 %v9686_v32, %s7726_s14  ;;  %v10217_v27 = vld [vmem:[#allocation2 + $0x19c] sm:$0xf]  ;;  %v10225_v22 = vld [vmem:[#allocation2 + $0x1a0] sm:$0x1]  ;;  %v4313_v10 = vsel %vm4284_vm2, %v4239_v40, %v9853_v11  ;;  %v4498_v23 = vsel %vm4219_vm1, %v4413_v12, %v9980_v39  ;;  %v10251_v0 = vcombine.low %v9953_v4, %v9913_v24  ;;  %v2836_v12 = vsel %vm7948_vm11, %v2831_v55, %v10101_v58 }
 0x280   :  { %v3305_v34 = vrot.slane %v10217_v27, 5  ;;  %v4071_v31 = vpop.permute.xlu0 %4070  ;;  %v3308_v45 = vrot.slane %v10225_v22, 5  ;;  %v10235_v57 = vld [vmem:[#allocation2 + $0x190] sm:$0xf]  ;;  %v10237_v3 = vld [vmem:[#allocation2 + $0x194] sm:$0x1] }
 0x281   :  { %v10222_v47 = vpop.permute.xlu1 %3858  ;;  %v4569_v13 = vsel %vm4284_vm2, %v4496_v26, %v4071_v31  ;;  %v3237_v26 = vrot.slane %v10235_v57, 5  ;;  %v4572_v31 = vsel %vm4284_vm2, %v4498_v23, %v10147_v38  ;;  %v2846_v38 = vsel %vm7948_vm11, %v2841_v7, %v2845_v44  ;;  %v10281_v7 = vpop.f32.mrf.mxu0 }
 0x282   :  { %v3307_v61 = vrot.slane %v3305_v34, 4  ;;  %3962 = vrot.lane.b32.xlu0 %v9989_v28, %s7726_s14  ;;  %4988 = vmatprep.mubr.bf16.mxu1 %v4569_v13  ;;  %v3306_v11 = vsel %vm7919_vm8, %v6620_v6, %v3305_v34  ;;  %v2850_v6 = vrot.slane %v2848_v9, 4  ;;  %v2853_v34 = vrot.slane %v2851_v42, 5 }
 0x283   :  { %3814 = vrot.lane.b32.xlu1 %v11589_v33, %s7725_s13  ;;  %v3240_v33 = vrot.slane %v10237_v3, 5  ;;  %4989 = vmatmul.mubr.bf16.gmra.mxu1 %v4313_v10  ;;  %v3238_v24 = vsel %vm7919_vm8, %v6618_v46, %v3237_v26  ;;  %v3239_v4 = vrot.slane %v3237_v26, 4  ;;  %v2863_v13 = vrot.slane %v2861_v36, 4  ;;  %v10292_v46 = vld [vmem:[#allocation2 + $0x180] sm:$0xf]  ;;  %v5207_v17 = vpop.f32.mrf.mxu0 }
 0x284   :  { %v3309_v39 = vsel %vm7919_vm8, %v3307_v61, %v3308_v45  ;;  %v10259_v40 = vpop.permute.xlu0 %3936  ;;  %4996 = vmatprep.mubr.bf16.mxu1 %v4572_v31  ;;  %v10270_v45 = vrot.slane %v2857_v25, 5  ;;  %v11593_v61 = vld [vmem:[#allocation46_spill] sm:$0xff]  ;;  %v10289_v25 = vcombine.low %v2836_v12, %v2846_v38  ;;  %v11594_v36 = vrot.slane %v9917_v2, 5  ;;  %v10324_v38 = vld [vmem:[%s11344_s4] ss:$0 sm:$0xff] }
 0x285   :  { %v10253_v16 = vpop.permute.xlu1 %3624  ;;  %v4155_v10 = vsel %vm4122_vm15, %v11593_v61, %v10025_v56  ;;  %v3241_v58 = vsel %vm7919_vm8, %v3239_v4, %v3240_v33  ;;  %v10279_v55 = vcombine.low %v3306_v11, %v3309_v39  ;;  %v2867_v56 = vshll.u32 %v10129_v48, 16  ;;  %v10332_v61 = vpop.f32.mrf.mxu0 }
 0x286   :  { %4034 = vrot.lane.b32.xlu0 %v10251_v0, %s7725_s13  ;;  %v10285_v9 = vcombine.low %v3238_v24, %v3241_v58  ;;  %v11595_v23 = vrot.slane %v10171_v52, 9  ;;  %v3377_v33 = vsel %vm7919_vm8, %v3375_v60, %v3376_v63  ;;  %v4241_v31 = vsel %vm4219_vm1, %v4155_v10, %v9933_v30 }
 0x287   :  { %3886 = vrot.lane.b32.xlu1 %v10151_v53, %s7727_s15  ;;  %v2854_v11 = vor.u32 %v2853_v34, %v2850_v6  ;;  %v2864_v48 = vor.u32 %v2863_v13, %v10270_v45  ;;  %v4316_v52 = vsel %vm4284_vm2, %v4241_v31, %v10048_v1  ;;  %v2872_v60 = vshrl.u32 %v10292_v46, 16 }
 0x288   :  { %v10287_v42 = vpop.permute.xlu0 %3934  ;;  %v3374_v26 = vsel %vm7919_vm8, %v11595_v23, %v11594_v36  ;;  %7449 = vmatmul.mubr.msk.bf16.gmra.mxu0 %vm4122_vm15, %v10285_v9  ;;  %v2875_v63 = vshll.u32 %v10292_v46, 16  ;;  %v2869_v12 = vrot.slane %v2867_v56, 5  ;;  %v2881_v6 = vshll.u32 %v10116_v37, 16 }
 0x289   :  { %v10283_v44 = vpop.permute.xlu1 %3790  ;;  %7452 = vmatprep.mubr.msk.bf16.mxu0 %vm4122_vm15, %v10279_v55  ;;  %v6730_v1 = vcombine.low %v3374_v26, %v3377_v33  ;;  %v2855_v24 = vrot.slane %v2854_v11, 4  ;;  %v2865_v4 = vrot.slane %v2864_v48, 4  ;;  %v2885_v34 = vshrl.u32 %v10116_v37, 16 }
 0x28a   :  { %4104 = vrot.lane.b32.xlu0 %v10289_v25, %s7727_s15  ;;  %v2874_v58 = vrot.slane %v2872_v60, 4  ;;  %v2877_v56 = vrot.slane %v2875_v63, 5  ;;  %v2883_v11 = vrot.slane %v2881_v6, 5 }
 0x28b   :  { %3656 = vrot.lane.b32.xlu1 %v10194_v59, %s7726_s14  ;;  %4997 = vmatmul.mubr.bf16.gmra.mxu1 %v4316_v52  ;;  %v4918_v13 = vpop.f32.mrf.mxu1  ;;  %v2860_v33 = vsel %vm7948_vm11, %v2855_v24, %v10270_v45  ;;  %v2870_v31 = vsel %vm7948_vm11, %v2865_v4, %v2869_v12  ;;  %v2887_v48 = vrot.slane %v2885_v34, 4  ;;  %v11596_v52 = vld [vmem:[#allocation18_spill] sm:$0xff]  ;;  %v11597_v34 = vld [vmem:[#allocation63_spill] sm:$0xff] }
 0x28c   :  { %v10319_v39 = vpop.permute.xlu0 %4010  ;;  %v4919_v36 = vadd.f32 %v10324_v38, %v4918_v13  ;;  %v4158_v60 = vsel %vm4122_vm15, %v11596_v52, %v10253_v16  ;;  %v2878_v13 = vor.u32 %v2877_v56, %v2874_v58  ;;  %v10359_v4 = vcombine.low %v2860_v33, %v2870_v31  ;;  %v10367_v52 = vld [vmem:[#allocation2 + $0x18c] sm:$0xf] }
 0x28d   :  { %v10315_v30 = vpop.permute.xlu1 %3788  ;;  %v4920_v26 = vpop.f32.mrf.mxu1  ;;  %v2888_v16 = vor.u32 %v2887_v48, %v2883_v11 }
 0x28e   :  { %3964 = vrot.lane.b32.xlu0 %v9985_v20, %s7726_s14  ;;  %v5208_v45 = vadd.f32 %v5207_v17, %v4919_v36  ;;  %v4416_v26 = vsel %vm4122_vm15, %v11597_v34, %v10080_v41  ;;  %v4419_v41 = vsel %vm4122_vm15, %v9726_v5, %v10287_v42  ;;  %v2879_v36 = vrot.slane %v2878_v13, 4 }
 0x28f   :  { %3816 = vrot.lane.b32.xlu1 %v9989_v28, %s7725_s13  ;;  %v10339_v28 = vcombine.low %v10196_v18, %v10127_v29  ;;  %v4921_v29 = vpop.f32.mrf.mxu1  ;;  %v5210_v18 = vpop.f32.mrf.mxu0  ;;  %v4500_v58 = vsel %vm4219_vm1, %v4416_v26, %v10192_v62  ;;  %v2899_v62 = vshll.u32 %v10367_v52, 16  ;;  %v2909_v42 = vshrl.u32 %v10235_v57, 16 }
 0x290   :  { %v4077_v23 = vpop.permute.xlu0 %4076  ;;  %7453 = vmatmul.mubr.msk.bf16.gmra.mxu0 %vm4122_vm15, %v6730_v1  ;;  %v4922_v24 = vadd.f32 %v10324_v38, %v4921_v29  ;;  %v2891_v1 = vshll.u32 %v10118_v8, 16  ;;  %v4243_v8 = vsel %vm4219_vm1, %v4158_v60, %v10114_v21  ;;  %v5462_v33 = vmax.f32 %v5208_v45, 0.0 }
 0x291   :  { %v10334_v10 = vpop.permute.xlu1 %3864  ;;  %v4923_v6 = vpop.f32.mrf.mxu1  ;;  %v2889_v21 = vrot.slane %v2888_v16, 4  ;;  %v4319_v60 = vsel %vm4284_vm2, %v4243_v8, %v10000_v50  ;;  %v4502_v13 = vsel %vm4219_vm1, %v4419_v41, %v10120_v51  ;;  %v10399_v34 = vcombine.low %v10292_v46, %v10116_v37 }
 0x292   :  { %4036 = vrot.lane.b32.xlu0 %v10339_v28, %s7725_s13  ;;  %v5211_v17 = vadd.f32 %v5210_v18, %v4922_v24  ;;  %v2893_v29 = vrot.slane %v2891_v1, 5  ;;  %v2896_v18 = vshrl.u32 %v10367_v52, 16  ;;  %v2905_v24 = vshll.u32 %v10235_v57, 16 }
 0x293   :  { %3888 = vrot.lane.b32.xlu1 %v10251_v0, %s7727_s15  ;;  %v4578_v45 = vsel %vm4284_vm2, %v4502_v13, %v4077_v23  ;;  %v2901_v16 = vrot.slane %v2899_v62, 5  ;;  %v2884_v50 = vsel %vm7948_vm11, %v2879_v36, %v2883_v11 }
 0x294   :  { %v10357_v12 = vpop.permute.xlu0 %4008  ;;  %v5463_v31 = vmax.f32 %v5211_v17, 0.0  ;;  %v2898_v26 = vrot.slane %v2896_v18, 4  ;;  %v2894_v51 = vsel %vm7948_vm11, %v2889_v21, %v2893_v29  ;;  %v2907_v23 = vrot.slane %v2905_v24, 5  ;;  %v11599_v18 = vld [vmem:[#allocation21_spill] sm:$0xff] }
 0x295   :  { %v10354_v63 = vpop.permute.xlu1 %3630  ;;  %v2911_v17 = vrot.slane %v2909_v42, 4  ;;  %v10414_v41 = vcombine.low %v2884_v50, %v2894_v51  ;;  %v3276_v42 = vshll.u32 %v10217_v27, 16 }
 0x296   :  { %4106 = vrot.lane.b32.xlu0 %v10359_v4, %s7727_s15  ;;  %v5526_v5 = vpack.c.bf16 %v5463_v31, %v5462_v33  ;;  %v2902_v33 = vor.u32 %v2901_v16, %v2898_v26  ;;  %v2915_v31 = vshll.u32 %v10237_v3, 16  ;;  %v10446_v26 = vcombine.low %v10367_v52, %v10235_v57 }
 0x297   :  { %3658 = vrot.lane.b32.xlu1 %v10289_v25, %s7726_s14  ;;  %v2912_v36 = vor.u32 %v2911_v17, %v2907_v23  ;;  %v3278_v52 = vrot.slane %v3276_v42, 5 }
 0x298   :  { %v4075_v48 = vpop.permute.xlu0 %4074  ;;  %7460 = vmatprep.mubr.msk.bf16.mxu0 %vm4122_vm15, %v5526_v5  ;;  %v2903_v24 = vrot.slane %v2902_v33, 4  ;;  %v2917_v5 = vrot.slane %v2915_v31, 5  ;;  %v10474_v31 = vld [vmem:[#allocation2 + $0x1a4] sm:$0xf] }
 0x299   :  { %v10378_v56 = vpop.permute.xlu1 %3862  ;;  %v4575_v6 = vsel %vm4284_vm2, %v4500_v58, %v4075_v48  ;;  %v11598_v58 = vld [vmem:[#allocation50_spill] sm:$0xff]  ;;  %v10421_v48 = vld [vmem:[#allocation2 + $0x198] sm:$0xf]  ;;  %v2913_v21 = vrot.slane %v2912_v36, 4 }
 0x29a   :  { %3966 = vrot.lane.b32.xlu0 %v10190_v14, %s7726_s14  ;;  %5004 = vmatprep.mubr.bf16.mxu1 %v4575_v6  ;;  %v4161_v8 = vsel %vm4122_vm15, %v11598_v58, %v10188_v19  ;;  %v3267_v6 = vshrl.u32 %v10421_v48, 16  ;;  %v3270_v3 = vshll.u32 %v10421_v48, 16  ;;  %v2908_v17 = vsel %vm7948_vm11, %v2903_v24, %v2907_v23 }
 0x29b   :  { %3818 = vrot.lane.b32.xlu1 %v9985_v20, %s7725_s13  ;;  %5005 = vmatmul.mubr.bf16.gmra.mxu1 %v4319_v60  ;;  %v4245_v11 = vsel %vm4219_vm1, %v4161_v8, %v10095_v49  ;;  %v11600_v60 = vld [vmem:[#allocation75_spill] sm:$0xff]  ;;  %v2918_v57 = vsel %vm7948_vm11, %v2913_v21, %v2917_v5  ;;  %v3335_v21 = vshrl.u32 %v10474_v31, 16  ;;  %v3348_v5 = vshrl.u32 %v9917_v2, 16 }
 0x29c   :  { %v10395_v20 = vpop.permute.xlu0 %3940  ;;  %5012 = vmatprep.mubr.bf16.mxu1 %v4578_v45  ;;  %v4322_v19 = vsel %vm4284_vm2, %v4245_v11, %v10222_v47  ;;  %v3280_v47 = vshrl.u32 %v10217_v27, 16  ;;  %v4422_v13 = vsel %vm4122_vm15, %v11600_v60, %v10259_v40  ;;  %v11601_v45 = vld [vmem:[#allocation77_spill] sm:$0xff]  ;;  %v3269_v40 = vrot.slane %v3267_v6, 4 }
 0x29d   :  { %v3629_v1 = vpop.permute.xlu1 %3628  ;;  %v4504_v50 = vsel %vm4219_vm1, %v4422_v13, %v10357_v12  ;;  %v3272_v58 = vrot.slane %v3270_v3, 5  ;;  %v10472_v36 = vcombine.low %v2908_v17, %v2918_v57  ;;  %v3344_v6 = vshll.u32 %v9917_v2, 16 }
 0x29e   :  { %4038 = vrot.lane.b32.xlu0 %v10399_v34, %s7725_s13  ;;  %v4164_v49 = vsel %vm4122_vm15, %v11599_v18, %v3629_v1  ;;  %v6720_v57 = vcombine.low %v10421_v48, %v10217_v27 }
 0x29f   :  { %3890 = vrot.lane.b32.xlu1 %v10339_v28, %s7727_s15  ;;  %v4247_v16 = vsel %vm4219_vm1, %v4164_v49, %v10315_v30  ;;  %v3286_v49 = vshll.u32 %v10225_v22, 16 }
 0x2a0   :  { %v3939_v46 = vpop.permute.xlu0 %3938  ;;  %v4325_v30 = vsel %vm4284_vm2, %v4247_v16, %v10143_v54  ;;  %v3273_v54 = vor.u32 %v3272_v58, %v3269_v40  ;;  %v11605_v16 = vld [vmem:[#allocation28_spill] sm:$0xff]  ;;  %v3350_v40 = vrot.slane %v3348_v5, 4 }
 0x2a1   :  { %v10412_v37 = vpop.permute.xlu1 %3792  ;;  %v4425_v1 = vsel %vm4122_vm15, %v11601_v45, %v3939_v46  ;;  %v3282_v46 = vrot.slane %v3280_v47, 4  ;;  %v11604_v47 = vld [vmem:[#allocation25_spill] sm:$0xff]  ;;  %v3288_v45 = vrot.slane %v3286_v49, 5  ;;  %v7687_v49 = vld [vmem:[#allocation2 + $0xdc] sm:$0xf] }
 0x2a2   :  { %4108 = vrot.lane.b32.xlu0 %v10414_v41, %s7727_s15  ;;  %v4506_v12 = vsel %vm4219_vm1, %v4425_v1, %v10319_v39  ;;  %v3274_v60 = vrot.slane %v3273_v54, 4  ;;  %v3346_v1 = vrot.slane %v3344_v6, 5  ;;  %v3354_v54 = vshll.u32 %v10183_v35, 16  ;;  %v11609_v6 = vld [vmem:[#allocation32_spill] sm:$0xff]  ;;  %v11610_v35 = vld [vmem:[#allocation51_spill] sm:$0xff] }
 0x2a3   :  { %3660 = vrot.lane.b32.xlu1 %v10359_v4, %s7726_s14  ;;  %5013 = vmatmul.mubr.bf16.gmra.mxu1 %v4322_v19  ;;  %v11602_v19 = vld [vmem:[#allocation15_spill] sm:$0xff]  ;;  %v3283_v39 = vor.u32 %v3282_v46, %v3278_v52 }
 0x2a4   :  { %v4081_v62 = vpop.permute.xlu0 %4080  ;;  %v4428_v18 = vsel %vm4122_vm15, %v11602_v19, %v10395_v20  ;;  %v3338_v20 = vshll.u32 %v10474_v31, 16 }
 0x2a5   :  { %v10427_v29 = vpop.permute.xlu1 %3642  ;;  %v4584_v23 = vsel %vm4284_vm2, %v4506_v12, %v4081_v62  ;;  %v11603_v62 = vld [vmem:[#allocation60_spill] sm:$0xff]  ;;  %v4508_v22 = vsel %vm4219_vm1, %v4428_v18, %v11604_v47  ;;  %v3284_v13 = vrot.slane %v3283_v39, 4  ;;  %v3351_v18 = vor.u32 %v3350_v40, %v3346_v1 }
 0x2a6   :  { %3968 = vrot.lane.b32.xlu0 %v10178_v15, %s7726_s14  ;;  %v4167_v24 = vsel %vm4122_vm15, %v11603_v62, %v10354_v63  ;;  %v3340_v17 = vrot.slane %v3338_v20, 5  ;;  %v11608_v12 = vld [vmem:[#allocation24_spill] sm:$0xff] }
 0x2a7   :  { %3820 = vrot.lane.b32.xlu1 %v10190_v14, %s7725_s13  ;;  %v4249_v63 = vsel %vm4219_vm1, %v4167_v24, %v10283_v44  ;;  %v3337_v44 = vrot.slane %v3335_v21, 4  ;;  %v3289_v46 = vsel %vm7948_vm11, %v3284_v13, %v3288_v45  ;;  %v7688_v62 = vld [vmem:[#allocation2 + $0xd8] sm:$0xf]  ;;  %v3352_v47 = vrot.slane %v3351_v18, 4  ;;  %v7689_v13 = vld [vmem:[#allocation2 + $0x1a8] sm:$0xf] }
 0x2a8   :  { %v4079_v51 = vpop.permute.xlu0 %4078  ;;  %v4328_v2 = vsel %vm4284_vm2, %v4249_v63, %v10378_v56  ;;  %v3279_v56 = vsel %vm7948_vm11, %v3274_v60, %v3278_v52  ;;  %v6639_v24 = vcombine.low %v7688_v62, %v7687_v49  ;;  %v11611_v60 = vld [vmem:[#allocation31_spill] sm:$0xff]  ;;  %v6726_v45 = vcombine.low %v10474_v31, %v7689_v13  ;;  %v11615_v31 = vld [vmem:[#allocation20_spill] sm:$0xff] }
 0x2a9   :  { %v10448_v14 = vpop.permute.xlu1 %3802  ;;  %v4581_v8 = vsel %vm4284_vm2, %v4504_v50, %v4079_v51  ;;  %v4587_v50 = vsel %vm4284_vm2, %v4508_v22, %v11605_v16  ;;  %v3341_v48 = vor.u32 %v3340_v17, %v3337_v44  ;;  %v10530_v52 = vcombine.low %v3279_v56, %v3289_v46  ;;  %v11613_v17 = vld [vmem:[#allocation14_spill] sm:$0xff]  ;;  %v11617_v46 = vld [vmem:[#allocation13_spill] sm:$0xff]  ;;  %v11621_v49 = vld [vmem:[#allocation35_spill] sm:$0xff] }
 0x2aa   :  { %4040 = vrot.lane.b32.xlu0 %v10446_v26, %s7725_s13  ;;  %5020 = vmatprep.mubr.bf16.mxu1 %v4581_v8  ;;  %v3356_v22 = vrot.slane %v3354_v54, 5  ;;  %v11620_v54 = vld [vmem:[#allocation61_spill] sm:$0xff] }
 0x2ab   :  { %3892 = vrot.lane.b32.xlu1 %v10399_v34, %s7727_s15  ;;  %5021 = vmatmul.mubr.bf16.gmra.mxu1 %v4325_v30  ;;  %v11607_v30 = vld [vmem:[#allocation40_spill] sm:$0xff]  ;;  %v3342_v5 = vrot.slane %v3341_v48, 4  ;;  %v4437_v62 = vsel %vm4122_vm15, %v11621_v49, %v11620_v54 }
 0x2ac   :  { %v10470_v11 = vpop.permute.xlu0 %3950  ;;  %5028 = vmatprep.mubr.bf16.mxu1 %v4584_v23  ;;  %v4431_v23 = vsel %vm4122_vm15, %v11608_v12, %v11607_v30 }
 0x2ad   :  { %v10468_v33 = vpop.permute.xlu1 %3874  ;;  %v3347_v16 = vsel %vm7948_vm11, %v3342_v5, %v3346_v1  ;;  %v11616_v1 = vld [vmem:[#allocation41_spill] sm:$0xff] }
 0x2ae   :  { %4110 = vrot.lane.b32.xlu0 %v10472_v36, %s7727_s15 }
 0x2af   :  { %3662 = vrot.lane.b32.xlu1 %v10414_v41, %s7726_s14 }
 0x2b0   :  { %v10491_v42 = vpop.permute.xlu0 %4022 }
 0x2b1   :  { %v3633_v3 = vpop.permute.xlu1 %3632 }
 0x2b2   :  { %3970 = vrot.lane.b32.xlu0 %v10285_v9, %s7726_s14 }
 0x2b3   :  { %3822 = vrot.lane.b32.xlu1 %v10178_v15, %s7725_s13  ;;  %5029 = vmatmul.mubr.bf16.gmra.mxu1 %v4328_v2  ;;  %v11606_v15 = vld [vmem:[#allocation8_spill] sm:$0xff] }
 0x2b4   :  { %v4170_v58 = vsel %vm4122_vm15, %v11606_v15, %v3633_v3  ;;  %v10509_v8 = vpop.permute.xlu0 %4092  ;;  %5036 = vmatprep.mubr.bf16.mxu1 %v4587_v50  ;;  %v4510_v3 = vsel %vm4219_vm1, %v4431_v23, %v11609_v6  ;;  %v3357_v50 = vsel %vm7948_vm11, %v3352_v47, %v3356_v22  ;;  %v11614_v15 = vld [vmem:[#allocation27_spill] sm:$0xff]  ;;  %v11618_v23 = vld [vmem:[#allocation65_spill] sm:$0xff]  ;;  %v11624_v47 = vld [vmem:[#allocation44_spill] sm:$0xff] }
 0x2b5   :  { %v10505_v51 = vpop.permute.xlu1 %3644  ;;  %v4251_v27 = vsel %vm4219_vm1, %v4170_v58, %v10412_v37  ;;  %v4590_v21 = vsel %vm4284_vm2, %v4510_v3, %v11610_v35  ;;  %v6728_v56 = vcombine.low %v3347_v16, %v3357_v50  ;;  %v4514_v22 = vsel %vm4219_vm1, %v4437_v62, %v11624_v47  ;;  %v11626_v50 = vld [vmem:[#allocation17_spill] sm:$0xff]  ;;  %v11634_v62 = vld [vmem:[#allocation76_spill] sm:$0xff] }
 0x2b6   :  { %4042 = vrot.lane.b32.xlu0 %v6720_v57, %s7725_s13  ;;  %v4331_v37 = vsel %vm4284_vm2, %v4251_v27, %v10334_v10  ;;  %v4173_v10 = vsel %vm4122_vm15, %v6639_v24, %v11611_v60  ;;  %v11619_v27 = vld [vmem:[#allocation10_spill] sm:$0xff]  ;;  %v11625_v60 = vld [vmem:[#allocation71_spill] sm:$0xff] }
 0x2b7   :  { %3894 = vrot.lane.b32.xlu1 %v10446_v26, %s7727_s15  ;;  %v4176_v48 = vsel %vm4122_vm15, %v11619_v27, %v11618_v23  ;;  %v11632_v23 = vld [vmem:[#allocation57_spill] sm:$0xff] }
 0x2b8   :  { %v10528_v39 = vpop.permute.xlu0 %3952 }
 0x2b9   :  { %v10523_v19 = vpop.permute.xlu1 %3804 }
 0x2ba   :  { %4112 = vrot.lane.b32.xlu0 %v10530_v52, %s7727_s15 }
 0x2bb   :  { %3664 = vrot.lane.b32.xlu1 %v10472_v36, %s7726_s14  ;;  %5037 = vmatmul.mubr.bf16.gmra.mxu1 %v4331_v37  ;;  %v11622_v37 = vld [vmem:[#allocation3_spill] sm:$0xff] }
 0x2bc   :  { %v10544_v63 = vpop.permute.xlu0 %4024  ;;  %5044 = vmatprep.mubr.bf16.mxu1 %v4590_v21  ;;  %v4255_v6 = vsel %vm4219_vm1, %v4176_v48, %v11622_v37  ;;  %v11623_v21 = vld [vmem:[#allocation37_spill] sm:$0xff]  ;;  %v11635_v37 = vld [vmem:[#allocation19_spill] sm:$0xff] }
 0x2bd   :  { %v10542_v20 = vpop.permute.xlu1 %3876  ;;  %v4337_v5 = vsel %vm4284_vm2, %v4255_v6, %v11623_v21  ;;  %v11633_v48 = vld [vmem:[#allocation49_spill] sm:$0xff]  ;;  %v4182_v6 = vsel %vm4122_vm15, %v11635_v37, %v11634_v62  ;;  %v11639_v62 = vld [vmem:[#allocation12_spill] sm:$0xff] }
 0x2be   :  { %3972 = vrot.lane.b32.xlu0 %v10279_v55, %s7726_s14  ;;  %v4253_v55 = vsel %vm4219_vm1, %v4173_v10, %v11614_v15  ;;  %v4596_v10 = vsel %vm4284_vm2, %v4514_v22, %v11625_v60  ;;  %v11636_v22 = vld [vmem:[#allocation72_spill] sm:$0xff]  ;;  %v4185_v37 = vsel %vm4122_vm15, %v11639_v62, %v10427_v29 }
 0x2bf   :  { %3824 = vrot.lane.b32.xlu1 %v10285_v9, %s7725_s13  ;;  %v11612_v9 = vld [vmem:[#allocation36_spill] sm:$0xff]  ;;  %v4334_v43 = vsel %vm4284_vm2, %v4253_v55, %v11616_v1  ;;  %v4259_v60 = vsel %vm4219_vm1, %v4182_v6, %v11636_v22 }
 0x2c0   :  { %v10559_v44 = vpop.permute.xlu0 %4094  ;;  %v4434_v40 = vsel %vm4122_vm15, %v11613_v17, %v11612_v9  ;;  %v11627_v9 = vld [vmem:[#allocation7_spill] sm:$0xff] }
 0x2c1   :  { %v10553_v2 = vpop.permute.xlu1 %3646  ;;  %v4512_v58 = vsel %vm4219_vm1, %v4434_v40, %v11615_v31  ;;  %v4179_v17 = vsel %vm4122_vm15, %v11627_v9, %v11626_v50  ;;  %v11628_v31 = vld [vmem:[#allocation55_spill] sm:$0xff] }
 0x2c2   :  { %4044 = vrot.lane.b32.xlu0 %v6726_v45, %s7725_s13  ;;  %v4593_v30 = vsel %vm4284_vm2, %v4512_v58, %v11617_v46  ;;  %v11629_v58 = vld [vmem:[#allocation26_spill] sm:$0xff]  ;;  %v11631_v46 = vld [vmem:[#allocation9_spill] sm:$0xff]  ;;  %v11637_v9 = vld [vmem:[#allocation43_spill] sm:$0xff] }
 0x2c3   :  { %3896 = vrot.lane.b32.xlu1 %v6720_v57, %s7727_s15  ;;  %5045 = vmatmul.mubr.bf16.gmra.mxu1 %v4334_v43  ;;  %v10579_v57 = vpop.f32.mrf.mxu0  ;;  %v4440_v1 = vsel %vm4122_vm15, %v11629_v58, %v11628_v31  ;;  %v11630_v43 = vld [vmem:[#allocation45_spill] sm:$0xff]  ;;  %v11638_v58 = vld [vmem:[#allocation52_spill] sm:$0xff] }
 0x2c4   :  { %v10581_v18 = vpop.permute.xlu0 %3954  ;;  %5052 = vmatprep.mubr.bf16.mxu1 %v4593_v30  ;;  %v4516_v30 = vsel %vm4219_vm1, %v4440_v1, %v11631_v46  ;;  %v4343_v1 = vsel %vm4284_vm2, %v4259_v60, %v11638_v58  ;;  %v4261_v60 = vsel %vm4219_vm1, %v4185_v37, %v10448_v14 }
 0x2c5   :  { %v10574_v12 = vpop.permute.xlu1 %3806  ;;  %v10591_v3 = vpop.f32.mrf.mxu0  ;;  %v4599_v54 = vsel %vm4284_vm2, %v4516_v30, %v11633_v48  ;;  %v4346_v58 = vsel %vm4284_vm2, %v4261_v60, %v10468_v33 }
 0x2c6   :  { %4114 = vrot.lane.b32.xlu0 %v6728_v56, %s7727_s15  ;;  %v4257_v56 = vsel %vm4219_vm1, %v4179_v17, %v11630_v43  ;;  %v4443_v17 = vsel %vm4122_vm15, %v11637_v9, %v10470_v11  ;;  %v11640_v9 = vld [vmem:[#allocation11_spill] sm:$0xff] }
 0x2c7   :  { %v10603_v45 = vpop.f32.mrf.mxu0  ;;  %v4340_v27 = vsel %vm4284_vm2, %v4257_v56, %v11632_v23  ;;  %v4518_v31 = vsel %vm4219_vm1, %v4443_v17, %v10491_v42  ;;  %v4446_v17 = vsel %vm4122_vm15, %v11640_v9, %v10528_v39 }
 0x2c8   :  { %v10593_v35 = vpop.permute.xlu0 %4026  ;;  %v4602_v56 = vsel %vm4284_vm2, %v4518_v31, %v10509_v8  ;;  %v4520_v29 = vsel %vm4219_vm1, %v4446_v17, %v10544_v63 }
 0x2c9   :  { %v10587_v24 = vpop.permute.xlu1 %3878  ;;  %v10612_v15 = vpop.f32.mrf.mxu0 }
 0x2cb   :  { %5053 = vmatmul.mubr.bf16.gmra.mxu1 %v4337_v5  ;;  %v10632_v21 = vpop.f32.mrf.mxu0 }
 0x2cc   :  { %v10605_v16 = vpop.permute.xlu0 %4096  ;;  %5060 = vmatprep.mubr.bf16.mxu1 %v4596_v10 }
 0x2cd   :  { %v10601_v13 = vpop.permute.xlu1 %3648  ;;  %v10640_v10 = vpop.f32.mrf.mxu0 }
 0x2cf   :  { %v10655_v30 = vpop.f32.mrf.mxu0 }
 0x2d0   :  { %v10614_v55 = vpop.permute.xlu0 %3956 }
 0x2d1   :  { %v10610_v40 = vpop.permute.xlu1 %3808 }
 0x2d3   :  { %5061 = vmatmul.mubr.bf16.gmra.mxu1 %v4340_v27 }
 0x2d4   :  { %v10634_v5 = vpop.permute.xlu0 %4028  ;;  %5068 = vmatprep.mubr.bf16.mxu1 %v4599_v54  ;;  %v10662_v54 = vpop.f32.mrf.mxu0 }
 0x2d5   :  { %v10627_v49 = vpop.permute.xlu1 %3880 }
 0x2d6   :  { %v10685_v14 = vpop.f32.mrf.mxu0 }
 0x2d8   :  { %v10642_v50 = vpop.permute.xlu0 %4098 }
 0x2d9   :  { %v10636_v47 = vpop.permute.xlu1 %3650 }
 0x2db   :  { %v4926_v43 = vpop.f32.mrf.mxu1  ;;  %5069 = vmatmul.mubr.bf16.gmra.mxu1 %v4343_v1 }
 0x2dc   :  { %v4927_v23 = vadd.f32 %v10324_v38, %v4926_v43  ;;  %v10658_v27 = vpop.permute.xlu0 %3958  ;;  %5076 = vmatprep.mubr.bf16.mxu1 %v4602_v56  ;;  %v4605_v43 = vsel %vm4284_vm2, %v4520_v29, %v10559_v44 }
 0x2dd   :  { %v10653_v46 = vpop.permute.xlu1 %3810  ;;  %v4928_v11 = vpop.f32.mrf.mxu1 }
 0x2de   :  { %v5216_v8 = vadd.f32 %v10281_v7, %v4927_v23 }
 0x2df   :  { %v4929_v48 = vpop.f32.mrf.mxu1 }
 0x2e0   :  { %v4930_v6 = vadd.f32 %v10324_v38, %v4929_v48  ;;  %v10669_v22 = vpop.permute.xlu0 %4030  ;;  %v5464_v23 = vmax.f32 %v5216_v8, 0.0 }
 0x2e1   :  { %v10660_v42 = vpop.permute.xlu1 %3882  ;;  %v4931_v31 = vpop.f32.mrf.mxu1 }
 0x2e2   :  { %v5219_v7 = vadd.f32 %v10332_v61, %v4930_v6  ;;  %v10690_v61 = vpop.f32.mrf.mxu0  ;;  %v11641_v6 = vld [vmem:[#allocation30_spill] sm:$0xff]  ;;  %v11642_v31 = vld [vmem:[#allocation67_spill] sm:$0xff] }
 0x2e3   :  { %v4934_v1 = vpop.f32.mrf.mxu1  ;;  %5077 = vmatmul.mubr.bf16.gmra.mxu1 %v4346_v58  ;;  %v4188_v44 = vsel %vm4122_vm15, %v11641_v6, %v10505_v51  ;;  %v4449_v58 = vsel %vm4122_vm15, %v11642_v31, %v10581_v18 }
 0x2e4   :  { %v5465_v39 = vmax.f32 %v5219_v7, 0.0  ;;  %v4935_v11 = vadd.f32 %v10324_v38, %v4934_v1  ;;  %v4101_v48 = vpop.permute.xlu0 %4100  ;;  %5084 = vmatprep.mubr.bf16.mxu1 %v4605_v43  ;;  %v4263_v17 = vsel %vm4219_vm1, %v4188_v44, %v10523_v19  ;;  %v4522_v51 = vsel %vm4219_vm1, %v4449_v58, %v10593_v35  ;;  %v10714_v19 = vpop.f32.mrf.mxu0  ;;  %v11643_v35 = vld [vmem:[#allocation64_spill] sm:$0xff] }
 0x2e5   :  { %v10683_v56 = vpop.permute.xlu1 %3652  ;;  %v4936_v33 = vpop.f32.mrf.mxu1  ;;  %v4349_v7 = vsel %vm4284_vm2, %v4263_v17, %v10542_v20  ;;  %v4608_v1 = vsel %vm4284_vm2, %v4522_v51, %v10605_v16  ;;  %v11646_v51 = vld [vmem:[#allocation74_spill] sm:$0xff] }
 0x2e6   :  { %v5527_v62 = vpack.c.bf16 %v5465_v39, %v5464_v23  ;;  %v5224_v60 = vadd.f32 %v10591_v3, %v4935_v11  ;;  %v10718_v20 = vpop.f32.mrf.mxu0 }
 0x2e7   :  { %v4937_v63 = vpop.f32.mrf.mxu1 }
 0x2e8   :  { %v4938_v8 = vadd.f32 %v10324_v38, %v4937_v63  ;;  %v10697_v9 = vpop.permute.xlu0 %3960  ;;  %7461 = vmatmul.mubr.msk.bf16.vlgmr.msra.gmra.mxu0 %vm4122_vm15, %v5527_v62  ;;  %v5466_v23 = vmax.f32 %v5224_v60, 0.0  ;;  %v11644_v63 = vld [vmem:[#allocation73_spill] sm:$0xff]  ;;  %v10737_v17 = vpop.f32.mrf.mxu0 }
 0x2e9   :  { %v10688_v37 = vpop.permute.xlu1 %3812  ;;  %v4939_v29 = vpop.f32.mrf.mxu1  ;;  %v4452_v6 = vsel %vm4122_vm15, %v11644_v63, %v10614_v55 }
 0x2ea   :  { %v5227_v3 = vadd.f32 %v10612_v15, %v4938_v8  ;;  %v4191_v15 = vsel %vm4122_vm15, %v11643_v35, %v10553_v2  ;;  %v4524_v60 = vsel %vm4219_vm1, %v4452_v6, %v10634_v5  ;;  %v10741_v55 = vpop.f32.mrf.mxu0 }
 0x2eb   :  { %5085 = vmatmul.mubr.bf16.gmra.mxu1 %v4349_v7  ;;  %v4265_v16 = vsel %vm4219_vm1, %v4191_v15, %v10574_v12  ;;  %v4611_v2 = vsel %vm4284_vm2, %v4524_v60, %v10642_v50 }
 0x2ec   :  { %v5467_v39 = vmax.f32 %v5227_v3, 0.0  ;;  %v4033_v18 = vpop.permute.xlu0 %4032  ;;  %5092 = vmatprep.mubr.bf16.mxu1 %v4608_v1  ;;  %v4352_v44 = vsel %vm4284_vm2, %v4265_v16, %v10587_v24  ;;  %v11645_v24 = vld [vmem:[#allocation33_spill] sm:$0xff]  ;;  %v4455_v3 = vsel %vm4122_vm15, %v11646_v51, %v10658_v27  ;;  %v10759_v15 = vpop.f32.mrf.mxu0 }
 0x2ed   :  { %v10712_v43 = vpop.permute.xlu1 %3884  ;;  %v4194_v29 = vsel %vm4122_vm15, %v11645_v24, %v10601_v13 }
 0x2ee   :  { %v5528_v11 = vpack.c.bf16 %v5467_v39, %v5466_v23  ;;  %v4267_v50 = vsel %vm4219_vm1, %v4194_v29, %v10610_v40  ;;  %v4526_v39 = vsel %vm4219_vm1, %v4455_v3, %v10669_v22  ;;  %v10766_v22 = vpop.f32.mrf.mxu0 }
 0x2ef   :  { %v4355_v23 = vsel %vm4284_vm2, %v4267_v50, %v10627_v49  ;;  %v4614_v13 = vsel %vm4284_vm2, %v4526_v39, %v4101_v48  ;;  %v11647_v48 = vld [vmem:[#allocation34_spill] sm:$0xff] }
 0x2f0   :  { %v4103_v62 = vpop.permute.xlu0 %4102  ;;  %7464 = vmatprep.mubr.msk.bf16.mxu0 %vm4122_vm15, %v5528_v11  ;;  %v4197_v60 = vsel %vm4122_vm15, %v11647_v48, %v10636_v47  ;;  %v10781_v39 = vpop.f32.mrf.mxu0 }
 0x2f1   :  { %v10716_v33 = vpop.permute.xlu1 %3654  ;;  %v4269_v29 = vsel %vm4219_vm1, %v4197_v60, %v10653_v46 }
 0x2f2   :  { %v4358_v50 = vsel %vm4284_vm2, %v4269_v29, %v10660_v42 }
 0x2f3   :  { %5093 = vmatmul.mubr.bf16.gmra.mxu1 %v4352_v44 }
 0x2f4   :  { %v3963_v31 = vpop.permute.xlu0 %3962  ;;  %5100 = vmatprep.mubr.bf16.mxu1 %v4611_v2 }
 0x2f5   :  { %v10735_v8 = vpop.permute.xlu1 %3814 }
 0x2f7   :  { %v4942_v12 = vpop.f32.mrf.mxu1 }
 0x2f8   :  { %v4943_v5 = vadd.f32 %v10324_v38, %v4942_v12  ;;  %v4035_v7 = vpop.permute.xlu0 %4034 }
 0x2f9   :  { %v10739_v58 = vpop.permute.xlu1 %3886  ;;  %v4944_v1 = vpop.f32.mrf.mxu1 }
 0x2fa   :  { %v5232_v40 = vadd.f32 %v10579_v57, %v4943_v5 }
 0x2fb   :  { %v4945_v11 = vpop.f32.mrf.mxu1  ;;  %5101 = vmatmul.mubr.bf16.gmra.mxu1 %v4355_v23 }
 0x2fc   :  { %v4946_v16 = vadd.f32 %v10324_v38, %v4945_v11  ;;  %v4105_v27 = vpop.permute.xlu0 %4104  ;;  %5108 = vmatprep.mubr.bf16.mxu1 %v4614_v13  ;;  %v5468_v2 = vmax.f32 %v5232_v40, 0.0 }
 0x2fd   :  { %v10757_v35 = vpop.permute.xlu1 %3656  ;;  %v4947_v63 = vpop.f32.mrf.mxu1 }
 0x2fe   :  { %v5235_v49 = vadd.f32 %v10603_v45, %v4946_v16  ;;  %v4458_v45 = vsel %vm4122_vm15, %v9686_v32, %v10697_v9 }
 0x2ff   :  { %v4950_v6 = vpop.f32.mrf.mxu1  ;;  %v4528_v51 = vsel %vm4219_vm1, %v4458_v45, %v4033_v18  ;;  %v10789_v18 = vpop.f32.mrf.mxu0 }
 0x300   :  { %v5469_v12 = vmax.f32 %v5235_v49, 0.0  ;;  %v4951_v57 = vadd.f32 %v10324_v38, %v4950_v6  ;;  %v3965_v24 = vpop.permute.xlu0 %3964  ;;  %v4617_v1 = vsel %vm4284_vm2, %v4528_v51, %v4103_v62  ;;  %v11648_v62 = vld [vmem:[#allocation54_spill] sm:$0xff]  ;;  %v4461_v6 = vsel %vm4122_vm15, %v10194_v59, %v3963_v31  ;;  %v11649_v59 = vld [vmem:[#allocation59_spill] sm:$0xff] }
 0x301   :  { %v10764_v44 = vpop.permute.xlu1 %3816  ;;  %v4952_v5 = vpop.f32.mrf.mxu1  ;;  %v4200_v40 = vsel %vm4122_vm15, %v11648_v62, %v10683_v56  ;;  %v4530_v48 = vsel %vm4219_vm1, %v4461_v6, %v4035_v7 }
 0x302   :  { %v5529_v3 = vpack.c.bf16 %v5469_v12, %v5468_v2  ;;  %v5240_v46 = vadd.f32 %v10640_v10, %v4951_v57  ;;  %v4271_v49 = vsel %vm4219_vm1, %v4200_v40, %v10688_v37  ;;  %v4620_v2 = vsel %vm4284_vm2, %v4530_v48, %v4105_v27  ;;  %v10802_v56 = vpop.f32.mrf.mxu0 }
 0x303   :  { %v4953_v47 = vpop.f32.mrf.mxu1  ;;  %5109 = vmatmul.mubr.bf16.gmra.mxu1 %v4358_v50  ;;  %v4464_v27 = vsel %vm4122_vm15, %v10289_v25, %v3965_v24 }
 0x304   :  { %v4954_v11 = vadd.f32 %v10324_v38, %v4953_v47  ;;  %v4037_v13 = vpop.permute.xlu0 %4036  ;;  %5116 = vmatprep.mubr.bf16.mxu1 %v4617_v1  ;;  %7465 = vmatmul.mubr.msk.bf16.gmra.mxu0 %vm4122_vm15, %v5529_v3  ;;  %v5470_v16 = vmax.f32 %v5240_v46, 0.0  ;;  %v10805_v29 = vpop.f32.mrf.mxu0 }
 0x305   :  { %v3889_v23 = vpop.permute.xlu1 %3888  ;;  %v4955_v32 = vpop.f32.mrf.mxu1  ;;  %v4532_v5 = vsel %vm4219_vm1, %v4464_v27, %v4037_v13 }
 0x306   :  { %v5243_v42 = vadd.f32 %v10662_v54, %v4954_v11  ;;  %v4361_v54 = vsel %vm4284_vm2, %v4271_v49, %v10712_v43  ;;  %v4203_v43 = vsel %vm4122_vm15, %v11649_v59, %v10716_v33  ;;  %v10818_v47 = vpop.f32.mrf.mxu0 }
 0x307   :  { %v4273_v7 = vsel %vm4219_vm1, %v4203_v43, %v10735_v8 }
 0x308   :  { %v5471_v63 = vmax.f32 %v5243_v42, 0.0  ;;  %v4107_v10 = vpop.permute.xlu0 %4106  ;;  %v4364_v45 = vsel %vm4284_vm2, %v4273_v7, %v10739_v58  ;;  %v10821_v25 = vpop.f32.mrf.mxu0  ;;  %v4206_v58 = vsel %vm4122_vm15, %v10151_v53, %v10757_v35 }
 0x309   :  { %v10787_v9 = vpop.permute.xlu1 %3658  ;;  %v4623_v51 = vsel %vm4284_vm2, %v4532_v5, %v4107_v10  ;;  %v4275_v42 = vsel %vm4219_vm1, %v4206_v58, %v10764_v44 }
 0x30a   :  { %v5530_v60 = vpack.c.bf16 %v5471_v63, %v5470_v16  ;;  %v4367_v16 = vsel %vm4284_vm2, %v4275_v42, %v3889_v23  ;;  %v10836_v35 = vpop.f32.mrf.mxu0 }
 0x30b   :  { %5117 = vmatmul.mubr.bf16.gmra.mxu1 %v4361_v54 }
 0x30c   :  { %v3967_v57 = vpop.permute.xlu0 %3966  ;;  %5124 = vmatprep.mubr.bf16.mxu1 %v4620_v2  ;;  %7468 = vmatprep.mubr.msk.bf16.mxu0 %vm4122_vm15, %v5530_v60 }
 0x30d   :  { %v3819_v12 = vpop.permute.xlu1 %3818  ;;  %v4467_v62 = vsel %vm4122_vm15, %v10359_v4, %v3967_v57  ;;  %v10839_v57 = vpop.f32.mrf.mxu0 }
 0x310   :  { %v4039_v31 = vpop.permute.xlu0 %4038 }
 0x311   :  { %v3891_v37 = vpop.permute.xlu1 %3890  ;;  %v4534_v63 = vsel %vm4219_vm1, %v4467_v62, %v4039_v31 }
 0x313   :  { %v4958_v50 = vpop.f32.mrf.mxu1  ;;  %5125 = vmatmul.mubr.bf16.gmra.mxu1 %v4364_v45 }
 0x314   :  { %v4959_v33 = vadd.f32 %v10324_v38, %v4958_v50  ;;  %v4109_v1 = vpop.permute.xlu0 %4108  ;;  %5132 = vmatprep.mubr.bf16.mxu1 %v4623_v51 }
 0x315   :  { %v3661_v3 = vpop.permute.xlu1 %3660  ;;  %v4960_v8 = vpop.f32.mrf.mxu1  ;;  %v4626_v53 = vsel %vm4284_vm2, %v4534_v63, %v4109_v1 }
 0x316   :  { %v5248_v24 = vadd.f32 %v10632_v21, %v4959_v33 }
 0x317   :  { %v4961_v46 = vpop.f32.mrf.mxu1 }
 0x318   :  { %v4962_v13 = vadd.f32 %v10324_v38, %v4961_v46  ;;  %v3969_v32 = vpop.permute.xlu0 %3968  ;;  %v5472_v6 = vmax.f32 %v5248_v24, 0.0 }
 0x319   :  { %v3821_v11 = vpop.permute.xlu1 %3820  ;;  %v4963_v40 = vpop.f32.mrf.mxu1  ;;  %v4470_v27 = vsel %vm4122_vm15, %v10414_v41, %v3969_v32 }
 0x31a   :  { %v5251_v10 = vadd.f32 %v10655_v30, %v4962_v13  ;;  %v4209_v30 = vsel %vm4122_vm15, %v10251_v0, %v10787_v9  ;;  %v10854_v9 = vpop.f32.mrf.mxu0 }
 0x31b   :  { %v4966_v49 = vpop.f32.mrf.mxu1  ;;  %5133 = vmatmul.mubr.bf16.gmra.mxu1 %v4367_v16  ;;  %v4277_v7 = vsel %vm4219_vm1, %v4209_v30, %v3819_v12 }
 0x31c   :  { %v5473_v54 = vmax.f32 %v5251_v10, 0.0  ;;  %v4967_v44 = vadd.f32 %v10324_v38, %v4966_v49  ;;  %v4041_v48 = vpop.permute.xlu0 %4040  ;;  %5140 = vmatprep.mubr.bf16.mxu1 %v4626_v53  ;;  %v4370_v5 = vsel %vm4284_vm2, %v4277_v7, %v3891_v37  ;;  %v10856_v41 = vpop.f32.mrf.mxu0  ;;  %v4212_v37 = vsel %vm4122_vm15, %v10339_v28, %v3661_v3 }
 0x31d   :  { %v3893_v21 = vpop.permute.xlu1 %3892  ;;  %v4968_v4 = vpop.f32.mrf.mxu1  ;;  %v4536_v50 = vsel %vm4219_vm1, %v4470_v27, %v4041_v48 }
 0x31e   :  { %v5531_v60 = vpack.c.bf16 %v5473_v54, %v5472_v6  ;;  %v5256_v59 = vadd.f32 %v10690_v61, %v4967_v44  ;;  %v10865_v62 = vpop.f32.mrf.mxu0 }
 0x31f   :  { %v4969_v23 = vpop.f32.mrf.mxu1 }
 0x320   :  { %v4970_v43 = vadd.f32 %v10324_v38, %v4969_v23  ;;  %v4111_v31 = vpop.permute.xlu0 %4110  ;;  %7469 = vmatmul.mubr.msk.bf16.gmra.mxu0 %vm4122_vm15, %v5531_v60  ;;  %v5474_v33 = vmax.f32 %v5256_v59, 0.0  ;;  %v10870_v10 = vpop.f32.mrf.mxu0 }
 0x321   :  { %v3663_v2 = vpop.permute.xlu1 %3662  ;;  %v4971_v45 = vpop.f32.mrf.mxu1  ;;  %v4629_v0 = vsel %vm4284_vm2, %v4536_v50, %v4111_v31 }
 0x322   :  { %v5259_v51 = vadd.f32 %v10718_v20, %v4970_v43  ;;  %v4279_v20 = vsel %vm4219_vm1, %v4212_v37, %v3821_v11  ;;  %v10879_v23 = vpop.f32.mrf.mxu0 }
 0x323   :  { %5141 = vmatmul.mubr.bf16.gmra.mxu1 %v4370_v5  ;;  %v4373_v24 = vsel %vm4284_vm2, %v4279_v20, %v3893_v21 }
 0x324   :  { %v5475_v1 = vmax.f32 %v5259_v51, 0.0  ;;  %v3971_v8 = vpop.permute.xlu0 %3970  ;;  %5148 = vmatprep.mubr.bf16.mxu1 %v4629_v0  ;;  %v10884_v45 = vpop.f32.mrf.mxu0 }
 0x325   :  { %v3823_v61 = vpop.permute.xlu1 %3822  ;;  %v4473_v13 = vsel %vm4122_vm15, %v10472_v36, %v3971_v8  ;;  %v4215_v36 = vsel %vm4122_vm15, %v10399_v34, %v3663_v2 }
 0x326   :  { %v5532_v12 = vpack.c.bf16 %v5475_v1, %v5474_v33  ;;  %v4281_v6 = vsel %vm4219_vm1, %v4215_v36, %v3823_v61 }
 0x328   :  { %v4043_v58 = vpop.permute.xlu0 %4042  ;;  %7472 = vmatprep.mubr.msk.bf16.mxu0 %vm4122_vm15, %v5532_v12 }
 0x329   :  { %v3895_v46 = vpop.permute.xlu1 %3894  ;;  %v4538_v40 = vsel %vm4219_vm1, %v4473_v13, %v4043_v58 }
 0x32a   :  { %v4376_v48 = vsel %vm4284_vm2, %v4281_v6, %v3895_v46 }
 0x32b   :  { %v4974_v32 = vpop.f32.mrf.mxu1  ;;  %5149 = vmatmul.mubr.bf16.gmra.mxu1 %v4373_v24 }
 0x32c   :  { %v4975_v16 = vadd.f32 %v10324_v38, %v4974_v32  ;;  %v4113_v28 = vpop.permute.xlu0 %4112 }
 0x32d   :  { %v3665_v42 = vpop.permute.xlu1 %3664  ;;  %v4976_v3 = vpop.f32.mrf.mxu1  ;;  %v4632_v63 = vsel %vm4284_vm2, %v4538_v40, %v4113_v28  ;;  %v10910_v40 = vld [vmem:[%s11344_s4] ss:$0 sm:$0xff] }
 0x32e   :  { %5156 = vmatprep.mubr.bf16.mxu1 %v4632_v63  ;;  %v5264_v49 = vadd.f32 %v10685_v14, %v4975_v16 }
 0x32f   :  { %v4977_v11 = vpop.f32.mrf.mxu1 }
 0x330   :  { %v4978_v53 = vadd.f32 %v10324_v38, %v4977_v11  ;;  %v3973_v21 = vpop.permute.xlu0 %3972  ;;  %v5476_v30 = vmax.f32 %v5264_v49, 0.0 }
 0x331   :  { %v4979_v54 = vpop.f32.mrf.mxu1  ;;  %v3825_v44 = vpop.permute.xlu1 %3824  ;;  %v4476_v31 = vsel %vm4122_vm15, %v10530_v52, %v3973_v21 }
 0x332   :  { %v5267_v4 = vadd.f32 %v10714_v19, %v4978_v53  ;;  %v4218_v19 = vsel %vm4122_vm15, %v10446_v26, %v3665_v42  ;;  %v10896_v26 = vpop.f32.mrf.mxu0 }
 0x333   :  { %v4982_v60 = vpop.f32.mrf.mxu1  ;;  %5157 = vmatmul.mubr.bf16.gmra.mxu1 %v4376_v48  ;;  %v4283_v61 = vsel %vm4219_vm1, %v4218_v19, %v3825_v44 }
 0x334   :  { %v5477_v59 = vmax.f32 %v5267_v4, 0.0  ;;  %v4983_v34 = vadd.f32 %v10324_v38, %v4982_v60  ;;  %v4045_v14 = vpop.permute.xlu0 %4044  ;;  %v10898_v37 = vpop.f32.mrf.mxu0 }
 0x335   :  { %v4984_v2 = vpop.f32.mrf.mxu1  ;;  %v3897_v7 = vpop.permute.xlu1 %3896  ;;  %v4540_v50 = vsel %vm4219_vm1, %v4476_v31, %v4045_v14 }
 0x336   :  { %v5533_v43 = vpack.c.bf16 %v5477_v59, %v5476_v30  ;;  %v5272_v5 = vadd.f32 %v10741_v55, %v4983_v34  ;;  %v4379_v1 = vsel %vm4284_vm2, %v4283_v61, %v3897_v7  ;;  %v10901_v20 = vpop.f32.mrf.mxu0 }
 0x337   :  { %v4985_v27 = vpop.f32.mrf.mxu1 }
 0x338   :  { %v4986_v51 = vadd.f32 %v10324_v38, %v4985_v27  ;;  %v4115_v0 = vpop.permute.xlu0 %4114  ;;  %7473 = vmatmul.mubr.msk.bf16.gmra.mxu0 %vm4122_vm15, %v5533_v43  ;;  %v5478_v55 = vmax.f32 %v5272_v5, 0.0  ;;  %v10904_v42 = vpop.f32.mrf.mxu0 }
 0x339   :  { %v4987_v33 = vpop.f32.mrf.mxu1  ;;  %v4635_v52 = vsel %vm4284_vm2, %v4540_v50, %v4115_v0 }
 0x33a   :  { %v5275_v8 = vadd.f32 %v10766_v22, %v4986_v51  ;;  %5164 = vmatprep.mubr.bf16.mxu1 %v4635_v52  ;;  %v10914_v11 = vpop.f32.mrf.mxu0 }
 0x33b   :  { %5165 = vmatmul.mubr.bf16.gmra.mxu1 %v4379_v1 }
 0x33c   :  { %v5479_v12 = vmax.f32 %v5275_v8, 0.0  ;;  %v10917_v6 = vpop.f32.mrf.mxu0 }
 0x33e   :  { %v5534_v46 = vpack.c.bf16 %v5479_v12, %v5478_v55 }
 0x340   :  { %7476 = vmatprep.mubr.msk.bf16.mxu0 %vm4122_vm15, %v5534_v46 }
 0x343   :  { %v4990_v58 = vpop.f32.mrf.mxu1 }
 0x344   :  { %v4991_v24 = vadd.f32 %v10324_v38, %v4990_v58 }
 0x345   :  { %v4992_v13 = vpop.f32.mrf.mxu1 }
 0x346   :  { %v5280_v22 = vadd.f32 %v10737_v17, %v4991_v24 }
 0x347   :  { %v4993_v32 = vpop.f32.mrf.mxu1 }
 0x348   :  { %v4994_v16 = vadd.f32 %v10910_v40, %v4993_v32  ;;  %v5480_v38 = vmax.f32 %v5280_v22, 0.0 }
 0x349   :  { %v4995_v28 = vpop.f32.mrf.mxu1 }
 0x34a   :  { %v5283_v3 = vadd.f32 %v10759_v15, %v4994_v16  ;;  %v10922_v15 = vpop.f32.mrf.mxu0 }
 0x34b   :  { %v4998_v63 = vpop.f32.mrf.mxu1 }
 0x34c   :  { %v5481_v36 = vmax.f32 %v5283_v3, 0.0  ;;  %v4999_v49 = vadd.f32 %v10910_v40, %v4998_v63  ;;  %v10925_v59 = vpop.f32.mrf.mxu0 }
 0x34d   :  { %v5000_v53 = vpop.f32.mrf.mxu1 }
 0x34e   :  { %v5535_v21 = vpack.c.bf16 %v5481_v36, %v5480_v38  ;;  %v5288_v54 = vadd.f32 %v10789_v18, %v4999_v49  ;;  %v10928_v14 = vpop.f32.mrf.mxu0 }
 0x34f   :  { %v5001_v17 = vpop.f32.mrf.mxu1 }
 0x350   :  { %v5002_v44 = vadd.f32 %v10910_v40, %v5001_v17  ;;  %7477 = vmatmul.mubr.msk.bf16.gmra.mxu0 %vm4122_vm15, %v5535_v21  ;;  %v5482_v60 = vmax.f32 %v5288_v54, 0.0  ;;  %v10931_v31 = vpop.f32.mrf.mxu0 }
 0x351   :  { %v5003_v48 = vpop.f32.mrf.mxu1 }
 0x352   :  { %v5291_v4 = vadd.f32 %v10805_v29, %v5002_v44  ;;  %v10933_v27 = vpop.f32.mrf.mxu0 }
 0x354   :  { %v5483_v30 = vmax.f32 %v5291_v4, 0.0  ;;  %v10938_v0 = vpop.f32.mrf.mxu0 }
 0x356   :  { %v5536_v34 = vpack.c.bf16 %v5483_v30, %v5482_v60  ;;  %v10941_v12 = vpop.f32.mrf.mxu0 }
 0x358   :  { %7480 = vmatprep.mubr.msk.bf16.mxu0 %vm4122_vm15, %v5536_v34  ;;  %v10947_v13 = vpop.f32.mrf.mxu0 }
 0x35a   :  { %v10950_v3 = vpop.f32.mrf.mxu0 }
 0x35b   :  { %v5006_v2 = vpop.f32.mrf.mxu1 }
 0x35c   :  { %v5007_v18 = vadd.f32 %v10910_v40, %v5006_v2 }
 0x35d   :  { %v5008_v43 = vpop.f32.mrf.mxu1 }
 0x35e   :  { %v5296_v29 = vadd.f32 %v10781_v39, %v5007_v18 }
 0x35f   :  { %v5009_v7 = vpop.f32.mrf.mxu1 }
 0x360   :  { %v5010_v19 = vadd.f32 %v10910_v40, %v5009_v7  ;;  %v5484_v61 = vmax.f32 %v5296_v29, 0.0 }
 0x361   :  { %v5011_v5 = vpop.f32.mrf.mxu1 }
 0x362   :  { %v5299_v50 = vadd.f32 %v10802_v56, %v5010_v19 }
 0x363   :  { %v5014_v51 = vpop.f32.mrf.mxu1 }
 0x364   :  { %v5485_v33 = vmax.f32 %v5299_v50, 0.0  ;;  %v5015_v52 = vadd.f32 %v10910_v40, %v5014_v51 }
 0x365   :  { %v5016_v1 = vpop.f32.mrf.mxu1 }
 0x366   :  { %v5537_v8 = vpack.c.bf16 %v5485_v33, %v5484_v61  ;;  %v5304_v46 = vadd.f32 %v10821_v25, %v5015_v52 }
 0x367   :  { %v5017_v55 = vpop.f32.mrf.mxu1 }
 0x368   :  { %v5018_v39 = vadd.f32 %v10910_v40, %v5017_v55  ;;  %7481 = vmatmul.mubr.msk.bf16.gmra.mxu0 %vm4122_vm15, %v5537_v8  ;;  %v5486_v32 = vmax.f32 %v5304_v46, 0.0 }
 0x369   :  { %v5019_v58 = vpop.f32.mrf.mxu1 }
 0x36a   :  { %v5307_v56 = vadd.f32 %v10839_v57, %v5018_v39  ;;  %v10955_v57 = vpop.f32.mrf.mxu0 }
 0x36b   :  { %v5022_v24 = vpop.f32.mrf.mxu1 }
 0x36c   :  { %v5487_v22 = vmax.f32 %v5307_v56, 0.0  ;;  %v5023_v16 = vadd.f32 %v10910_v40, %v5022_v24  ;;  %v10959_v4 = vpop.f32.mrf.mxu0 }
 0x36d   :  { %v5024_v28 = vpop.f32.mrf.mxu1 }
 0x36e   :  { %v5538_v63 = vpack.c.bf16 %v5487_v22, %v5486_v32  ;;  %v5312_v25 = vadd.f32 %v10818_v47, %v5023_v16  ;;  %v10964_v18 = vpop.f32.mrf.mxu0 }
 0x36f   :  { %v5025_v38 = vpop.f32.mrf.mxu1 }
 0x370   :  { %v5026_v36 = vadd.f32 %v10910_v40, %v5025_v38  ;;  %7484 = vmatprep.mubr.msk.bf16.mxu0 %vm4122_vm15, %v5538_v63  ;;  %v5488_v17 = vmax.f32 %v5312_v25, 0.0  ;;  %v10967_v7 = vpop.f32.mrf.mxu0 }
 0x371   :  { %v5027_v49 = vpop.f32.mrf.mxu1 }
 0x372   :  { %v5315_v53 = vadd.f32 %v10836_v35, %v5026_v36 }
 0x373   :  { %v5030_v21 = vpop.f32.mrf.mxu1 }
 0x374   :  { %v5489_v54 = vmax.f32 %v5315_v53, 0.0  ;;  %v5031_v44 = vadd.f32 %v10910_v40, %v5030_v21 }
 0x375   :  { %v5032_v48 = vpop.f32.mrf.mxu1 }
 0x376   :  { %v5539_v60 = vpack.c.bf16 %v5489_v54, %v5488_v17  ;;  %v5320_v47 = vadd.f32 %v10856_v41, %v5031_v44  ;;  %v10970_v41 = vpop.f32.mrf.mxu0 }
 0x377   :  { %v5033_v30 = vpop.f32.mrf.mxu1 }
 0x378   :  { %v5034_v34 = vadd.f32 %v10910_v40, %v5033_v30  ;;  %7485 = vmatmul.mubr.msk.bf16.gmra.mxu0 %vm4122_vm15, %v5539_v60  ;;  %v5490_v29 = vmax.f32 %v5320_v47, 0.0  ;;  %v10976_v55 = vpop.f32.mrf.mxu0 }
 0x379   :  { %v5035_v2 = vpop.f32.mrf.mxu1 }
 0x37a   :  { %v5323_v35 = vadd.f32 %v10870_v10, %v5034_v34  ;;  %v10979_v22 = vpop.f32.mrf.mxu0 }
 0x37b   :  { %v5038_v43 = vpop.f32.mrf.mxu1 }
 0x37c   :  { %v5491_v19 = vmax.f32 %v5323_v35, 0.0  ;;  %v5039_v5 = vadd.f32 %v10910_v40, %v5038_v43 }
 0x37d   :  { %v5040_v50 = vpop.f32.mrf.mxu1 }
 0x37e   :  { %v5540_v51 = vpack.c.bf16 %v5491_v19, %v5490_v29  ;;  %v5328_v33 = vadd.f32 %v10854_v9, %v5039_v5 }
 0x37f   :  { %v5041_v61 = vpop.f32.mrf.mxu1 }
 0x380   :  { %v5042_v52 = vadd.f32 %v10910_v40, %v5041_v61  ;;  %7488 = vmatprep.mubr.msk.bf16.mxu0 %vm4122_vm15, %v5540_v51  ;;  %v5492_v46 = vmax.f32 %v5328_v33, 0.0 }
 0x381   :  { %v5043_v1 = vpop.f32.mrf.mxu1 }
 0x382   :  { %v5331_v10 = vadd.f32 %v10865_v62, %v5042_v52  ;;  %v10984_v62 = vpop.f32.mrf.mxu0 }
 0x383   :  { %v5046_v8 = vpop.f32.mrf.mxu1 }
 0x384   :  { %v5493_v39 = vmax.f32 %v5331_v10, 0.0  ;;  %v5047_v58 = vadd.f32 %v10910_v40, %v5046_v8  ;;  %v10988_v21 = vpop.f32.mrf.mxu0 }
 0x385   :  { %v5048_v56 = vpop.f32.mrf.mxu1 }
 0x386   :  { %v5541_v24 = vpack.c.bf16 %v5493_v39, %v5492_v46  ;;  %v5336_v9 = vadd.f32 %v10884_v45, %v5047_v58  ;;  %v10993_v60 = vpop.f32.mrf.mxu0 }
 0x387   :  { %v5049_v32 = vpop.f32.mrf.mxu1 }
 0x388   :  { %v5050_v16 = vadd.f32 %v10910_v40, %v5049_v32  ;;  %7489 = vmatmul.mubr.msk.bf16.gmra.mxu0 %vm4122_vm15, %v5541_v24  ;;  %v5494_v25 = vmax.f32 %v5336_v9, 0.0  ;;  %v10997_v43 = vpop.f32.mrf.mxu0 }
 0x389   :  { %v5051_v28 = vpop.f32.mrf.mxu1 }
 0x38a   :  { %v5339_v63 = vadd.f32 %v10898_v37, %v5050_v16  ;;  %v11002_v50 = vpop.f32.mrf.mxu0 }
 0x38b   :  { %v5054_v38 = vpop.f32.mrf.mxu1 }
 0x38c   :  { %v5495_v36 = vmax.f32 %v5339_v63, 0.0  ;;  %v5055_v49 = vadd.f32 %v10910_v40, %v5054_v38  ;;  %v11006_v10 = vpop.f32.mrf.mxu0 }
 0x38d   :  { %v5056_v53 = vpop.f32.mrf.mxu1 }
 0x38e   :  { %v5542_v17 = vpack.c.bf16 %v5495_v36, %v5494_v25  ;;  %v5344_v45 = vadd.f32 %v10879_v23, %v5055_v49  ;;  %v11011_v56 = vpop.f32.mrf.mxu0 }
 0x38f   :  { %v5057_v54 = vpop.f32.mrf.mxu1 }
 0x390   :  { %v5058_v44 = vadd.f32 %v10910_v40, %v5057_v54  ;;  %7492 = vmatprep.mubr.msk.bf16.mxu0 %vm4122_vm15, %v5542_v17  ;;  %v5496_v47 = vmax.f32 %v5344_v45, 0.0  ;;  %v11015_v63 = vpop.f32.mrf.mxu0  ;;  %v7691_v54 = vld [vmem:[%s11340_s0 + $0x8] sm:$0xff]  }
 0x391   :  { %v5059_v48 = vpop.f32.mrf.mxu1  ;;  %v5968_v45 = vunpack.c.l.bf16 %v7691_v54 }
 0x392   :  { %v5347_v37 = vadd.f32 %v10896_v26, %v5058_v44 }
 0x393   :  { %v5062_v30 = vpop.f32.mrf.mxu1 }
 0x394   :  { %v5497_v34 = vmax.f32 %v5347_v37, 0.0  ;;  %v5063_v2 = vadd.f32 %v10910_v40, %v5062_v30 }
 0x395   :  { %v5064_v35 = vpop.f32.mrf.mxu1 }
 0x396   :  { %v5543_v29 = vpack.c.bf16 %v5497_v34, %v5496_v47  ;;  %v5352_v23 = vadd.f32 %v10904_v42, %v5063_v2  ;;  %v5969_v2 = vunpack.c.h.bf16 %v7691_v54 }
 0x397   :  { %v5065_v19 = vpop.f32.mrf.mxu1 }
 0x398   :  { %v5066_v5 = vadd.f32 %v10910_v40, %v5065_v19  ;;  %7493 = vmatmul.mubr.msk.bf16.gmra.mxu0 %vm4122_vm15, %v5543_v29  ;;  %v5498_v33 = vmax.f32 %v5352_v23, 0.0 }
 0x399   :  { %v5067_v51 = vpop.f32.mrf.mxu1 }
 0x39a   :  { %v5355_v26 = vadd.f32 %v10917_v6, %v5066_v5 }
 0x39b   :  { %v5070_v61 = vpop.f32.mrf.mxu1 }
 0x39c   :  { %v5499_v52 = vmax.f32 %v5355_v26, 0.0  ;;  %v5071_v1 = vadd.f32 %v10910_v40, %v5070_v61 }
 0x39d   :  { %v5072_v8 = vpop.f32.mrf.mxu1 }
 0x39e   :  { %v5544_v46 = vpack.c.bf16 %v5499_v52, %v5498_v33  ;;  %v5360_v42 = vadd.f32 %v10901_v20, %v5071_v1  ;;  %v11020_v20 = vld [vmem:[%s11345_s6] ss:$0 sm:$0xff] }
 0x39f   :  { %v5073_v39 = vpop.f32.mrf.mxu1 }
 0x3a0   :  { %v5074_v58 = vadd.f32 %v10910_v40, %v5073_v39  ;;  %7496 = vmatprep.mubr.msk.bf16.mxu0 %vm4122_vm15, %v5544_v46  ;;  %v5500_v9 = vmax.f32 %v5360_v42, 0.0 }
 0x3a1   :  { %v5075_v24 = vpop.f32.mrf.mxu1 }
 0x3a2   :  { %v5363_v6 = vadd.f32 %v10914_v11, %v5074_v58 }
 0x3a3   :  { %v5078_v32 = vpop.f32.mrf.mxu1 }
 0x3a4   :  { %v5501_v16 = vmax.f32 %v5363_v6, 0.0  ;;  %v5079_v28 = vadd.f32 %v10910_v40, %v5078_v32 }
 0x3a5   :  { %v5080_v38 = vpop.f32.mrf.mxu1 }
 0x3a6   :  { %v5545_v25 = vpack.c.bf16 %v5501_v16, %v5500_v9  ;;  %v5368_v49 = vadd.f32 %v10925_v59, %v5079_v28  ;;  %v7692_v59 = vld [vmem:[%s11340_s0] sm:$0xff]  }
 0x3a7   :  { %v5081_v36 = vpop.f32.mrf.mxu1  ;;  %v5966_v30 = vunpack.c.l.bf16 %v7692_v59  ;;  %v5967_v5 = vunpack.c.h.bf16 %v7692_v59 }
 0x3a8   :  { %v5082_v53 = vadd.f32 %v10910_v40, %v5081_v36  ;;  %v7462_v11 = vpop.f32.mrf.mxu0  ;;  %7497 = vmatmul.mubr.msk.bf16.gmra.mxu0 %vm4122_vm15, %v5545_v25  ;;  %v5502_v35 = vmax.f32 %v5368_v49, 0.0 }
 0x3a9   :  { %v5720_v17 = vadd.f32 %v7462_v11, %v11020_v20  ;;  %v5083_v44 = vpop.f32.mrf.mxu1 }
 0x3aa   :  { %v5371_v48 = vadd.f32 %v10931_v31, %v5082_v53  ;;  %v5711_v37 = vpop.f32.mrf.mxu0 }
 0x3ab   :  { %v5712_v47 = vadd.f32 %v11020_v20, %v5711_v37  ;;  %v5086_v34 = vpop.f32.mrf.mxu1  ;;  %v6032_v51 = vadd.f32 %v5968_v45, %v5720_v17 }
 0x3ac   :  { %v5503_v29 = vmax.f32 %v5371_v48, 0.0  ;;  %v5087_v19 = vadd.f32 %v10910_v40, %v5086_v34  ;;  %v7463_v23 = vpop.f32.mrf.mxu0 }
 0x3ad   :  { %v5723_v26 = vadd.f32 %v7463_v23, %v11020_v20  ;;  %v5088_v31 = vpop.f32.mrf.mxu1  ;;  %v6030_v52 = vadd.f32 %v5966_v30, %v5712_v47  ;;  %v6096_v58 = vmax.f32 %v6032_v51, 0.0 }
 0x3ae   :  { %v5546_v61 = vpack.c.bf16 %v5503_v29, %v5502_v35  ;;  %v5714_v33 = vpop.f32.mrf.mxu0  ;;  %v5376_v39 = vadd.f32 %v10922_v15, %v5087_v19 }
 0x3af   :  { %v6033_v1 = vadd.f32 %v5969_v2, %v5723_v26  ;;  %v5715_v8 = vadd.f32 %v11020_v20, %v5714_v33  ;;  %v5089_v46 = vpop.f32.mrf.mxu1  ;;  %v6094_v16 = vmax.f32 %v6030_v52, 0.0  ;;  %v7693_v33 = vld [vmem:[%s11340_s0 + $0x18] sm:$0xff]  }
 0x3b0   :  { %v5090_v42 = vadd.f32 %v10910_v40, %v5089_v46  ;;  %7500 = vmatprep.mubr.msk.bf16.mxu0 %vm4122_vm15, %v5546_v61  ;;  %v5504_v36 = vmax.f32 %v5376_v39, 0.0 }
 0x3b1   :  { %v6097_v24 = vmax.f32 %v6033_v1, 0.0  ;;  %v6031_v6 = vadd.f32 %v5967_v5, %v5715_v8  ;;  %v5091_v32 = vpop.f32.mrf.mxu1 }
 0x3b2   :  { %v5379_v9 = vadd.f32 %v10928_v14, %v5090_v42 }
 0x3b3   :  { %v7017_v28 = vpack.c.bf16 %v6097_v24, %v6096_v58  ;;  %v6095_v38 = vmax.f32 %v6031_v6, 0.0  ;;  %v5094_v25 = vpop.f32.mrf.mxu1  ;;  %v5973_v58 = vunpack.c.h.bf16 %v7693_v33 }
 0x3b4   :  { %v5505_v49 = vmax.f32 %v5379_v9, 0.0  ;;  %v5095_v53 = vadd.f32 %v10910_v40, %v5094_v25 }
 0x3b5   :  { %7169 = vst [vmem:[%s11346_s7 + $0x8] sm:$0xff] %v7017_v28   ;;  %v7012_v15 = vpack.c.bf16 %v6095_v38, %v6094_v16  ;;  %v5096_v11 = vpop.f32.mrf.mxu1 }
 0x3b6   :  { %v5547_v17 = vpack.c.bf16 %v5505_v49, %v5504_v36  ;;  %v5384_v54 = vadd.f32 %v10938_v0, %v5095_v53 }
 0x3b7   :  { %7013 = vst [vmem:[%s11346_s7] sm:$0xff] %v7012_v15   ;;  %v5097_v14 = vpop.f32.mrf.mxu1 }
 0x3b8   :  { %v5098_v45 = vadd.f32 %v10910_v40, %v5097_v14  ;;  %7501 = vmatmul.mubr.msk.bf16.gmra.mxu0 %vm4122_vm15, %v5547_v17  ;;  %v5506_v59 = vmax.f32 %v5384_v54, 0.0 }
 0x3b9   :  { %v5099_v44 = vpop.f32.mrf.mxu1 }
 0x3ba   :  { %v5387_v48 = vadd.f32 %v10947_v13, %v5098_v45 }
 0x3bb   :  { %v5102_v37 = vpop.f32.mrf.mxu1 }
 0x3bc   :  { %v5507_v30 = vmax.f32 %v5387_v48, 0.0  ;;  %v5103_v47 = vadd.f32 %v10910_v40, %v5102_v37 }
 0x3bd   :  { %v5104_v34 = vpop.f32.mrf.mxu1 }
 0x3be   :  { %v5548_v2 = vpack.c.bf16 %v5507_v30, %v5506_v59  ;;  %v5392_v29 = vadd.f32 %v10933_v27, %v5103_v47  ;;  %v5972_v27 = vunpack.c.l.bf16 %v7693_v33 }
 0x3bf   :  { %v5105_v35 = vpop.f32.mrf.mxu1 }
 0x3c0   :  { %v5106_v19 = vadd.f32 %v10910_v40, %v5105_v35  ;;  %7504 = vmatprep.mubr.msk.bf16.mxu0 %vm4122_vm15, %v5548_v2  ;;  %v5508_v51 = vmax.f32 %v5392_v29, 0.0 }
 0x3c1   :  { %v5107_v0 = vpop.f32.mrf.mxu1 }
 0x3c2   :  { %v5395_v23 = vadd.f32 %v10941_v12, %v5106_v19  ;;  %v7694_v12 = vld [vmem:[%s11340_s0 + $0x10] sm:$0xff]  }
 0x3c3   :  { %v5110_v5 = vpop.f32.mrf.mxu1  ;;  %v5970_v39 = vunpack.c.l.bf16 %v7694_v12  ;;  %v5971_v38 = vunpack.c.h.bf16 %v7694_v12 }
 0x3c4   :  { %v5509_v13 = vmax.f32 %v5395_v23, 0.0  ;;  %v5111_v26 = vadd.f32 %v10910_v40, %v5110_v5  ;;  %v7466_v31 = vpop.f32.mrf.mxu0 }
 0x3c5   :  { %v5736_v61 = vadd.f32 %v7466_v31, %v11020_v20  ;;  %v5112_v52 = vpop.f32.mrf.mxu1 }
 0x3c6   :  { %v5549_v1 = vpack.c.bf16 %v5509_v13, %v5508_v51  ;;  %v5727_v8 = vpop.f32.mrf.mxu0  ;;  %v5400_v24 = vadd.f32 %v10955_v57, %v5111_v26 }
 0x3c7   :  { %v5728_v46 = vadd.f32 %v11020_v20, %v5727_v8  ;;  %v5113_v42 = vpop.f32.mrf.mxu1  ;;  %v6036_v9 = vadd.f32 %v5972_v27, %v5736_v61 }
 0x3c8   :  { %v5114_v6 = vadd.f32 %v10910_v40, %v5113_v42  ;;  %v7467_v32 = vpop.f32.mrf.mxu0  ;;  %7505 = vmatmul.mubr.msk.bf16.gmra.mxu0 %vm4122_vm15, %v5549_v1  ;;  %v5510_v17 = vmax.f32 %v5400_v24, 0.0 }
 0x3c9   :  { %v5739_v16 = vadd.f32 %v7467_v32, %v11020_v20  ;;  %v5115_v28 = vpop.f32.mrf.mxu1  ;;  %v6034_v49 = vadd.f32 %v5970_v39, %v5728_v46  ;;  %v6100_v54 = vmax.f32 %v6036_v9, 0.0 }
 0x3ca   :  { %v5403_v25 = vadd.f32 %v10964_v18, %v5114_v6  ;;  %v5730_v36 = vpop.f32.mrf.mxu0 }
 0x3cb   :  { %v6037_v53 = vadd.f32 %v5973_v58, %v5739_v16  ;;  %v5731_v15 = vadd.f32 %v11020_v20, %v5730_v36  ;;  %v5118_v11 = vpop.f32.mrf.mxu1  ;;  %v6098_v59 = vmax.f32 %v6034_v49, 0.0 }
 0x3cc   :  { %v5511_v57 = vmax.f32 %v5403_v25, 0.0  ;;  %v5119_v14 = vadd.f32 %v10910_v40, %v5118_v11 }
 0x3cd   :  { %v6101_v45 = vmax.f32 %v6037_v53, 0.0  ;;  %v6035_v44 = vadd.f32 %v5971_v38, %v5731_v15  ;;  %v5120_v48 = vpop.f32.mrf.mxu1 }
 0x3ce   :  { %v5550_v37 = vpack.c.bf16 %v5511_v57, %v5510_v17  ;;  %v5408_v18 = vadd.f32 %v10950_v3, %v5119_v14 }
 0x3cf   :  { %v7027_v30 = vpack.c.bf16 %v6101_v45, %v6100_v54  ;;  %v6099_v47 = vmax.f32 %v6035_v44, 0.0  ;;  %v5121_v34 = vpop.f32.mrf.mxu1 }
 0x3d0   :  { %v5122_v2 = vadd.f32 %v10910_v40, %v5121_v34  ;;  %7508 = vmatprep.mubr.msk.bf16.mxu0 %vm4122_vm15, %v5550_v37  ;;  %v5512_v23 = vmax.f32 %v5408_v18, 0.0 }
 0x3d1   :  { %7171 = vst [vmem:[%s11346_s7 + $0x18] sm:$0xff] %v7027_v30   ;;  %v7022_v35 = vpack.c.bf16 %v6099_v47, %v6098_v59  ;;  %v5123_v29 = vpop.f32.mrf.mxu1 }
 0x3d2   :  { %v5411_v19 = vadd.f32 %v10959_v4, %v5122_v2 }
 0x3d3   :  { %7170 = vst [vmem:[%s11346_s7 + $0x10] sm:$0xff] %v7022_v35   ;;  %v5126_v0 = vpop.f32.mrf.mxu1 }
 0x3d4   :  { %v5513_v5 = vmax.f32 %v5411_v19, 0.0  ;;  %v5127_v3 = vadd.f32 %v10910_v40, %v5126_v0 }
 0x3d5   :  { %v5128_v51 = vpop.f32.mrf.mxu1 }
 0x3d6   :  { %v5551_v13 = vpack.c.bf16 %v5513_v5, %v5512_v23  ;;  %v5416_v31 = vadd.f32 %v10970_v41, %v5127_v3 }
 0x3d7   :  { %v5129_v26 = vpop.f32.mrf.mxu1 }
 0x3d8   :  { %v5130_v61 = vadd.f32 %v10910_v40, %v5129_v26  ;;  %7509 = vmatmul.mubr.msk.bf16.gmra.mxu0 %vm4122_vm15, %v5551_v13  ;;  %v5514_v52 = vmax.f32 %v5416_v31, 0.0 }
 0x3d9   :  { %v5131_v33 = vpop.f32.mrf.mxu1 }
 0x3da   :  { %v5419_v4 = vadd.f32 %v10979_v22, %v5130_v61  ;;  %v7695_v22 = vld [vmem:[%s11340_s0 + $0x28] sm:$0xff]  }
 0x3db   :  { %v5134_v27 = vpop.f32.mrf.mxu1  ;;  %v5976_v6 = vunpack.c.l.bf16 %v7695_v22  ;;  %v5977_v36 = vunpack.c.h.bf16 %v7695_v22 }
 0x3dc   :  { %v5515_v1 = vmax.f32 %v5419_v4, 0.0  ;;  %v5135_v8 = vadd.f32 %v10910_v40, %v5134_v27 }
 0x3dd   :  { %v5136_v46 = vpop.f32.mrf.mxu1 }
 0x3de   :  { %v5552_v12 = vpack.c.bf16 %v5515_v1, %v5514_v52  ;;  %v5424_v42 = vadd.f32 %v10967_v7, %v5135_v8  ;;  %v7696_v7 = vld [vmem:[%s11340_s0 + $0x20] sm:$0xff]  }
 0x3df   :  { %v5137_v39 = vpop.f32.mrf.mxu1  ;;  %v5974_v38 = vunpack.c.l.bf16 %v7696_v7 }
 0x3e0   :  { %v5138_v58 = vadd.f32 %v10910_v40, %v5137_v39  ;;  %v7470_v41 = vpop.f32.mrf.mxu0  ;;  %7512 = vmatprep.mubr.msk.bf16.mxu0 %vm4122_vm15, %v5552_v12  ;;  %v5516_v49 = vmax.f32 %v5424_v42, 0.0 }
 0x3e1   :  { %v5752_v24 = vadd.f32 %v7470_v41, %v11020_v20  ;;  %v5139_v32 = vpop.f32.mrf.mxu1 }
 0x3e2   :  { %v5427_v9 = vadd.f32 %v10976_v55, %v5138_v58  ;;  %v5743_v16 = vpop.f32.mrf.mxu0  ;;  %v5975_v55 = vunpack.c.h.bf16 %v7696_v7 }
 0x3e3   :  { %v5744_v28 = vadd.f32 %v11020_v20, %v5743_v16  ;;  %v5142_v25 = vpop.f32.mrf.mxu1  ;;  %v6040_v17 = vadd.f32 %v5976_v6, %v5752_v24 }
 0x3e4   :  { %v5517_v53 = vmax.f32 %v5427_v9, 0.0  ;;  %v5143_v15 = vadd.f32 %v10910_v40, %v5142_v25  ;;  %v7471_v11 = vpop.f32.mrf.mxu0 }
 0x3e5   :  { %v5755_v57 = vadd.f32 %v7471_v11, %v11020_v20  ;;  %v5144_v14 = vpop.f32.mrf.mxu1  ;;  %v6038_v44 = vadd.f32 %v5974_v38, %v5744_v28  ;;  %v6104_v34 = vmax.f32 %v6040_v17, 0.0 }
 0x3e6   :  { %v5553_v54 = vpack.c.bf16 %v5517_v53, %v5516_v49  ;;  %v5746_v45 = vpop.f32.mrf.mxu0  ;;  %v5432_v30 = vadd.f32 %v10988_v21, %v5143_v15 }
 0x3e7   :  { %v6041_v48 = vadd.f32 %v5977_v36, %v5755_v57  ;;  %v5747_v37 = vadd.f32 %v11020_v20, %v5746_v45  ;;  %v5145_v59 = vpop.f32.mrf.mxu1  ;;  %v6102_v19 = vmax.f32 %v6038_v44, 0.0 }
 0x3e8   :  { %v5146_v47 = vadd.f32 %v10910_v40, %v5145_v59  ;;  %7513 = vmatmul.mubr.msk.bf16.gmra.mxu0 %vm4122_vm15, %v5553_v54  ;;  %v5518_v3 = vmax.f32 %v5432_v30, 0.0 }
 0x3e9   :  { %v6105_v18 = vmax.f32 %v6041_v48, 0.0  ;;  %v6039_v2 = vadd.f32 %v5975_v55, %v5747_v37  ;;  %v5147_v35 = vpop.f32.mrf.mxu1 }
 0x3ea   :  { %v5435_v29 = vadd.f32 %v10997_v43, %v5146_v47 }
 0x3eb   :  { %v7037_v0 = vpack.c.bf16 %v6105_v18, %v6104_v34  ;;  %v6103_v23 = vmax.f32 %v6039_v2, 0.0  ;;  %v5150_v5 = vpop.f32.mrf.mxu1 }
 0x3ec   :  { %v5519_v51 = vmax.f32 %v5435_v29, 0.0  ;;  %v5151_v13 = vadd.f32 %v10910_v40, %v5150_v5  ;;  %v7699_v5 = vld [vmem:[%s11340_s0 + $0x48] sm:$0xff]  }
 0x3ed   :  { %7173 = vst [vmem:[%s11346_s7 + $0x28] sm:$0xff] %v7037_v0   ;;  %v7032_v21 = vpack.c.bf16 %v6103_v23, %v6102_v19  ;;  %v5152_v26 = vpop.f32.mrf.mxu1 }
 0x3ee   :  { %v5554_v31 = vpack.c.bf16 %v5519_v51, %v5518_v3  ;;  %v5440_v61 = vadd.f32 %v10984_v62, %v5151_v13  ;;  %v5984_v3 = vunpack.c.l.bf16 %v7699_v5 }
 0x3ef   :  { %7172 = vst [vmem:[%s11346_s7 + $0x20] sm:$0xff] %v7032_v21   ;;  %v5153_v43 = vpop.f32.mrf.mxu1  ;;  %v7700_v21 = vld [vmem:[%s11340_s0 + $0x40] sm:$0xff]  }
 0x3f0   :  { %v5154_v33 = vadd.f32 %v10910_v40, %v5153_v43  ;;  %7516 = vmatprep.mubr.msk.bf16.mxu0 %vm4122_vm15, %v5554_v31  ;;  %v5520_v1 = vmax.f32 %v5440_v61, 0.0  ;;  %v5982_v26 = vunpack.c.l.bf16 %v7700_v21  ;;  %v5985_v31 = vunpack.c.h.bf16 %v7699_v5 }
 0x3f1   :  { %v5155_v4 = vpop.f32.mrf.mxu1 }
 0x3f2   :  { %v5443_v27 = vadd.f32 %v10993_v60, %v5154_v33  ;;  %v7697_v60 = vld [vmem:[%s11340_s0 + $0x38] sm:$0xff]   ;;  %v5983_v4 = vunpack.c.h.bf16 %v7700_v21 }
 0x3f3   :  { %v5158_v52 = vpop.f32.mrf.mxu1  ;;  %v5980_v22 = vunpack.c.l.bf16 %v7697_v60  ;;  %v5981_v38 = vunpack.c.h.bf16 %v7697_v60 }
 0x3f4   :  { %v5521_v8 = vmax.f32 %v5443_v27, 0.0  ;;  %v5159_v46 = vadd.f32 %v10910_v40, %v5158_v52 }
 0x3f5   :  { %v5160_v12 = vpop.f32.mrf.mxu1 }
 0x3f6   :  { %v5555_v39 = vpack.c.bf16 %v5521_v8, %v5520_v1  ;;  %v5448_v58 = vadd.f32 %v11006_v10, %v5159_v46  ;;  %v7698_v10 = vld [vmem:[%s11340_s0 + $0x30] sm:$0xff]  }
 0x3f7   :  { %v5161_v42 = vpop.f32.mrf.mxu1  ;;  %v5978_v28 = vunpack.c.l.bf16 %v7698_v10 }
 0x3f8   :  { %v5162_v41 = vadd.f32 %v10910_v40, %v5161_v42  ;;  %v7474_v62 = vpop.f32.mrf.mxu0  ;;  %7517 = vmatmul.mubr.msk.bf16.gmra.mxu0 %vm4122_vm15, %v5555_v39  ;;  %v5522_v25 = vmax.f32 %v5448_v58, 0.0 }
 0x3f9   :  { %v5768_v24 = vadd.f32 %v7474_v62, %v11020_v20  ;;  %v5163_v6 = vpop.f32.mrf.mxu1 }
 0x3fa   :  { %v5451_v32 = vadd.f32 %v11015_v63, %v5162_v41  ;;  %v5759_v9 = vpop.f32.mrf.mxu0  ;;  %v5979_v63 = vunpack.c.h.bf16 %v7698_v10 }
 0x3fb   :  { %v5760_v16 = vadd.f32 %v11020_v20, %v5759_v9  ;;  %v5166_v7 = vpop.f32.mrf.mxu1  ;;  %v6044_v15 = vadd.f32 %v5980_v22, %v5768_v24  ;;  %v7701_v22 = vld [vmem:[%s11340_s0 + $0x58] sm:$0xff]  }
 0x3fc   :  { %v5523_v36 = vmax.f32 %v5451_v32, 0.0  ;;  %v5167_v49 = vadd.f32 %v10910_v40, %v5166_v7  ;;  %v7475_v53 = vpop.f32.mrf.mxu0  ;;  %v5988_v6 = vunpack.c.l.bf16 %v7701_v22 }
 0x3fd   :  { %v5771_v11 = vadd.f32 %v7475_v53, %v11020_v20  ;;  %v5168_v17 = vpop.f32.mrf.mxu1  ;;  %v6042_v55 = vadd.f32 %v5978_v28, %v5760_v16  ;;  %v6108_v59 = vmax.f32 %v6044_v15, 0.0  ;;  %v7702_v16 = vld [vmem:[%s11340_s0 + $0x50] sm:$0xff]   ;;  %v5989_v28 = vunpack.c.h.bf16 %v7701_v22 }
 0x3fe   :  { %v5556_v57 = vpack.c.bf16 %v5523_v36, %v5522_v25  ;;  %v5762_v14 = vpop.f32.mrf.mxu0  ;;  %v5456_v48 = vadd.f32 %v11002_v50, %v5167_v49  ;;  %v5986_v10 = vunpack.c.l.bf16 %v7702_v16  ;;  %v5987_v36 = vunpack.c.h.bf16 %v7702_v16 }
 0x3ff   :  { %v6045_v54 = vadd.f32 %v5981_v38, %v5771_v11  ;;  %v5763_v45 = vadd.f32 %v11020_v20, %v5762_v14  ;;  %v5169_v44 = vpop.f32.mrf.mxu1  ;;  %v6106_v2 = vmax.f32 %v6042_v55, 0.0 }
 0x400   :  { %v5170_v37 = vadd.f32 %v10910_v40, %v5169_v44  ;;  %7520 = vmatprep.mubr.msk.bf16.mxu0 %vm4122_vm15, %v5556_v57  ;;  %v5524_v19 = vmax.f32 %v5456_v48, 0.0 }
 0x401   :  { %v6109_v30 = vmax.f32 %v6045_v54, 0.0  ;;  %v6043_v47 = vadd.f32 %v5979_v63, %v5763_v45  ;;  %v5171_v34 = vpop.f32.mrf.mxu1 }
 0x402   :  { %v5459_v18 = vadd.f32 %v11011_v56, %v5170_v37  ;;  %v7703_v37 = vld [vmem:[%s11340_s0 + $0x68] sm:$0xff]   ;;  %v7704_v34 = vld [vmem:[%s11340_s0 + $0x60] sm:$0xff]  }
 0x403   :  { %v7047_v35 = vpack.c.bf16 %v6109_v30, %v6108_v59  ;;  %v6107_v29 = vmax.f32 %v6043_v47, 0.0  ;;  %v5992_v59 = vunpack.c.l.bf16 %v7703_v37 }
 0x404   :  { %v5525_v0 = vmax.f32 %v5459_v18, 0.0  ;;  %v5990_v18 = vunpack.c.l.bf16 %v7704_v34 }
 0x405   :  { %7175 = vst [vmem:[%s11346_s7 + $0x38] sm:$0xff] %v7047_v35   ;;  %v7042_v50 = vpack.c.bf16 %v6107_v29, %v6106_v2  ;;  %v5993_v2 = vunpack.c.h.bf16 %v7703_v37 }
 0x406   :  { %v5557_v23 = vpack.c.bf16 %v5525_v0, %v5524_v19  ;;  %v5991_v0 = vunpack.c.h.bf16 %v7704_v34 }
 0x407   :  { %7174 = vst [vmem:[%s11346_s7 + $0x30] sm:$0xff] %v7042_v50  }
 0x408   :  { %7521 = vmatmul.mubr.msk.bf16.gmra.mxu0 %vm4122_vm15, %v5557_v23 }
 0x410   :  { %v7478_v40 = vpop.f32.mrf.mxu0 }
 0x411   :  { %v5784_v56 = vadd.f32 %v7478_v40, %v11020_v20 }
 0x412   :  { %v5775_v51 = vpop.f32.mrf.mxu0 }
 0x413   :  { %v5776_v13 = vadd.f32 %v11020_v20, %v5775_v51  ;;  %v6048_v61 = vadd.f32 %v5984_v3, %v5784_v56 }
 0x414   :  { %v7479_v43 = vpop.f32.mrf.mxu0 }
 0x415   :  { %v5787_v33 = vadd.f32 %v7479_v43, %v11020_v20  ;;  %v6046_v52 = vadd.f32 %v5982_v26, %v5776_v13  ;;  %v6112_v46 = vmax.f32 %v6048_v61, 0.0 }
 0x416   :  { %v5778_v27 = vpop.f32.mrf.mxu0 }
 0x417   :  { %v6049_v1 = vadd.f32 %v5985_v31, %v5787_v33  ;;  %v5779_v8 = vadd.f32 %v11020_v20, %v5778_v27  ;;  %v6110_v42 = vmax.f32 %v6046_v52, 0.0  ;;  %v7705_v33 = vld [vmem:[%s11340_s0 + $0x78] sm:$0xff]  }
 0x419   :  { %v6113_v12 = vmax.f32 %v6049_v1, 0.0  ;;  %v6047_v39 = vadd.f32 %v5983_v4, %v5779_v8  ;;  %v5996_v4 = vunpack.c.l.bf16 %v7705_v33  ;;  %v7706_v1 = vld [vmem:[%s11340_s0 + $0x70] sm:$0xff]  }
 0x41a   :  { %v5994_v8 = vunpack.c.l.bf16 %v7706_v1 }
 0x41b   :  { %v7057_v58 = vpack.c.bf16 %v6113_v12, %v6112_v46  ;;  %v6111_v41 = vmax.f32 %v6047_v39, 0.0  ;;  %v5997_v46 = vunpack.c.h.bf16 %v7705_v33 }
 0x41d   :  { %7177 = vst [vmem:[%s11346_s7 + $0x48] sm:$0xff] %v7057_v58   ;;  %v7052_v62 = vpack.c.bf16 %v6111_v41, %v6110_v42  ;;  %v5995_v58 = vunpack.c.h.bf16 %v7706_v1 }
 0x41f   :  { %7176 = vst [vmem:[%s11346_s7 + $0x40] sm:$0xff] %v7052_v62  }
 0x428   :  { %v7482_v24 = vpop.f32.mrf.mxu0 }
 0x429   :  { %v5800_v60 = vadd.f32 %v7482_v24, %v11020_v20 }
 0x42a   :  { %v5791_v32 = vpop.f32.mrf.mxu0 }
 0x42b   :  { %v5792_v9 = vadd.f32 %v11020_v20, %v5791_v32  ;;  %v6052_v38 = vadd.f32 %v5988_v6, %v5800_v60 }
 0x42c   :  { %v7483_v7 = vpop.f32.mrf.mxu0 }
 0x42d   :  { %v5803_v25 = vadd.f32 %v7483_v7, %v11020_v20  ;;  %v6050_v53 = vadd.f32 %v5986_v10, %v5792_v9  ;;  %v6116_v17 = vmax.f32 %v6052_v38, 0.0 }
 0x42e   :  { %v5794_v49 = vpop.f32.mrf.mxu0 }
 0x42f   :  { %v6053_v15 = vadd.f32 %v5989_v28, %v5803_v25  ;;  %v5795_v11 = vadd.f32 %v11020_v20, %v5794_v49  ;;  %v6114_v14 = vmax.f32 %v6050_v53, 0.0  ;;  %v7707_v25 = vld [vmem:[%s11340_s0 + $0x88] sm:$0xff]   ;;  %v7708_v53 = vld [vmem:[%s11340_s0 + $0x80] sm:$0xff]  }
 0x431   :  { %v6117_v63 = vmax.f32 %v6053_v15, 0.0  ;;  %v6051_v57 = vadd.f32 %v5987_v36, %v5795_v11  ;;  %v6000_v36 = vunpack.c.l.bf16 %v7707_v25  ;;  %v5998_v15 = vunpack.c.l.bf16 %v7708_v53 }
 0x433   :  { %v7067_v55 = vpack.c.bf16 %v6117_v63, %v6116_v17  ;;  %v6115_v54 = vmax.f32 %v6051_v57, 0.0  ;;  %v6001_v17 = vunpack.c.h.bf16 %v7707_v25  ;;  %v5999_v57 = vunpack.c.h.bf16 %v7708_v53 }
 0x435   :  { %7179 = vst [vmem:[%s11346_s7 + $0x58] sm:$0xff] %v7067_v55   ;;  %v7062_v45 = vpack.c.bf16 %v6115_v54, %v6114_v14 }
 0x437   :  { %7178 = vst [vmem:[%s11346_s7 + $0x50] sm:$0xff] %v7062_v45  }
 0x438   :  { %v7486_v44 = vpop.f32.mrf.mxu0 }
 0x439   :  { %v5816_v48 = vadd.f32 %v7486_v44, %v11020_v20 }
 0x43a   :  { %v5807_v30 = vpop.f32.mrf.mxu0 }
 0x43b   :  { %v5808_v47 = vadd.f32 %v11020_v20, %v5807_v30  ;;  %v6056_v29 = vadd.f32 %v5992_v59, %v5816_v48 }
 0x43c   :  { %v7487_v35 = vpop.f32.mrf.mxu0 }
 0x43d   :  { %v5819_v19 = vadd.f32 %v7487_v35, %v11020_v20  ;;  %v6054_v23 = vadd.f32 %v5990_v18, %v5808_v47  ;;  %v6120_v5 = vmax.f32 %v6056_v29, 0.0 }
 0x43e   :  { %v5810_v50 = vpop.f32.mrf.mxu0 }
 0x43f   :  { %v6057_v40 = vadd.f32 %v5993_v2, %v5819_v19  ;;  %v5811_v56 = vadd.f32 %v11020_v20, %v5810_v50  ;;  %v6118_v13 = vmax.f32 %v6054_v23, 0.0  ;;  %v7709_v19 = vld [vmem:[%s11340_s0 + $0x98] sm:$0xff]  }
 0x441   :  { %v6121_v3 = vmax.f32 %v6057_v40, 0.0  ;;  %v6055_v51 = vadd.f32 %v5991_v0, %v5811_v56  ;;  %v6004_v0 = vunpack.c.l.bf16 %v7709_v19  ;;  %v7710_v40 = vld [vmem:[%s11340_s0 + $0x90] sm:$0xff]  }
 0x442   :  { %v6002_v56 = vunpack.c.l.bf16 %v7710_v40 }
 0x443   :  { %v7077_v21 = vpack.c.bf16 %v6121_v3, %v6120_v5  ;;  %v6119_v26 = vmax.f32 %v6055_v51, 0.0  ;;  %v6005_v5 = vunpack.c.h.bf16 %v7709_v19 }
 0x445   :  { %7181 = vst [vmem:[%s11346_s7 + $0x68] sm:$0xff] %v7077_v21   ;;  %v7072_v31 = vpack.c.bf16 %v6119_v26, %v6118_v13  ;;  %v6003_v21 = vunpack.c.h.bf16 %v7710_v40 }
 0x447   :  { %7180 = vst [vmem:[%s11346_s7 + $0x60] sm:$0xff] %v7072_v31  }
 0x448   :  { %v7490_v43 = vpop.f32.mrf.mxu0 }
 0x449   :  { %v5832_v61 = vadd.f32 %v7490_v43, %v11020_v20 }
 0x44a   :  { %v5823_v27 = vpop.f32.mrf.mxu0 }
 0x44b   :  { %v5824_v52 = vadd.f32 %v11020_v20, %v5823_v27  ;;  %v6060_v39 = vadd.f32 %v5996_v4, %v5832_v61 }
 0x44c   :  { %v7491_v12 = vpop.f32.mrf.mxu0 }
 0x44d   :  { %v5835_v42 = vadd.f32 %v7491_v12, %v11020_v20  ;;  %v6058_v62 = vadd.f32 %v5994_v8, %v5824_v52  ;;  %v6124_v22 = vmax.f32 %v6060_v39, 0.0 }
 0x44e   :  { %v5826_v41 = vpop.f32.mrf.mxu0 }
 0x44f   :  { %v6061_v24 = vadd.f32 %v5997_v46, %v5835_v42  ;;  %v5827_v60 = vadd.f32 %v11020_v20, %v5826_v41  ;;  %v6122_v9 = vmax.f32 %v6058_v62, 0.0  ;;  %v7711_v42 = vld [vmem:[%s11340_s0 + $0xa8] sm:$0xff]  }
 0x451   :  { %v6125_v6 = vmax.f32 %v6061_v24, 0.0  ;;  %v6059_v32 = vadd.f32 %v5995_v58, %v5827_v60  ;;  %v6008_v58 = vunpack.c.l.bf16 %v7711_v42  ;;  %v7712_v24 = vld [vmem:[%s11340_s0 + $0xa0] sm:$0xff]  }
 0x452   :  { %v6006_v60 = vunpack.c.l.bf16 %v7712_v24 }
 0x453   :  { %v7087_v16 = vpack.c.bf16 %v6125_v6, %v6124_v22  ;;  %v6123_v10 = vmax.f32 %v6059_v32, 0.0  ;;  %v6009_v22 = vunpack.c.h.bf16 %v7711_v42 }
 0x455   :  { %7183 = vst [vmem:[%s11346_s7 + $0x78] sm:$0xff] %v7087_v16   ;;  %v7082_v28 = vpack.c.bf16 %v6123_v10, %v6122_v9  ;;  %v6007_v16 = vunpack.c.h.bf16 %v7712_v24 }
 0x457   :  { %7182 = vst [vmem:[%s11346_s7 + $0x70] sm:$0xff] %v7082_v28  }
 0x458   :  { %v7494_v7 = vpop.f32.mrf.mxu0 }
 0x459   :  { %v5848_v38 = vadd.f32 %v7494_v7, %v11020_v20 }
 0x45a   :  { %v5839_v49 = vpop.f32.mrf.mxu0 }
 0x45b   :  { %v5840_v11 = vadd.f32 %v11020_v20, %v5839_v49  ;;  %v6064_v14 = vadd.f32 %v6000_v36, %v5848_v38 }
 0x45c   :  { %v7495_v63 = vpop.f32.mrf.mxu0 }
 0x45d   :  { %v5851_v55 = vadd.f32 %v7495_v63, %v11020_v20  ;;  %v6062_v45 = vadd.f32 %v5998_v15, %v5840_v11  ;;  %v6128_v37 = vmax.f32 %v6064_v14, 0.0  ;;  %v7713_v14 = vld [vmem:[%s11340_s0 + $0xb8] sm:$0xff]  }
 0x45e   :  { %v5842_v54 = vpop.f32.mrf.mxu0 }
 0x45f   :  { %v6065_v44 = vadd.f32 %v6001_v17, %v5851_v55  ;;  %v5843_v48 = vadd.f32 %v11020_v20, %v5842_v54  ;;  %v6126_v47 = vmax.f32 %v6062_v45, 0.0  ;;  %v6012_v55 = vunpack.c.l.bf16 %v7713_v14 }
 0x461   :  { %v6129_v59 = vmax.f32 %v6065_v44, 0.0  ;;  %v6063_v30 = vadd.f32 %v5999_v57, %v5843_v48  ;;  %v7714_v44 = vld [vmem:[%s11340_s0 + $0xb0] sm:$0xff]  }
 0x462   :  { %v6010_v48 = vunpack.c.l.bf16 %v7714_v44 }
 0x463   :  { %v7097_v34 = vpack.c.bf16 %v6129_v59, %v6128_v37  ;;  %v6127_v18 = vmax.f32 %v6063_v30, 0.0  ;;  %v6013_v37 = vunpack.c.h.bf16 %v7713_v14 }
 0x465   :  { %7185 = vst [vmem:[%s11346_s7 + $0x88] sm:$0xff] %v7097_v34   ;;  %v7092_v2 = vpack.c.bf16 %v6127_v18, %v6126_v47  ;;  %v6011_v34 = vunpack.c.h.bf16 %v7714_v44 }
 0x467   :  { %7184 = vst [vmem:[%s11346_s7 + $0x80] sm:$0xff] %v7092_v2  }
 0x468   :  { %v7498_v35 = vpop.f32.mrf.mxu0 }
 0x469   :  { %v5864_v29 = vadd.f32 %v7498_v35, %v11020_v20 }
 0x46a   :  { %v5855_v50 = vpop.f32.mrf.mxu0 }
 0x46b   :  { %v5856_v23 = vadd.f32 %v11020_v20, %v5855_v50  ;;  %v6068_v51 = vadd.f32 %v6004_v0, %v5864_v29 }
 0x46c   :  { %v7499_v3 = vpop.f32.mrf.mxu0 }
 0x46d   :  { %v5867_v13 = vadd.f32 %v7499_v3, %v11020_v20  ;;  %v6066_v31 = vadd.f32 %v6002_v56, %v5856_v23  ;;  %v6132_v33 = vmax.f32 %v6068_v51, 0.0 }
 0x46e   :  { %v5858_v26 = vpop.f32.mrf.mxu0 }
 0x46f   :  { %v6069_v43 = vadd.f32 %v6005_v5, %v5867_v13  ;;  %v5859_v61 = vadd.f32 %v11020_v20, %v5858_v26  ;;  %v6130_v52 = vmax.f32 %v6066_v31, 0.0  ;;  %v7715_v13 = vld [vmem:[%s11340_s0 + $0xc8] sm:$0xff]  }
 0x471   :  { %v6133_v4 = vmax.f32 %v6069_v43, 0.0  ;;  %v6067_v27 = vadd.f32 %v6003_v21, %v5859_v61  ;;  %v6016_v21 = vunpack.c.l.bf16 %v7715_v13  ;;  %v7716_v43 = vld [vmem:[%s11340_s0 + $0xc0] sm:$0xff]  }
 0x472   :  { %v6014_v61 = vunpack.c.l.bf16 %v7716_v43 }
 0x473   :  { %v7107_v1 = vpack.c.bf16 %v6133_v4, %v6132_v33  ;;  %v6131_v8 = vmax.f32 %v6067_v27, 0.0  ;;  %v6017_v33 = vunpack.c.h.bf16 %v7715_v13 }
 0x475   :  { %7187 = vst [vmem:[%s11346_s7 + $0x98] sm:$0xff] %v7107_v1   ;;  %v7102_v46 = vpack.c.bf16 %v6131_v8, %v6130_v52  ;;  %v6015_v1 = vunpack.c.h.bf16 %v7716_v43 }
 0x477   :  { %7186 = vst [vmem:[%s11346_s7 + $0x90] sm:$0xff] %v7102_v46  }
 0x478   :  { %v7502_v12 = vpop.f32.mrf.mxu0 }
 0x479   :  { %v5880_v39 = vadd.f32 %v7502_v12, %v11020_v20 }
 0x47a   :  { %v5871_v41 = vpop.f32.mrf.mxu0 }
 0x47b   :  { %v5872_v62 = vadd.f32 %v11020_v20, %v5871_v41  ;;  %v6072_v32 = vadd.f32 %v6008_v58, %v5880_v39 }
 0x47c   :  { %v7503_v6 = vpop.f32.mrf.mxu0 }
 0x47d   :  { %v5883_v9 = vadd.f32 %v7503_v6, %v11020_v20  ;;  %v6070_v28 = vadd.f32 %v6006_v60, %v5872_v62  ;;  %v6136_v25 = vmax.f32 %v6072_v32, 0.0 }
 0x47e   :  { %v5874_v10 = vpop.f32.mrf.mxu0 }
 0x47f   :  { %v6073_v7 = vadd.f32 %v6009_v22, %v5883_v9  ;;  %v5875_v38 = vadd.f32 %v11020_v20, %v5874_v10  ;;  %v6134_v53 = vmax.f32 %v6070_v28, 0.0  ;;  %v7717_v9 = vld [vmem:[%s11340_s0 + $0xd8] sm:$0xff]  }
 0x481   :  { %v6137_v36 = vmax.f32 %v6073_v7, 0.0  ;;  %v6071_v49 = vadd.f32 %v6007_v16, %v5875_v38  ;;  %v6020_v16 = vunpack.c.l.bf16 %v7717_v9  ;;  %v7718_v7 = vld [vmem:[%s11340_s0 + $0xd0] sm:$0xff]  }
 0x482   :  { %v6018_v38 = vunpack.c.l.bf16 %v7718_v7 }
 0x483   :  { %v7117_v15 = vpack.c.bf16 %v6137_v36, %v6136_v25  ;;  %v6135_v11 = vmax.f32 %v6071_v49, 0.0  ;;  %v6021_v25 = vunpack.c.h.bf16 %v7717_v9 }
 0x485   :  { %7189 = vst [vmem:[%s11346_s7 + $0xa8] sm:$0xff] %v7117_v15   ;;  %v7112_v17 = vpack.c.bf16 %v6135_v11, %v6134_v53  ;;  %v6019_v15 = vunpack.c.h.bf16 %v7718_v7 }
 0x487   :  { %7188 = vst [vmem:[%s11346_s7 + $0xa0] sm:$0xff] %v7112_v17  }
 0x488   :  { %v7506_v63 = vpop.f32.mrf.mxu0 }
 0x489   :  { %v5896_v57 = vadd.f32 %v7506_v63, %v11020_v20 }
 0x48a   :  { %v5887_v54 = vpop.f32.mrf.mxu0 }
 0x48b   :  { %v5888_v45 = vadd.f32 %v11020_v20, %v5887_v54  ;;  %v6076_v30 = vadd.f32 %v6012_v55, %v5896_v57 }
 0x48c   :  { %v7507_v59 = vpop.f32.mrf.mxu0 }
 0x48d   :  { %v5899_v47 = vadd.f32 %v7507_v59, %v11020_v20  ;;  %v6074_v2 = vadd.f32 %v6010_v48, %v5888_v45  ;;  %v6140_v19 = vmax.f32 %v6076_v30, 0.0 }
 0x48e   :  { %v5890_v18 = vpop.f32.mrf.mxu0 }
 0x48f   :  { %v6077_v35 = vadd.f32 %v6013_v37, %v5899_v47  ;;  %v5891_v29 = vadd.f32 %v11020_v20, %v5890_v18  ;;  %v6138_v23 = vmax.f32 %v6074_v2, 0.0  ;;  %v7719_v47 = vld [vmem:[%s11340_s0 + $0xe8] sm:$0xff]  }
 0x491   :  { %v6141_v0 = vmax.f32 %v6077_v35, 0.0  ;;  %v6075_v50 = vadd.f32 %v6011_v34, %v5891_v29  ;;  %v6024_v34 = vunpack.c.l.bf16 %v7719_v47  ;;  %v7720_v35 = vld [vmem:[%s11340_s0 + $0xe0] sm:$0xff]  }
 0x492   :  { %v6022_v29 = vunpack.c.l.bf16 %v7720_v35 }
 0x493   :  { %v7127_v40 = vpack.c.bf16 %v6141_v0, %v6140_v19  ;;  %v6139_v56 = vmax.f32 %v6075_v50, 0.0  ;;  %v6025_v19 = vunpack.c.h.bf16 %v7719_v47 }
 0x495   :  { %7191 = vst [vmem:[%s11346_s7 + $0xb8] sm:$0xff] %v7127_v40   ;;  %v7122_v5 = vpack.c.bf16 %v6139_v56, %v6138_v23  ;;  %v6023_v40 = vunpack.c.h.bf16 %v7720_v35 }
 0x497   :  { %7190 = vst [vmem:[%s11346_s7 + $0xb0] sm:$0xff] %v7122_v5  }
 0x498   :  { %v7510_v3 = vpop.f32.mrf.mxu0 }
 0x499   :  { %v5912_v51 = vadd.f32 %v7510_v3, %v11020_v20 }
 0x49a   :  { %v5903_v26 = vpop.f32.mrf.mxu0 }
 0x49b   :  { %v5904_v31 = vadd.f32 %v11020_v20, %v5903_v26  ;;  %v6080_v27 = vadd.f32 %v6016_v21, %v5912_v51 }
 0x49c   :  { %v7511_v4 = vpop.f32.mrf.mxu0 }
 0x49d   :  { %v5915_v52 = vadd.f32 %v7511_v4, %v11020_v20  ;;  %v6078_v46 = vadd.f32 %v6014_v61, %v5904_v31  ;;  %v6144_v42 = vmax.f32 %v6080_v27, 0.0 }
 0x49e   :  { %v5906_v8 = vpop.f32.mrf.mxu0 }
 0x49f   :  { %v6081_v12 = vadd.f32 %v6017_v33, %v5915_v52  ;;  %v5907_v39 = vadd.f32 %v11020_v20, %v5906_v8  ;;  %v6142_v62 = vmax.f32 %v6078_v46, 0.0  ;;  %v7721_v52 = vld [vmem:[%s11340_s0 + $0xf8] sm:$0xff]  }
 0x4a1   :  { %v6145_v58 = vmax.f32 %v6081_v12, 0.0  ;;  %v6079_v41 = vadd.f32 %v6015_v1, %v5907_v39  ;;  %v6028_v1 = vunpack.c.l.bf16 %v7721_v52  ;;  %v7722_v12 = vld [vmem:[%s11340_s0 + $0xf0] sm:$0xff]  }
 0x4a2   :  { %v6026_v39 = vunpack.c.l.bf16 %v7722_v12 }
 0x4a3   :  { %v7137_v24 = vpack.c.bf16 %v6145_v58, %v6144_v42  ;;  %v6143_v60 = vmax.f32 %v6079_v41, 0.0  ;;  %v6029_v42 = vunpack.c.h.bf16 %v7721_v52 }
 0x4a5   :  { %7193 = vst [vmem:[%s11346_s7 + $0xc8] sm:$0xff] %v7137_v24   ;;  %v7132_v22 = vpack.c.bf16 %v6143_v60, %v6142_v62  ;;  %v7723_v62 = vld [vmem:[%s11345_s6] ss:$0 sm:$0xff]  ;;  %v6027_v60 = vunpack.c.h.bf16 %v7722_v12 }
 0x4a7   :  { %7192 = vst [vmem:[%s11346_s7 + $0xc0] sm:$0xff] %v7132_v22  }
 0x4a8   :  { %v7514_v6 = vpop.f32.mrf.mxu0 }
 0x4a9   :  { %v5928_v32 = vadd.f32 %v7514_v6, %v11020_v20 }
 0x4aa   :  { %v5919_v10 = vpop.f32.mrf.mxu0 }
 0x4ab   :  { %v5920_v28 = vadd.f32 %v11020_v20, %v5919_v10  ;;  %v6084_v49 = vadd.f32 %v6020_v16, %v5928_v32 }
 0x4ac   :  { %v7515_v36 = vpop.f32.mrf.mxu0 }
 0x4ad   :  { %v5931_v53 = vadd.f32 %v7515_v36, %v11020_v20  ;;  %v6082_v17 = vadd.f32 %v6018_v38, %v5920_v28  ;;  %v6148_v14 = vmax.f32 %v6084_v49, 0.0 }
 0x4ae   :  { %v5922_v11 = vpop.f32.mrf.mxu0 }
 0x4af   :  { %v6085_v63 = vadd.f32 %v6021_v25, %v5931_v53  ;;  %v5923_v57 = vadd.f32 %v11020_v20, %v5922_v11  ;;  %v6146_v45 = vmax.f32 %v6082_v17, 0.0 }
 0x4b1   :  { %v6149_v55 = vmax.f32 %v6085_v63, 0.0  ;;  %v6083_v54 = vadd.f32 %v6019_v15, %v5923_v57 }
 0x4b3   :  { %v7147_v44 = vpack.c.bf16 %v6149_v55, %v6148_v14  ;;  %v6147_v48 = vmax.f32 %v6083_v54, 0.0 }
 0x4b5   :  { %7195 = vst [vmem:[%s11346_s7 + $0xd8] sm:$0xff] %v7147_v44   ;;  %v7142_v37 = vpack.c.bf16 %v6147_v48, %v6146_v45 }
 0x4b7   :  { %7194 = vst [vmem:[%s11346_s7 + $0xd0] sm:$0xff] %v7142_v37  }
 0x4b8   :  { %v7518_v59 = vpop.f32.mrf.mxu0 }
 0x4b9   :  { %v5944_v30 = vadd.f32 %v7518_v59, %v11020_v20 }
 0x4ba   :  { %v5935_v18 = vpop.f32.mrf.mxu0 }
 0x4bb   :  { %v5936_v2 = vadd.f32 %v11020_v20, %v5935_v18  ;;  %v6088_v50 = vadd.f32 %v6024_v34, %v5944_v30 }
 0x4bc   :  { %v7519_v0 = vpop.f32.mrf.mxu0 }
 0x4bd   :  { %v5947_v23 = vadd.f32 %v7519_v0, %v11020_v20  ;;  %v6086_v5 = vadd.f32 %v6022_v29, %v5936_v2  ;;  %v6152_v13 = vmax.f32 %v6088_v50, 0.0 }
 0x4be   :  { %v5938_v56 = vpop.f32.mrf.mxu0 }
 0x4bf   :  { %v6089_v3 = vadd.f32 %v6025_v19, %v5947_v23  ;;  %v5939_v51 = vadd.f32 %v11020_v20, %v5938_v56  ;;  %v6150_v31 = vmax.f32 %v6086_v5, 0.0 }
 0x4c1   :  { %v6153_v21 = vmax.f32 %v6089_v3, 0.0  ;;  %v6087_v26 = vadd.f32 %v6023_v40, %v5939_v51 }
 0x4c3   :  { %v7157_v43 = vpack.c.bf16 %v6153_v21, %v6152_v13  ;;  %v6151_v61 = vmax.f32 %v6087_v26, 0.0 }
 0x4c5   :  { %7197 = vst [vmem:[%s11346_s7 + $0xe8] sm:$0xff] %v7157_v43   ;;  %v7152_v33 = vpack.c.bf16 %v6151_v61, %v6150_v31 }
 0x4c7   :  { %7196 = vst [vmem:[%s11346_s7 + $0xe0] sm:$0xff] %v7152_v33  }
 0x4c8   :  { %v7522_v4 = vpop.f32.mrf.mxu0 }
 0x4c9   :  { %v5960_v27 = vadd.f32 %v7522_v4, %v11020_v20 }
 0x4ca   :  { %v5951_v8 = vpop.f32.mrf.mxu0 }
 0x4cb   :  { %v5952_v46 = vadd.f32 %v11020_v20, %v5951_v8  ;;  %v6092_v41 = vadd.f32 %v6028_v1, %v5960_v27 }
 0x4cc   :  { %v7523_v58 = vpop.f32.mrf.mxu0 }
 0x4cd   :  { %v5963_v24 = vadd.f32 %v7723_v62, %v7523_v58  ;;  %v6090_v6 = vadd.f32 %v6026_v39, %v5952_v46  ;;  %v6156_v16 = vmax.f32 %v6092_v41, 0.0 }
 0x4ce   :  { %v5954_v22 = vpop.f32.mrf.mxu0 }
 0x4cf   :  { %v6093_v32 = vadd.f32 %v6029_v42, %v5963_v24  ;;  %v5955_v9 = vadd.f32 %v7723_v62, %v5954_v22  ;;  %v6154_v28 = vmax.f32 %v6090_v6, 0.0 }
 0x4d1   :  { %v6157_v20 = vmax.f32 %v6093_v32, 0.0  ;;  %v6091_v10 = vadd.f32 %v6027_v60, %v5955_v9 }
 0x4d3   :  { %v7167_v7 = vpack.c.bf16 %v6157_v20, %v6156_v16  ;;  %v6155_v38 = vmax.f32 %v6091_v10, 0.0 }
 0x4d5   :  { %7199 = vst [vmem:[%s11346_s7 + $0xf8] sm:$0xff] %v7167_v7   ;;  %v7162_v25 = vpack.c.bf16 %v6155_v38, %v6154_v28 }
 0x4d7   :  { %7198 = vst [vmem:[%s11346_s7 + $0xf0] sm:$0xff] %v7162_v25  }

</bundles_post_ra>
